<compile_context>
chip_gen: v6e
topology: v6e:2x2x1
jax: 0.10.0
libtpu: 0.0.40
codegen_flags: <defaults>
</compile_context>

<pallas_src>
import numpy as np
import jax
import jax.numpy as jnp
from jax.experimental import pallas as pl
from jax.experimental.pallas import tpu as pltpu


# ----------------------------------------------------------------------------
# positional encoding table (same as the PyTorch `pos_table`)
# ----------------------------------------------------------------------------
def pos_table(n_embeddings, hidden_size):
    def get_angle(x, h):
        return x / np.power(10000, 2 * (h // 2) / hidden_size)

    tab = np.array(
        [[get_angle(i, j) for j in range(hidden_size)] for i in range(n_embeddings)]
    ).astype(np.float64)
    tab[:, 0::2] = np.sin(tab[:, 0::2])
    tab[:, 1::2] = np.cos(tab[:, 1::2])
    return tab


# ----------------------------------------------------------------------------
# fused Pallas kernel: one grid step == one lane-dense tile of Bt samples
# ----------------------------------------------------------------------------
def _pin_kernel(obs_ref, lstm_ref, m_ref, lin_ref, y_ref):
    # obs_ref : (F+1, Bt) VMEM  rows 0..F-1 = obs features, row F = prev_action
    # lstm_ref: (3H, 3)   SMEM  rows [i | g | o] gates, cols [w_obs, w_act, b_ih+b_hh]
    # m_ref   : (E, H)    SMEM  folded attention matrix  Q @ Wq^T @ Wk
    # lin_ref : (1, E+1)  SMEM  [lin_w (E values) | lin_b]
    # y_ref   : (1, Bt)   VMEM  lane-dense output row
    H = lstm_ref.shape[0] // 3
    E = m_ref.shape[0]
    F = obs_ref.shape[0] - 1

    obs = obs_ref[0:F, :]                      # (F, Bt) features on sublanes, batch on lanes
    pa = obs_ref[F:F + 1, :]                   # (1, Bt)

    # --- LSTMCell step with zero initial state (c0 = h0 = 0 -> f-gate unused)
    # Per hidden channel h: gate = act(w_obs*obs + w_act*pa + bias).
    # Scalar weights come from SMEM (scalar-unit loads; hidden under VPU work).
    h_t = []
    for h in range(H):
        zi = lstm_ref[h, 0] * obs + (lstm_ref[h, 1] * pa + lstm_ref[h, 2])
        zg = lstm_ref[H + h, 0] * obs + (lstm_ref[H + h, 1] * pa + lstm_ref[H + h, 2])
        zo = lstm_ref[2 * H + h, 0] * obs + (lstm_ref[2 * H + h, 1] * pa + lstm_ref[2 * H + h, 2])
        c = jax.nn.sigmoid(zi) * jnp.tanh(zg)
        h_t.append(jax.nn.sigmoid(zo) * jnp.tanh(c))        # (F, Bt)

    # --- attention + latent code + final linear -------------------------------
    # attn[e] = tanh(sum_h M[e,h] * h_t[h])        exact f32 VPU MAC (H = 8 terms)
    # latent[e] = tanh(sum_f attn[e,f] * obs[f])   sublane reduce (XLU)
    # y = tanh(sum_e lin_w[e] * latent[e] + lin_b)
    s = jnp.zeros(pa.shape, jnp.float32)                     # (1, Bt)
    for e in range(E):
        acc = m_ref[e, 0] * h_t[0]
        for h in range(1, H):
            acc = acc + m_ref[e, h] * h_t[h]                 # (F, Bt)
        attn_e = jnp.tanh(acc)
        latent_e = jnp.tanh(jnp.sum(attn_e * obs, axis=0, keepdims=True))   # (1, Bt)
        s = s + lin_ref[0, e] * latent_e
    y_ref[...] = jnp.tanh(s + lin_ref[0, E])                 # lane-dense store


# ----------------------------------------------------------------------------
# wrappers
# ----------------------------------------------------------------------------
def permutation_invariant_network_batched(obs_b, prev_actions, params, block_b=128):
    """obs_b: (B, n_features) f32 ; prev_actions: (B,) f32 ; returns (B,) f32."""
    obs_b = jnp.asarray(obs_b, jnp.float32)
    B, F = obs_b.shape
    pa = jnp.asarray(prev_actions, jnp.float32).reshape(B)

    lstm_pk = params["lstm_pk"]                  # (3H, 3)
    m_pk = params["m_pk"]                        # (E, H)
    lin_pk = params["lin_pk"]                    # (1, E+1)
    H = lstm_pk.shape[0] // 3
    E = m_pk.shape[0]

    Bt = int(block_b)
    n_blocks = max(1, -(-B // Bt))
    Bpad = n_blocks * Bt

    # Batch on the lane (last) axis; prev_action appended as an extra feature
    # row so the kernel has a single lane-dense data operand.
    obs_aug = jnp.zeros((F + 1, Bpad), jnp.float32)
    obs_aug = obs_aug.at[:F, :B].set(obs_b.T)
    obs_aug = obs_aug.at[F, :B].set(pa)

    flops_per = 2 * E * H * F + 2 * E * F + 12 * H * F + 3 * E
    trans_per = 4 * H * F + E * F + E + 1
    cost = pl.CostEstimate(
        flops=int(Bpad * flops_per),
        transcendentals=int(Bpad * trans_per),
        bytes_accessed=int(4 * (obs_aug.size + Bpad + lstm_pk.size + m_pk.size + lin_pk.size)),
    )

    y = pl.pallas_call(
        _pin_kernel,
        out_shape=jax.ShapeDtypeStruct((1, Bpad), jnp.float32),
        grid=(n_blocks,),
        in_specs=[
            pl.BlockSpec((F + 1, Bt), lambda b: (0, b)),           # lane-dense sample tile
            pl.BlockSpec(memory_space=pltpu.MemorySpace.SMEM),     # resident scalar tables
            pl.BlockSpec(memory_space=pltpu.MemorySpace.SMEM),
            pl.BlockSpec(memory_space=pltpu.MemorySpace.SMEM),
        ],
        out_specs=pl.BlockSpec((1, Bt), lambda b: (0, b)),         # lane-dense output row
        compiler_params=pltpu.CompilerParams(
            dimension_semantics=("parallel",)),                    # tiles shard across TCs (v7x)
        cost_estimate=cost,
    )(obs_aug, lstm_pk, m_pk, lin_pk)
    return y[0, :B]


def permutation_invariant_network(obs, prev_action, params):
    """obs: (n_features,) f32 ; prev_action: python/np float ; returns (1,) f32."""
    obs_b = jnp.asarray(obs, jnp.float32).reshape(1, -1)
    pa = jnp.asarray([float(prev_action)], jnp.float32)
    return permutation_invariant_network_batched(obs_b, pa, params)


# ----------------------------------------------------------------------------
# parameter construction (raw PyTorch-layout weights) + host-side folding/packing
# ----------------------------------------------------------------------------
def make_raw_params(key, n_embeddings=16, proj_dim=32, hidden_size=8):
    ks = jax.random.split(key, 8)

    def uni(k, shape, fan_in):
        bound = 1.0 / np.sqrt(fan_in)
        return np.asarray(jax.random.uniform(k, shape, jnp.float32, -bound, bound))

    return {
        "n_embeddings": n_embeddings,
        "proj_dim": proj_dim,
        "hidden_size": hidden_size,
        "Q": pos_table(n_embeddings, hidden_size).astype(np.float32),
        # nn.LSTMCell(input_size=2, hidden_size=H): PyTorch layouts
        "w_ih": uni(ks[0], (4 * hidden_size, 2), hidden_size),
        "w_hh": uni(ks[1], (4 * hidden_size, hidden_size), hidden_size),
        "b_ih": uni(ks[2], (4 * hidden_size,), hidden_size),
        "b_hh": uni(ks[3], (4 * hidden_size,), hidden_size),
        # AttentionMatrix projections (bias=False), PyTorch (out, in) layout
        "wq": uni(ks[4], (proj_dim, hidden_size), hidden_size),
        "wk": uni(ks[5], (proj_dim, hidden_size), hidden_size),
        # final Linear(n_embeddings -> 1)
        "lin_w": uni(ks[6], (1, n_embeddings), n_embeddings),
        "lin_b": uni(ks[7], (1,), n_embeddings),
    }


def pack_params(raw):
    """Fold constants on the host and pack them into three small SMEM tables."""
    H = raw["hidden_size"]
    f64 = np.float64

    w_ih = np.asarray(raw["w_ih"], f64)                         # (4H, 2)
    bias = np.asarray(raw["b_ih"], f64) + np.asarray(raw["b_hh"], f64)
    keep = np.r_[0:H, 2 * H:3 * H, 3 * H:4 * H]                 # i, g, o rows (f unused: c0 == 0)
    lstm_pk = np.stack([w_ih[keep, 0], w_ih[keep, 1], bias[keep]], axis=1)   # (3H, 3)

    # (Q Wq^T)(h Wk^T)^T == (Q Wq^T Wk) h^T  -> fold the three constant matrices
    m_pk = (np.asarray(raw["Q"], f64) @ np.asarray(raw["wq"], f64).T
            @ np.asarray(raw["wk"], f64))                       # (E, H)

    lin_pk = np.concatenate(
        [np.asarray(raw["lin_w"], f64)[0], np.asarray(raw["lin_b"], f64)])[None, :]   # (1, E+1)

    return {
        "lstm_pk": jnp.asarray(lstm_pk, jnp.float32),
        "m_pk": jnp.asarray(m_pk, jnp.float32),
        "lin_pk": jnp.asarray(lin_pk, jnp.float32),
    }


# ----------------------------------------------------------------------------
# numpy float64 reference (mirrors the PyTorch forward exactly, incl. zero state)
# ----------------------------------------------------------------------------
def reference_forward(obs, prev_action, raw):
    f64 = np.float64
    obs = np.asarray(obs, f64)
    F = obs.shape[0]
    H = raw["hidden_size"]
    h0 = np.zeros((F, H), f64)
    c0 = np.zeros((F, H), f64)

    x = np.concatenate([obs[:, None], np.full((F, 1), prev_action, f64)], axis=1)
    gates = (x @ raw["w_ih"].astype(f64).T + h0 @ raw["w_hh"].astype(f64).T
             + raw["b_ih"].astype(f64) + raw["b_hh"].astype(f64))

    def sig(z):
        return 1.0 / (1.0 + np.exp(-z))

    i = sig(gates[:, 0 * H:1 * H])
    f = sig(gates[:, 1 * H:2 * H])
    g = np.tanh(gates[:, 2 * H:3 * H])
    o = sig(gates[:, 3 * H:4 * H])
    c = f * c0 + i * g
    h = o * np.tanh(c)

    q = raw["Q"].astype(f64) @ raw["wq"].astype(f64).T
    k = h @ raw["wk"].astype(f64).T
    attn = np.tanh(q @ k.T)
    latent = np.tanh(attn @ obs[:, None])[:, 0]
    y = np.tanh(latent @ raw["lin_w"].astype(f64)[0] + raw["lin_b"].astype(f64)[0])
    return np.array([y])


if __name__ == "__main__":
    key = jax.random.PRNGKey(0)
    k_param, k_obs, k_act = jax.random.split(key, 3)

    n_embeddings, proj_dim, hidden_size = 16, 32, 8
    n_features = 16
    batch = 8

    raw = make_raw_params(k_param, n_embeddings, proj_dim, hidden_size)
    params = pack_params(raw)

    # --- single forward (matches the PyTorch module call with fresh state) ---
    obs = jax.random.uniform(k_obs, (n_features,), jnp.float32, -1.0, 1.0)
    prev_action = 0.5
    y = jax.block_until_ready(permutation_invariant_network(obs, prev_action, params))
    y_ref = reference_forward(np.asarray(obs), prev_action, raw)
    np.testing.assert_allclose(np.asarray(y), y_ref, rtol=1e-4, atol=1e-5)

    # --- small batch: one lane-dense tile, grid=(1,) --------------------------
    obs_b = jax.random.uniform(k_obs, (batch, n_features), jnp.float32, -1.0, 1.0)
    prev_b = jax.random.uniform(k_act, (batch,), jnp.float32, -1.0, 1.0)
    y_b = jax.block_until_ready(
        permutation_invariant_network_batched(obs_b, prev_b, params))
    y_b_ref = np.concatenate([
        reference_forward(np.asarray(obs_b[i]), float(prev_b[i]), raw)
        for i in range(batch)])
    np.testing.assert_allclose(np.asarray(y_b), y_b_ref, rtol=1e-4, atol=1e-5)

    # --- larger batch: multiple lane-dense tiles, grid=(2,) -------------------
    big = 200
    obs_big = jax.random.uniform(k_obs, (big, n_features), jnp.float32, -1.0, 1.0)
    prev_big = jax.random.uniform(k_act, (big,), jnp.float32, -1.0, 1.0)
    y_big = jax.block_until_ready(
        permutation_invariant_network_batched(obs_big, prev_big, params))
    y_big_ref = np.concatenate([
        reference_forward(np.asarray(obs_big[i]), float(prev_big[i]), raw)
        for i in range(big)])
    np.testing.assert_allclose(np.asarray(y_big), y_big_ref, rtol=1e-4, atol=1e-5)

    print("KERNEL_OK")
</pallas_src>

<mosaic_0001>
module attributes {stable_mosaic.version = 11 : i64} {
  func.func @_pin_kernel(%arg0: i32, %arg1: memref<17x128xf32, #tpu.memory_space<vmem>>, %arg2: memref<24x3xf32, #tpu.memory_space<smem>>, %arg3: memref<16x8xf32, #tpu.memory_space<smem>>, %arg4: memref<1x17xf32, #tpu.memory_space<smem>>, %arg5: memref<1x128xf32, #tpu.memory_space<vmem>>) attributes {dimension_semantics = [#tpu.dimension_semantics<parallel>], iteration_bounds = array<i64: 1>, scalar_prefetch = 0 : i64, scratch_operands = 0 : i64, tpu.core_type = #tpu.core_type<tc>, window_params = [{transform_indices = @transform_0, window_bounds = array<i64: 17, 128>}, {transform_indices = @transform_1, window_bounds = array<i64: 24, 3>}, {transform_indices = @transform_2, window_bounds = array<i64: 16, 8>}, {transform_indices = @transform_3, window_bounds = array<i64: 1, 17>}, {transform_indices = @transform_4, window_bounds = array<i64: 1, 128>}]} {
    %c0 = arith.constant 0 : index
    %c0_0 = arith.constant 0 : index
    %0 = vector.load %arg1[%c0, %c0_0] : memref<17x128xf32, #tpu.memory_space<vmem>>, vector<16x128xf32>
    %c16 = arith.constant 16 : index
    %c0_1 = arith.constant 0 : index
    %1 = vector.load %arg1[%c16, %c0_1] : memref<17x128xf32, #tpu.memory_space<vmem>>, vector<1x128xf32>
    %c0_2 = arith.constant 0 : index
    %c0_3 = arith.constant 0 : index
    %2 = memref.load %arg2[%c0_2, %c0_3] : memref<24x3xf32, #tpu.memory_space<smem>>
    %3 = vector.broadcast %2 : f32 to vector<16x128xf32>
    %4 = arith.mulf %3, %0 : vector<16x128xf32>
    %c0_4 = arith.constant 0 : index
    %c1 = arith.constant 1 : index
    %5 = memref.load %arg2[%c0_4, %c1] : memref<24x3xf32, #tpu.memory_space<smem>>
    %6 = vector.broadcast %5 : f32 to vector<1x128xf32>
    %7 = arith.mulf %6, %1 : vector<1x128xf32>
    %c0_5 = arith.constant 0 : index
    %c2 = arith.constant 2 : index
    %8 = memref.load %arg2[%c0_5, %c2] : memref<24x3xf32, #tpu.memory_space<smem>>
    %9 = vector.broadcast %8 : f32 to vector<1x128xf32>
    %10 = arith.addf %7, %9 : vector<1x128xf32>
    %11 = vector.broadcast %10 : vector<1x128xf32> to vector<16x128xf32>
    %12 = arith.addf %4, %11 : vector<16x128xf32>
    %c8 = arith.constant 8 : index
    %c0_6 = arith.constant 0 : index
    %13 = memref.load %arg2[%c8, %c0_6] : memref<24x3xf32, #tpu.memory_space<smem>>
    %14 = vector.broadcast %13 : f32 to vector<16x128xf32>
    %15 = arith.mulf %14, %0 : vector<16x128xf32>
    %c8_7 = arith.constant 8 : index
    %c1_8 = arith.constant 1 : index
    %16 = memref.load %arg2[%c8_7, %c1_8] : memref<24x3xf32, #tpu.memory_space<smem>>
    %17 = vector.broadcast %16 : f32 to vector<1x128xf32>
    %18 = arith.mulf %17, %1 : vector<1x128xf32>
    %c8_9 = arith.constant 8 : index
    %c2_10 = arith.constant 2 : index
    %19 = memref.load %arg2[%c8_9, %c2_10] : memref<24x3xf32, #tpu.memory_space<smem>>
    %20 = vector.broadcast %19 : f32 to vector<1x128xf32>
    %21 = arith.addf %18, %20 : vector<1x128xf32>
    %22 = vector.broadcast %21 : vector<1x128xf32> to vector<16x128xf32>
    %23 = arith.addf %15, %22 : vector<16x128xf32>
    %c16_11 = arith.constant 16 : index
    %c0_12 = arith.constant 0 : index
    %24 = memref.load %arg2[%c16_11, %c0_12] : memref<24x3xf32, #tpu.memory_space<smem>>
    %25 = vector.broadcast %24 : f32 to vector<16x128xf32>
    %26 = arith.mulf %25, %0 : vector<16x128xf32>
    %c16_13 = arith.constant 16 : index
    %c1_14 = arith.constant 1 : index
    %27 = memref.load %arg2[%c16_13, %c1_14] : memref<24x3xf32, #tpu.memory_space<smem>>
    %28 = vector.broadcast %27 : f32 to vector<1x128xf32>
    %29 = arith.mulf %28, %1 : vector<1x128xf32>
    %c16_15 = arith.constant 16 : index
    %c2_16 = arith.constant 2 : index
    %30 = memref.load %arg2[%c16_15, %c2_16] : memref<24x3xf32, #tpu.memory_space<smem>>
    %31 = vector.broadcast %30 : f32 to vector<1x128xf32>
    %32 = arith.addf %29, %31 : vector<1x128xf32>
    %33 = vector.broadcast %32 : vector<1x128xf32> to vector<16x128xf32>
    %34 = arith.addf %26, %33 : vector<16x128xf32>
    %35 = arith.negf %12 : vector<16x128xf32>
    %36 = math.exp %35 : vector<16x128xf32>
    %cst = arith.constant 1.000000e+00 : f32
    %37 = vector.broadcast %cst : f32 to vector<16x128xf32>
    %38 = arith.addf %37, %36 : vector<16x128xf32>
    %39 = arith.divf %37, %38 : vector<16x128xf32>
    %40 = math.tanh %23 : vector<16x128xf32>
    %41 = arith.mulf %39, %40 : vector<16x128xf32>
    %42 = arith.negf %34 : vector<16x128xf32>
    %43 = math.exp %42 : vector<16x128xf32>
    %cst_17 = arith.constant 1.000000e+00 : f32
    %44 = vector.broadcast %cst_17 : f32 to vector<16x128xf32>
    %45 = arith.addf %44, %43 : vector<16x128xf32>
    %46 = arith.divf %44, %45 : vector<16x128xf32>
    %47 = math.tanh %41 : vector<16x128xf32>
    %48 = arith.mulf %46, %47 : vector<16x128xf32>
    %c1_18 = arith.constant 1 : index
    %c0_19 = arith.constant 0 : index
    %49 = memref.load %arg2[%c1_18, %c0_19] : memref<24x3xf32, #tpu.memory_space<smem>>
    %50 = vector.broadcast %49 : f32 to vector<16x128xf32>
    %51 = arith.mulf %50, %0 : vector<16x128xf32>
    %c1_20 = arith.constant 1 : index
    %c1_21 = arith.constant 1 : index
    %52 = memref.load %arg2[%c1_20, %c1_21] : memref<24x3xf32, #tpu.memory_space<smem>>
    %53 = vector.broadcast %52 : f32 to vector<1x128xf32>
    %54 = arith.mulf %53, %1 : vector<1x128xf32>
    %c1_22 = arith.constant 1 : index
    %c2_23 = arith.constant 2 : index
    %55 = memref.load %arg2[%c1_22, %c2_23] : memref<24x3xf32, #tpu.memory_space<smem>>
    %56 = vector.broadcast %55 : f32 to vector<1x128xf32>
    %57 = arith.addf %54, %56 : vector<1x128xf32>
    %58 = vector.broadcast %57 : vector<1x128xf32> to vector<16x128xf32>
    %59 = arith.addf %51, %58 : vector<16x128xf32>
    %c9 = arith.constant 9 : index
    %c0_24 = arith.constant 0 : index
    %60 = memref.load %arg2[%c9, %c0_24] : memref<24x3xf32, #tpu.memory_space<smem>>
    %61 = vector.broadcast %60 : f32 to vector<16x128xf32>
    %62 = arith.mulf %61, %0 : vector<16x128xf32>
    %c9_25 = arith.constant 9 : index
    %c1_26 = arith.constant 1 : index
    %63 = memref.load %arg2[%c9_25, %c1_26] : memref<24x3xf32, #tpu.memory_space<smem>>
    %64 = vector.broadcast %63 : f32 to vector<1x128xf32>
    %65 = arith.mulf %64, %1 : vector<1x128xf32>
    %c9_27 = arith.constant 9 : index
    %c2_28 = arith.constant 2 : index
    %66 = memref.load %arg2[%c9_27, %c2_28] : memref<24x3xf32, #tpu.memory_space<smem>>
    %67 = vector.broadcast %66 : f32 to vector<1x128xf32>
    %68 = arith.addf %65, %67 : vector<1x128xf32>
    %69 = vector.broadcast %68 : vector<1x128xf32> to vector<16x128xf32>
    %70 = arith.addf %62, %69 : vector<16x128xf32>
    %c17 = arith.constant 17 : index
    %c0_29 = arith.constant 0 : index
    %71 = memref.load %arg2[%c17, %c0_29] : memref<24x3xf32, #tpu.memory_space<smem>>
    %72 = vector.broadcast %71 : f32 to vector<16x128xf32>
    %73 = arith.mulf %72, %0 : vector<16x128xf32>
    %c17_30 = arith.constant 17 : index
    %c1_31 = arith.constant 1 : index
    %74 = memref.load %arg2[%c17_30, %c1_31] : memref<24x3xf32, #tpu.memory_space<smem>>
    %75 = vector.broadcast %74 : f32 to vector<1x128xf32>
    %76 = arith.mulf %75, %1 : vector<1x128xf32>
    %c17_32 = arith.constant 17 : index
    %c2_33 = arith.constant 2 : index
    %77 = memref.load %arg2[%c17_32, %c2_33] : memref<24x3xf32, #tpu.memory_space<smem>>
    %78 = vector.broadcast %77 : f32 to vector<1x128xf32>
    %79 = arith.addf %76, %78 : vector<1x128xf32>
    %80 = vector.broadcast %79 : vector<1x128xf32> to vector<16x128xf32>
    %81 = arith.addf %73, %80 : vector<16x128xf32>
    %82 = arith.negf %59 : vector<16x128xf32>
    %83 = math.exp %82 : vector<16x128xf32>
    %cst_34 = arith.constant 1.000000e+00 : f32
    %84 = vector.broadcast %cst_34 : f32 to vector<16x128xf32>
    %85 = arith.addf %84, %83 : vector<16x128xf32>
    %86 = arith.divf %84, %85 : vector<16x128xf32>
    %87 = math.tanh %70 : vector<16x128xf32>
    %88 = arith.mulf %86, %87 : vector<16x128xf32>
    %89 = arith.negf %81 : vector<16x128xf32>
    %90 = math.exp %89 : vector<16x128xf32>
    %cst_35 = arith.constant 1.000000e+00 : f32
    %91 = vector.broadcast %cst_35 : f32 to vector<16x128xf32>
    %92 = arith.addf %91, %90 : vector<16x128xf32>
    %93 = arith.divf %91, %92 : vector<16x128xf32>
    %94 = math.tanh %88 : vector<16x128xf32>
    %95 = arith.mulf %93, %94 : vector<16x128xf32>
    %c2_36 = arith.constant 2 : index
    %c0_37 = arith.constant 0 : index
    %96 = memref.load %arg2[%c2_36, %c0_37] : memref<24x3xf32, #tpu.memory_space<smem>>
    %97 = vector.broadcast %96 : f32 to vector<16x128xf32>
    %98 = arith.mulf %97, %0 : vector<16x128xf32>
    %c2_38 = arith.constant 2 : index
    %c1_39 = arith.constant 1 : index
    %99 = memref.load %arg2[%c2_38, %c1_39] : memref<24x3xf32, #tpu.memory_space<smem>>
    %100 = vector.broadcast %99 : f32 to vector<1x128xf32>
    %101 = arith.mulf %100, %1 : vector<1x128xf32>
    %c2_40 = arith.constant 2 : index
    %c2_41 = arith.constant 2 : index
    %102 = memref.load %arg2[%c2_40, %c2_41] : memref<24x3xf32, #tpu.memory_space<smem>>
    %103 = vector.broadcast %102 : f32 to vector<1x128xf32>
    %104 = arith.addf %101, %103 : vector<1x128xf32>
    %105 = vector.broadcast %104 : vector<1x128xf32> to vector<16x128xf32>
    %106 = arith.addf %98, %105 : vector<16x128xf32>
    %c10 = arith.constant 10 : index
    %c0_42 = arith.constant 0 : index
    %107 = memref.load %arg2[%c10, %c0_42] : memref<24x3xf32, #tpu.memory_space<smem>>
    %108 = vector.broadcast %107 : f32 to vector<16x128xf32>
    %109 = arith.mulf %108, %0 : vector<16x128xf32>
    %c10_43 = arith.constant 10 : index
    %c1_44 = arith.constant 1 : index
    %110 = memref.load %arg2[%c10_43, %c1_44] : memref<24x3xf32, #tpu.memory_space<smem>>
    %111 = vector.broadcast %110 : f32 to vector<1x128xf32>
    %112 = arith.mulf %111, %1 : vector<1x128xf32>
    %c10_45 = arith.constant 10 : index
    %c2_46 = arith.constant 2 : index
    %113 = memref.load %arg2[%c10_45, %c2_46] : memref<24x3xf32, #tpu.memory_space<smem>>
    %114 = vector.broadcast %113 : f32 to vector<1x128xf32>
    %115 = arith.addf %112, %114 : vector<1x128xf32>
    %116 = vector.broadcast %115 : vector<1x128xf32> to vector<16x128xf32>
    %117 = arith.addf %109, %116 : vector<16x128xf32>
    %c18 = arith.constant 18 : index
    %c0_47 = arith.constant 0 : index
    %118 = memref.load %arg2[%c18, %c0_47] : memref<24x3xf32, #tpu.memory_space<smem>>
    %119 = vector.broadcast %118 : f32 to vector<16x128xf32>
    %120 = arith.mulf %119, %0 : vector<16x128xf32>
    %c18_48 = arith.constant 18 : index
    %c1_49 = arith.constant 1 : index
    %121 = memref.load %arg2[%c18_48, %c1_49] : memref<24x3xf32, #tpu.memory_space<smem>>
    %122 = vector.broadcast %121 : f32 to vector<1x128xf32>
    %123 = arith.mulf %122, %1 : vector<1x128xf32>
    %c18_50 = arith.constant 18 : index
    %c2_51 = arith.constant 2 : index
    %124 = memref.load %arg2[%c18_50, %c2_51] : memref<24x3xf32, #tpu.memory_space<smem>>
    %125 = vector.broadcast %124 : f32 to vector<1x128xf32>
    %126 = arith.addf %123, %125 : vector<1x128xf32>
    %127 = vector.broadcast %126 : vector<1x128xf32> to vector<16x128xf32>
    %128 = arith.addf %120, %127 : vector<16x128xf32>
    %129 = arith.negf %106 : vector<16x128xf32>
    %130 = math.exp %129 : vector<16x128xf32>
    %cst_52 = arith.constant 1.000000e+00 : f32
    %131 = vector.broadcast %cst_52 : f32 to vector<16x128xf32>
    %132 = arith.addf %131, %130 : vector<16x128xf32>
    %133 = arith.divf %131, %132 : vector<16x128xf32>
    %134 = math.tanh %117 : vector<16x128xf32>
    %135 = arith.mulf %133, %134 : vector<16x128xf32>
    %136 = arith.negf %128 : vector<16x128xf32>
    %137 = math.exp %136 : vector<16x128xf32>
    %cst_53 = arith.constant 1.000000e+00 : f32
    %138 = vector.broadcast %cst_53 : f32 to vector<16x128xf32>
    %139 = arith.addf %138, %137 : vector<16x128xf32>
    %140 = arith.divf %138, %139 : vector<16x128xf32>
    %141 = math.tanh %135 : vector<16x128xf32>
    %142 = arith.mulf %140, %141 : vector<16x128xf32>
    %c3 = arith.constant 3 : index
    %c0_54 = arith.constant 0 : index
    %143 = memref.load %arg2[%c3, %c0_54] : memref<24x3xf32, #tpu.memory_space<smem>>
    %144 = vector.broadcast %143 : f32 to vector<16x128xf32>
    %145 = arith.mulf %144, %0 : vector<16x128xf32>
    %c3_55 = arith.constant 3 : index
    %c1_56 = arith.constant 1 : index
    %146 = memref.load %arg2[%c3_55, %c1_56] : memref<24x3xf32, #tpu.memory_space<smem>>
    %147 = vector.broadcast %146 : f32 to vector<1x128xf32>
    %148 = arith.mulf %147, %1 : vector<1x128xf32>
    %c3_57 = arith.constant 3 : index
    %c2_58 = arith.constant 2 : index
    %149 = memref.load %arg2[%c3_57, %c2_58] : memref<24x3xf32, #tpu.memory_space<smem>>
    %150 = vector.broadcast %149 : f32 to vector<1x128xf32>
    %151 = arith.addf %148, %150 : vector<1x128xf32>
    %152 = vector.broadcast %151 : vector<1x128xf32> to vector<16x128xf32>
    %153 = arith.addf %145, %152 : vector<16x128xf32>
    %c11 = arith.constant 11 : index
    %c0_59 = arith.constant 0 : index
    %154 = memref.load %arg2[%c11, %c0_59] : memref<24x3xf32, #tpu.memory_space<smem>>
    %155 = vector.broadcast %154 : f32 to vector<16x128xf32>
    %156 = arith.mulf %155, %0 : vector<16x128xf32>
    %c11_60 = arith.constant 11 : index
    %c1_61 = arith.constant 1 : index
    %157 = memref.load %arg2[%c11_60, %c1_61] : memref<24x3xf32, #tpu.memory_space<smem>>
    %158 = vector.broadcast %157 : f32 to vector<1x128xf32>
    %159 = arith.mulf %158, %1 : vector<1x128xf32>
    %c11_62 = arith.constant 11 : index
    %c2_63 = arith.constant 2 : index
    %160 = memref.load %arg2[%c11_62, %c2_63] : memref<24x3xf32, #tpu.memory_space<smem>>
    %161 = vector.broadcast %160 : f32 to vector<1x128xf32>
    %162 = arith.addf %159, %161 : vector<1x128xf32>
    %163 = vector.broadcast %162 : vector<1x128xf32> to vector<16x128xf32>
    %164 = arith.addf %156, %163 : vector<16x128xf32>
    %c19 = arith.constant 19 : index
    %c0_64 = arith.constant 0 : index
    %165 = memref.load %arg2[%c19, %c0_64] : memref<24x3xf32, #tpu.memory_space<smem>>
    %166 = vector.broadcast %165 : f32 to vector<16x128xf32>
    %167 = arith.mulf %166, %0 : vector<16x128xf32>
    %c19_65 = arith.constant 19 : index
    %c1_66 = arith.constant 1 : index
    %168 = memref.load %arg2[%c19_65, %c1_66] : memref<24x3xf32, #tpu.memory_space<smem>>
    %169 = vector.broadcast %168 : f32 to vector<1x128xf32>
    %170 = arith.mulf %169, %1 : vector<1x128xf32>
    %c19_67 = arith.constant 19 : index
    %c2_68 = arith.constant 2 : index
    %171 = memref.load %arg2[%c19_67, %c2_68] : memref<24x3xf32, #tpu.memory_space<smem>>
    %172 = vector.broadcast %171 : f32 to vector<1x128xf32>
    %173 = arith.addf %170, %172 : vector<1x128xf32>
    %174 = vector.broadcast %173 : vector<1x128xf32> to vector<16x128xf32>
    %175 = arith.addf %167, %174 : vector<16x128xf32>
    %176 = arith.negf %153 : vector<16x128xf32>
    %177 = math.exp %176 : vector<16x128xf32>
    %cst_69 = arith.constant 1.000000e+00 : f32
    %178 = vector.broadcast %cst_69 : f32 to vector<16x128xf32>
    %179 = arith.addf %178, %177 : vector<16x128xf32>
    %180 = arith.divf %178, %179 : vector<16x128xf32>
    %181 = math.tanh %164 : vector<16x128xf32>
    %182 = arith.mulf %180, %181 : vector<16x128xf32>
    %183 = arith.negf %175 : vector<16x128xf32>
    %184 = math.exp %183 : vector<16x128xf32>
    %cst_70 = arith.constant 1.000000e+00 : f32
    %185 = vector.broadcast %cst_70 : f32 to vector<16x128xf32>
    %186 = arith.addf %185, %184 : vector<16x128xf32>
    %187 = arith.divf %185, %186 : vector<16x128xf32>
    %188 = math.tanh %182 : vector<16x128xf32>
    %189 = arith.mulf %187, %188 : vector<16x128xf32>
    %c4 = arith.constant 4 : index
    %c0_71 = arith.constant 0 : index
    %190 = memref.load %arg2[%c4, %c0_71] : memref<24x3xf32, #tpu.memory_space<smem>>
    %191 = vector.broadcast %190 : f32 to vector<16x128xf32>
    %192 = arith.mulf %191, %0 : vector<16x128xf32>
    %c4_72 = arith.constant 4 : index
    %c1_73 = arith.constant 1 : index
    %193 = memref.load %arg2[%c4_72, %c1_73] : memref<24x3xf32, #tpu.memory_space<smem>>
    %194 = vector.broadcast %193 : f32 to vector<1x128xf32>
    %195 = arith.mulf %194, %1 : vector<1x128xf32>
    %c4_74 = arith.constant 4 : index
    %c2_75 = arith.constant 2 : index
    %196 = memref.load %arg2[%c4_74, %c2_75] : memref<24x3xf32, #tpu.memory_space<smem>>
    %197 = vector.broadcast %196 : f32 to vector<1x128xf32>
    %198 = arith.addf %195, %197 : vector<1x128xf32>
    %199 = vector.broadcast %198 : vector<1x128xf32> to vector<16x128xf32>
    %200 = arith.addf %192, %199 : vector<16x128xf32>
    %c12 = arith.constant 12 : index
    %c0_76 = arith.constant 0 : index
    %201 = memref.load %arg2[%c12, %c0_76] : memref<24x3xf32, #tpu.memory_space<smem>>
    %202 = vector.broadcast %201 : f32 to vector<16x128xf32>
    %203 = arith.mulf %202, %0 : vector<16x128xf32>
    %c12_77 = arith.constant 12 : index
    %c1_78 = arith.constant 1 : index
    %204 = memref.load %arg2[%c12_77, %c1_78] : memref<24x3xf32, #tpu.memory_space<smem>>
    %205 = vector.broadcast %204 : f32 to vector<1x128xf32>
    %206 = arith.mulf %205, %1 : vector<1x128xf32>
    %c12_79 = arith.constant 12 : index
    %c2_80 = arith.constant 2 : index
    %207 = memref.load %arg2[%c12_79, %c2_80] : memref<24x3xf32, #tpu.memory_space<smem>>
    %208 = vector.broadcast %207 : f32 to vector<1x128xf32>
    %209 = arith.addf %206, %208 : vector<1x128xf32>
    %210 = vector.broadcast %209 : vector<1x128xf32> to vector<16x128xf32>
    %211 = arith.addf %203, %210 : vector<16x128xf32>
    %c20 = arith.constant 20 : index
    %c0_81 = arith.constant 0 : index
    %212 = memref.load %arg2[%c20, %c0_81] : memref<24x3xf32, #tpu.memory_space<smem>>
    %213 = vector.broadcast %212 : f32 to vector<16x128xf32>
    %214 = arith.mulf %213, %0 : vector<16x128xf32>
    %c20_82 = arith.constant 20 : index
    %c1_83 = arith.constant 1 : index
    %215 = memref.load %arg2[%c20_82, %c1_83] : memref<24x3xf32, #tpu.memory_space<smem>>
    %216 = vector.broadcast %215 : f32 to vector<1x128xf32>
    %217 = arith.mulf %216, %1 : vector<1x128xf32>
    %c20_84 = arith.constant 20 : index
    %c2_85 = arith.constant 2 : index
    %218 = memref.load %arg2[%c20_84, %c2_85] : memref<24x3xf32, #tpu.memory_space<smem>>
    %219 = vector.broadcast %218 : f32 to vector<1x128xf32>
    %220 = arith.addf %217, %219 : vector<1x128xf32>
    %221 = vector.broadcast %220 : vector<1x128xf32> to vector<16x128xf32>
    %222 = arith.addf %214, %221 : vector<16x128xf32>
    %223 = arith.negf %200 : vector<16x128xf32>
    %224 = math.exp %223 : vector<16x128xf32>
    %cst_86 = arith.constant 1.000000e+00 : f32
    %225 = vector.broadcast %cst_86 : f32 to vector<16x128xf32>
    %226 = arith.addf %225, %224 : vector<16x128xf32>
    %227 = arith.divf %225, %226 : vector<16x128xf32>
    %228 = math.tanh %211 : vector<16x128xf32>
    %229 = arith.mulf %227, %228 : vector<16x128xf32>
    %230 = arith.negf %222 : vector<16x128xf32>
    %231 = math.exp %230 : vector<16x128xf32>
    %cst_87 = arith.constant 1.000000e+00 : f32
    %232 = vector.broadcast %cst_87 : f32 to vector<16x128xf32>
    %233 = arith.addf %232, %231 : vector<16x128xf32>
    %234 = arith.divf %232, %233 : vector<16x128xf32>
    %235 = math.tanh %229 : vector<16x128xf32>
    %236 = arith.mulf %234, %235 : vector<16x128xf32>
    %c5 = arith.constant 5 : index
    %c0_88 = arith.constant 0 : index
    %237 = memref.load %arg2[%c5, %c0_88] : memref<24x3xf32, #tpu.memory_space<smem>>
    %238 = vector.broadcast %237 : f32 to vector<16x128xf32>
    %239 = arith.mulf %238, %0 : vector<16x128xf32>
    %c5_89 = arith.constant 5 : index
    %c1_90 = arith.constant 1 : index
    %240 = memref.load %arg2[%c5_89, %c1_90] : memref<24x3xf32, #tpu.memory_space<smem>>
    %241 = vector.broadcast %240 : f32 to vector<1x128xf32>
    %242 = arith.mulf %241, %1 : vector<1x128xf32>
    %c5_91 = arith.constant 5 : index
    %c2_92 = arith.constant 2 : index
    %243 = memref.load %arg2[%c5_91, %c2_92] : memref<24x3xf32, #tpu.memory_space<smem>>
    %244 = vector.broadcast %243 : f32 to vector<1x128xf32>
    %245 = arith.addf %242, %244 : vector<1x128xf32>
    %246 = vector.broadcast %245 : vector<1x128xf32> to vector<16x128xf32>
    %247 = arith.addf %239, %246 : vector<16x128xf32>
    %c13 = arith.constant 13 : index
    %c0_93 = arith.constant 0 : index
    %248 = memref.load %arg2[%c13, %c0_93] : memref<24x3xf32, #tpu.memory_space<smem>>
    %249 = vector.broadcast %248 : f32 to vector<16x128xf32>
    %250 = arith.mulf %249, %0 : vector<16x128xf32>
    %c13_94 = arith.constant 13 : index
    %c1_95 = arith.constant 1 : index
    %251 = memref.load %arg2[%c13_94, %c1_95] : memref<24x3xf32, #tpu.memory_space<smem>>
    %252 = vector.broadcast %251 : f32 to vector<1x128xf32>
    %253 = arith.mulf %252, %1 : vector<1x128xf32>
    %c13_96 = arith.constant 13 : index
    %c2_97 = arith.constant 2 : index
    %254 = memref.load %arg2[%c13_96, %c2_97] : memref<24x3xf32, #tpu.memory_space<smem>>
    %255 = vector.broadcast %254 : f32 to vector<1x128xf32>
    %256 = arith.addf %253, %255 : vector<1x128xf32>
    %257 = vector.broadcast %256 : vector<1x128xf32> to vector<16x128xf32>
    %258 = arith.addf %250, %257 : vector<16x128xf32>
    %c21 = arith.constant 21 : index
    %c0_98 = arith.constant 0 : index
    %259 = memref.load %arg2[%c21, %c0_98] : memref<24x3xf32, #tpu.memory_space<smem>>
    %260 = vector.broadcast %259 : f32 to vector<16x128xf32>
    %261 = arith.mulf %260, %0 : vector<16x128xf32>
    %c21_99 = arith.constant 21 : index
    %c1_100 = arith.constant 1 : index
    %262 = memref.load %arg2[%c21_99, %c1_100] : memref<24x3xf32, #tpu.memory_space<smem>>
    %263 = vector.broadcast %262 : f32 to vector<1x128xf32>
    %264 = arith.mulf %263, %1 : vector<1x128xf32>
    %c21_101 = arith.constant 21 : index
    %c2_102 = arith.constant 2 : index
    %265 = memref.load %arg2[%c21_101, %c2_102] : memref<24x3xf32, #tpu.memory_space<smem>>
    %266 = vector.broadcast %265 : f32 to vector<1x128xf32>
    %267 = arith.addf %264, %266 : vector<1x128xf32>
    %268 = vector.broadcast %267 : vector<1x128xf32> to vector<16x128xf32>
    %269 = arith.addf %261, %268 : vector<16x128xf32>
    %270 = arith.negf %247 : vector<16x128xf32>
    %271 = math.exp %270 : vector<16x128xf32>
    %cst_103 = arith.constant 1.000000e+00 : f32
    %272 = vector.broadcast %cst_103 : f32 to vector<16x128xf32>
    %273 = arith.addf %272, %271 : vector<16x128xf32>
    %274 = arith.divf %272, %273 : vector<16x128xf32>
    %275 = math.tanh %258 : vector<16x128xf32>
    %276 = arith.mulf %274, %275 : vector<16x128xf32>
    %277 = arith.negf %269 : vector<16x128xf32>
    %278 = math.exp %277 : vector<16x128xf32>
    %cst_104 = arith.constant 1.000000e+00 : f32
    %279 = vector.broadcast %cst_104 : f32 to vector<16x128xf32>
    %280 = arith.addf %279, %278 : vector<16x128xf32>
    %281 = arith.divf %279, %280 : vector<16x128xf32>
    %282 = math.tanh %276 : vector<16x128xf32>
    %283 = arith.mulf %281, %282 : vector<16x128xf32>
    %c6 = arith.constant 6 : index
    %c0_105 = arith.constant 0 : index
    %284 = memref.load %arg2[%c6, %c0_105] : memref<24x3xf32, #tpu.memory_space<smem>>
    %285 = vector.broadcast %284 : f32 to vector<16x128xf32>
    %286 = arith.mulf %285, %0 : vector<16x128xf32>
    %c6_106 = arith.constant 6 : index
    %c1_107 = arith.constant 1 : index
    %287 = memref.load %arg2[%c6_106, %c1_107] : memref<24x3xf32, #tpu.memory_space<smem>>
    %288 = vector.broadcast %287 : f32 to vector<1x128xf32>
    %289 = arith.mulf %288, %1 : vector<1x128xf32>
    %c6_108 = arith.constant 6 : index
    %c2_109 = arith.constant 2 : index
    %290 = memref.load %arg2[%c6_108, %c2_109] : memref<24x3xf32, #tpu.memory_space<smem>>
    %291 = vector.broadcast %290 : f32 to vector<1x128xf32>
    %292 = arith.addf %289, %291 : vector<1x128xf32>
    %293 = vector.broadcast %292 : vector<1x128xf32> to vector<16x128xf32>
    %294 = arith.addf %286, %293 : vector<16x128xf32>
    %c14 = arith.constant 14 : index
    %c0_110 = arith.constant 0 : index
    %295 = memref.load %arg2[%c14, %c0_110] : memref<24x3xf32, #tpu.memory_space<smem>>
    %296 = vector.broadcast %295 : f32 to vector<16x128xf32>
    %297 = arith.mulf %296, %0 : vector<16x128xf32>
    %c14_111 = arith.constant 14 : index
    %c1_112 = arith.constant 1 : index
    %298 = memref.load %arg2[%c14_111, %c1_112] : memref<24x3xf32, #tpu.memory_space<smem>>
    %299 = vector.broadcast %298 : f32 to vector<1x128xf32>
    %300 = arith.mulf %299, %1 : vector<1x128xf32>
    %c14_113 = arith.constant 14 : index
    %c2_114 = arith.constant 2 : index
    %301 = memref.load %arg2[%c14_113, %c2_114] : memref<24x3xf32, #tpu.memory_space<smem>>
    %302 = vector.broadcast %301 : f32 to vector<1x128xf32>
    %303 = arith.addf %300, %302 : vector<1x128xf32>
    %304 = vector.broadcast %303 : vector<1x128xf32> to vector<16x128xf32>
    %305 = arith.addf %297, %304 : vector<16x128xf32>
    %c22 = arith.constant 22 : index
    %c0_115 = arith.constant 0 : index
    %306 = memref.load %arg2[%c22, %c0_115] : memref<24x3xf32, #tpu.memory_space<smem>>
    %307 = vector.broadcast %306 : f32 to vector<16x128xf32>
    %308 = arith.mulf %307, %0 : vector<16x128xf32>
    %c22_116 = arith.constant 22 : index
    %c1_117 = arith.constant 1 : index
    %309 = memref.load %arg2[%c22_116, %c1_117] : memref<24x3xf32, #tpu.memory_space<smem>>
    %310 = vector.broadcast %309 : f32 to vector<1x128xf32>
    %311 = arith.mulf %310, %1 : vector<1x128xf32>
    %c22_118 = arith.constant 22 : index
    %c2_119 = arith.constant 2 : index
    %312 = memref.load %arg2[%c22_118, %c2_119] : memref<24x3xf32, #tpu.memory_space<smem>>
    %313 = vector.broadcast %312 : f32 to vector<1x128xf32>
    %314 = arith.addf %311, %313 : vector<1x128xf32>
    %315 = vector.broadcast %314 : vector<1x128xf32> to vector<16x128xf32>
    %316 = arith.addf %308, %315 : vector<16x128xf32>
    %317 = arith.negf %294 : vector<16x128xf32>
    %318 = math.exp %317 : vector<16x128xf32>
    %cst_120 = arith.constant 1.000000e+00 : f32
    %319 = vector.broadcast %cst_120 : f32 to vector<16x128xf32>
    %320 = arith.addf %319, %318 : vector<16x128xf32>
    %321 = arith.divf %319, %320 : vector<16x128xf32>
    %322 = math.tanh %305 : vector<16x128xf32>
    %323 = arith.mulf %321, %322 : vector<16x128xf32>
    %324 = arith.negf %316 : vector<16x128xf32>
    %325 = math.exp %324 : vector<16x128xf32>
    %cst_121 = arith.constant 1.000000e+00 : f32
    %326 = vector.broadcast %cst_121 : f32 to vector<16x128xf32>
    %327 = arith.addf %326, %325 : vector<16x128xf32>
    %328 = arith.divf %326, %327 : vector<16x128xf32>
    %329 = math.tanh %323 : vector<16x128xf32>
    %330 = arith.mulf %328, %329 : vector<16x128xf32>
    %c7 = arith.constant 7 : index
    %c0_122 = arith.constant 0 : index
    %331 = memref.load %arg2[%c7, %c0_122] : memref<24x3xf32, #tpu.memory_space<smem>>
    %332 = vector.broadcast %331 : f32 to vector<16x128xf32>
    %333 = arith.mulf %332, %0 : vector<16x128xf32>
    %c7_123 = arith.constant 7 : index
    %c1_124 = arith.constant 1 : index
    %334 = memref.load %arg2[%c7_123, %c1_124] : memref<24x3xf32, #tpu.memory_space<smem>>
    %335 = vector.broadcast %334 : f32 to vector<1x128xf32>
    %336 = arith.mulf %335, %1 : vector<1x128xf32>
    %c7_125 = arith.constant 7 : index
    %c2_126 = arith.constant 2 : index
    %337 = memref.load %arg2[%c7_125, %c2_126] : memref<24x3xf32, #tpu.memory_space<smem>>
    %338 = vector.broadcast %337 : f32 to vector<1x128xf32>
    %339 = arith.addf %336, %338 : vector<1x128xf32>
    %340 = vector.broadcast %339 : vector<1x128xf32> to vector<16x128xf32>
    %341 = arith.addf %333, %340 : vector<16x128xf32>
    %c15 = arith.constant 15 : index
    %c0_127 = arith.constant 0 : index
    %342 = memref.load %arg2[%c15, %c0_127] : memref<24x3xf32, #tpu.memory_space<smem>>
    %343 = vector.broadcast %342 : f32 to vector<16x128xf32>
    %344 = arith.mulf %343, %0 : vector<16x128xf32>
    %c15_128 = arith.constant 15 : index
    %c1_129 = arith.constant 1 : index
    %345 = memref.load %arg2[%c15_128, %c1_129] : memref<24x3xf32, #tpu.memory_space<smem>>
    %346 = vector.broadcast %345 : f32 to vector<1x128xf32>
    %347 = arith.mulf %346, %1 : vector<1x128xf32>
    %c15_130 = arith.constant 15 : index
    %c2_131 = arith.constant 2 : index
    %348 = memref.load %arg2[%c15_130, %c2_131] : memref<24x3xf32, #tpu.memory_space<smem>>
    %349 = vector.broadcast %348 : f32 to vector<1x128xf32>
    %350 = arith.addf %347, %349 : vector<1x128xf32>
    %351 = vector.broadcast %350 : vector<1x128xf32> to vector<16x128xf32>
    %352 = arith.addf %344, %351 : vector<16x128xf32>
    %c23 = arith.constant 23 : index
    %c0_132 = arith.constant 0 : index
    %353 = memref.load %arg2[%c23, %c0_132] : memref<24x3xf32, #tpu.memory_space<smem>>
    %354 = vector.broadcast %353 : f32 to vector<16x128xf32>
    %355 = arith.mulf %354, %0 : vector<16x128xf32>
    %c23_133 = arith.constant 23 : index
    %c1_134 = arith.constant 1 : index
    %356 = memref.load %arg2[%c23_133, %c1_134] : memref<24x3xf32, #tpu.memory_space<smem>>
    %357 = vector.broadcast %356 : f32 to vector<1x128xf32>
    %358 = arith.mulf %357, %1 : vector<1x128xf32>
    %c23_135 = arith.constant 23 : index
    %c2_136 = arith.constant 2 : index
    %359 = memref.load %arg2[%c23_135, %c2_136] : memref<24x3xf32, #tpu.memory_space<smem>>
    %360 = vector.broadcast %359 : f32 to vector<1x128xf32>
    %361 = arith.addf %358, %360 : vector<1x128xf32>
    %362 = vector.broadcast %361 : vector<1x128xf32> to vector<16x128xf32>
    %363 = arith.addf %355, %362 : vector<16x128xf32>
    %364 = arith.negf %341 : vector<16x128xf32>
    %365 = math.exp %364 : vector<16x128xf32>
    %cst_137 = arith.constant 1.000000e+00 : f32
    %366 = vector.broadcast %cst_137 : f32 to vector<16x128xf32>
    %367 = arith.addf %366, %365 : vector<16x128xf32>
    %368 = arith.divf %366, %367 : vector<16x128xf32>
    %369 = math.tanh %352 : vector<16x128xf32>
    %370 = arith.mulf %368, %369 : vector<16x128xf32>
    %371 = arith.negf %363 : vector<16x128xf32>
    %372 = math.exp %371 : vector<16x128xf32>
    %cst_138 = arith.constant 1.000000e+00 : f32
    %373 = vector.broadcast %cst_138 : f32 to vector<16x128xf32>
    %374 = arith.addf %373, %372 : vector<16x128xf32>
    %375 = arith.divf %373, %374 : vector<16x128xf32>
    %376 = math.tanh %370 : vector<16x128xf32>
    %377 = arith.mulf %375, %376 : vector<16x128xf32>
    %cst_139 = arith.constant 0.000000e+00 : f32
    %378 = vector.broadcast %cst_139 : f32 to vector<1x128xf32>
    %c0_140 = arith.constant 0 : index
    %c0_141 = arith.constant 0 : index
    %379 = memref.load %arg3[%c0_140, %c0_141] : memref<16x8xf32, #tpu.memory_space<smem>>
    %380 = vector.broadcast %379 : f32 to vector<16x128xf32>
    %381 = arith.mulf %380, %48 : vector<16x128xf32>
    %c0_142 = arith.constant 0 : index
    %c1_143 = arith.constant 1 : index
    %382 = memref.load %arg3[%c0_142, %c1_143] : memref<16x8xf32, #tpu.memory_space<smem>>
    %383 = vector.broadcast %382 : f32 to vector<16x128xf32>
    %384 = arith.mulf %383, %95 : vector<16x128xf32>
    %385 = arith.addf %381, %384 : vector<16x128xf32>
    %c0_144 = arith.constant 0 : index
    %c2_145 = arith.constant 2 : index
    %386 = memref.load %arg3[%c0_144, %c2_145] : memref<16x8xf32, #tpu.memory_space<smem>>
    %387 = vector.broadcast %386 : f32 to vector<16x128xf32>
    %388 = arith.mulf %387, %142 : vector<16x128xf32>
    %389 = arith.addf %385, %388 : vector<16x128xf32>
    %c0_146 = arith.constant 0 : index
    %c3_147 = arith.constant 3 : index
    %390 = memref.load %arg3[%c0_146, %c3_147] : memref<16x8xf32, #tpu.memory_space<smem>>
    %391 = vector.broadcast %390 : f32 to vector<16x128xf32>
    %392 = arith.mulf %391, %189 : vector<16x128xf32>
    %393 = arith.addf %389, %392 : vector<16x128xf32>
    %c0_148 = arith.constant 0 : index
    %c4_149 = arith.constant 4 : index
    %394 = memref.load %arg3[%c0_148, %c4_149] : memref<16x8xf32, #tpu.memory_space<smem>>
    %395 = vector.broadcast %394 : f32 to vector<16x128xf32>
    %396 = arith.mulf %395, %236 : vector<16x128xf32>
    %397 = arith.addf %393, %396 : vector<16x128xf32>
    %c0_150 = arith.constant 0 : index
    %c5_151 = arith.constant 5 : index
    %398 = memref.load %arg3[%c0_150, %c5_151] : memref<16x8xf32, #tpu.memory_space<smem>>
    %399 = vector.broadcast %398 : f32 to vector<16x128xf32>
    %400 = arith.mulf %399, %283 : vector<16x128xf32>
    %401 = arith.addf %397, %400 : vector<16x128xf32>
    %c0_152 = arith.constant 0 : index
    %c6_153 = arith.constant 6 : index
    %402 = memref.load %arg3[%c0_152, %c6_153] : memref<16x8xf32, #tpu.memory_space<smem>>
    %403 = vector.broadcast %402 : f32 to vector<16x128xf32>
    %404 = arith.mulf %403, %330 : vector<16x128xf32>
    %405 = arith.addf %401, %404 : vector<16x128xf32>
    %c0_154 = arith.constant 0 : index
    %c7_155 = arith.constant 7 : index
    %406 = memref.load %arg3[%c0_154, %c7_155] : memref<16x8xf32, #tpu.memory_space<smem>>
    %407 = vector.broadcast %406 : f32 to vector<16x128xf32>
    %408 = arith.mulf %407, %377 : vector<16x128xf32>
    %409 = arith.addf %405, %408 : vector<16x128xf32>
    %410 = math.tanh %409 : vector<16x128xf32>
    %411 = arith.mulf %410, %0 : vector<16x128xf32>
    %cst_156 = arith.constant dense<0.000000e+00> : vector<128xf32>
    %412 = vector.multi_reduction <add>, %411, %cst_156 [0] : vector<16x128xf32> to vector<128xf32>
    %413 = vector.shape_cast %412 : vector<128xf32> to vector<1x128xf32>
    %414 = math.tanh %413 : vector<1x128xf32>
    %c0_157 = arith.constant 0 : index
    %c0_158 = arith.constant 0 : index
    %415 = memref.load %arg4[%c0_157, %c0_158] : memref<1x17xf32, #tpu.memory_space<smem>>
    %416 = vector.broadcast %415 : f32 to vector<1x128xf32>
    %417 = arith.mulf %416, %414 : vector<1x128xf32>
    %418 = arith.addf %378, %417 : vector<1x128xf32>
    %c1_159 = arith.constant 1 : index
    %c0_160 = arith.constant 0 : index
    %419 = memref.load %arg3[%c1_159, %c0_160] : memref<16x8xf32, #tpu.memory_space<smem>>
    %420 = vector.broadcast %419 : f32 to vector<16x128xf32>
    %421 = arith.mulf %420, %48 : vector<16x128xf32>
    %c1_161 = arith.constant 1 : index
    %c1_162 = arith.constant 1 : index
    %422 = memref.load %arg3[%c1_161, %c1_162] : memref<16x8xf32, #tpu.memory_space<smem>>
    %423 = vector.broadcast %422 : f32 to vector<16x128xf32>
    %424 = arith.mulf %423, %95 : vector<16x128xf32>
    %425 = arith.addf %421, %424 : vector<16x128xf32>
    %c1_163 = arith.constant 1 : index
    %c2_164 = arith.constant 2 : index
    %426 = memref.load %arg3[%c1_163, %c2_164] : memref<16x8xf32, #tpu.memory_space<smem>>
    %427 = vector.broadcast %426 : f32 to vector<16x128xf32>
    %428 = arith.mulf %427, %142 : vector<16x128xf32>
    %429 = arith.addf %425, %428 : vector<16x128xf32>
    %c1_165 = arith.constant 1 : index
    %c3_166 = arith.constant 3 : index
    %430 = memref.load %arg3[%c1_165, %c3_166] : memref<16x8xf32, #tpu.memory_space<smem>>
    %431 = vector.broadcast %430 : f32 to vector<16x128xf32>
    %432 = arith.mulf %431, %189 : vector<16x128xf32>
    %433 = arith.addf %429, %432 : vector<16x128xf32>
    %c1_167 = arith.constant 1 : index
    %c4_168 = arith.constant 4 : index
    %434 = memref.load %arg3[%c1_167, %c4_168] : memref<16x8xf32, #tpu.memory_space<smem>>
    %435 = vector.broadcast %434 : f32 to vector<16x128xf32>
    %436 = arith.mulf %435, %236 : vector<16x128xf32>
    %437 = arith.addf %433, %436 : vector<16x128xf32>
    %c1_169 = arith.constant 1 : index
    %c5_170 = arith.constant 5 : index
    %438 = memref.load %arg3[%c1_169, %c5_170] : memref<16x8xf32, #tpu.memory_space<smem>>
    %439 = vector.broadcast %438 : f32 to vector<16x128xf32>
    %440 = arith.mulf %439, %283 : vector<16x128xf32>
    %441 = arith.addf %437, %440 : vector<16x128xf32>
    %c1_171 = arith.constant 1 : index
    %c6_172 = arith.constant 6 : index
    %442 = memref.load %arg3[%c1_171, %c6_172] : memref<16x8xf32, #tpu.memory_space<smem>>
    %443 = vector.broadcast %442 : f32 to vector<16x128xf32>
    %444 = arith.mulf %443, %330 : vector<16x128xf32>
    %445 = arith.addf %441, %444 : vector<16x128xf32>
    %c1_173 = arith.constant 1 : index
    %c7_174 = arith.constant 7 : index
    %446 = memref.load %arg3[%c1_173, %c7_174] : memref<16x8xf32, #tpu.memory_space<smem>>
    %447 = vector.broadcast %446 : f32 to vector<16x128xf32>
    %448 = arith.mulf %447, %377 : vector<16x128xf32>
    %449 = arith.addf %445, %448 : vector<16x128xf32>
    %450 = math.tanh %449 : vector<16x128xf32>
    %451 = arith.mulf %450, %0 : vector<16x128xf32>
    %cst_175 = arith.constant dense<0.000000e+00> : vector<128xf32>
    %452 = vector.multi_reduction <add>, %451, %cst_175 [0] : vector<16x128xf32> to vector<128xf32>
    %453 = vector.shape_cast %452 : vector<128xf32> to vector<1x128xf32>
    %454 = math.tanh %453 : vector<1x128xf32>
    %c0_176 = arith.constant 0 : index
    %c1_177 = arith.constant 1 : index
    %455 = memref.load %arg4[%c0_176, %c1_177] : memref<1x17xf32, #tpu.memory_space<smem>>
    %456 = vector.broadcast %455 : f32 to vector<1x128xf32>
    %457 = arith.mulf %456, %454 : vector<1x128xf32>
    %458 = arith.addf %418, %457 : vector<1x128xf32>
    %c2_178 = arith.constant 2 : index
    %c0_179 = arith.constant 0 : index
    %459 = memref.load %arg3[%c2_178, %c0_179] : memref<16x8xf32, #tpu.memory_space<smem>>
    %460 = vector.broadcast %459 : f32 to vector<16x128xf32>
    %461 = arith.mulf %460, %48 : vector<16x128xf32>
    %c2_180 = arith.constant 2 : index
    %c1_181 = arith.constant 1 : index
    %462 = memref.load %arg3[%c2_180, %c1_181] : memref<16x8xf32, #tpu.memory_space<smem>>
    %463 = vector.broadcast %462 : f32 to vector<16x128xf32>
    %464 = arith.mulf %463, %95 : vector<16x128xf32>
    %465 = arith.addf %461, %464 : vector<16x128xf32>
    %c2_182 = arith.constant 2 : index
    %c2_183 = arith.constant 2 : index
    %466 = memref.load %arg3[%c2_182, %c2_183] : memref<16x8xf32, #tpu.memory_space<smem>>
    %467 = vector.broadcast %466 : f32 to vector<16x128xf32>
    %468 = arith.mulf %467, %142 : vector<16x128xf32>
    %469 = arith.addf %465, %468 : vector<16x128xf32>
    %c2_184 = arith.constant 2 : index
    %c3_185 = arith.constant 3 : index
    %470 = memref.load %arg3[%c2_184, %c3_185] : memref<16x8xf32, #tpu.memory_space<smem>>
    %471 = vector.broadcast %470 : f32 to vector<16x128xf32>
    %472 = arith.mulf %471, %189 : vector<16x128xf32>
    %473 = arith.addf %469, %472 : vector<16x128xf32>
    %c2_186 = arith.constant 2 : index
    %c4_187 = arith.constant 4 : index
    %474 = memref.load %arg3[%c2_186, %c4_187] : memref<16x8xf32, #tpu.memory_space<smem>>
    %475 = vector.broadcast %474 : f32 to vector<16x128xf32>
    %476 = arith.mulf %475, %236 : vector<16x128xf32>
    %477 = arith.addf %473, %476 : vector<16x128xf32>
    %c2_188 = arith.constant 2 : index
    %c5_189 = arith.constant 5 : index
    %478 = memref.load %arg3[%c2_188, %c5_189] : memref<16x8xf32, #tpu.memory_space<smem>>
    %479 = vector.broadcast %478 : f32 to vector<16x128xf32>
    %480 = arith.mulf %479, %283 : vector<16x128xf32>
    %481 = arith.addf %477, %480 : vector<16x128xf32>
    %c2_190 = arith.constant 2 : index
    %c6_191 = arith.constant 6 : index
    %482 = memref.load %arg3[%c2_190, %c6_191] : memref<16x8xf32, #tpu.memory_space<smem>>
    %483 = vector.broadcast %482 : f32 to vector<16x128xf32>
    %484 = arith.mulf %483, %330 : vector<16x128xf32>
    %485 = arith.addf %481, %484 : vector<16x128xf32>
    %c2_192 = arith.constant 2 : index
    %c7_193 = arith.constant 7 : index
    %486 = memref.load %arg3[%c2_192, %c7_193] : memref<16x8xf32, #tpu.memory_space<smem>>
    %487 = vector.broadcast %486 : f32 to vector<16x128xf32>
    %488 = arith.mulf %487, %377 : vector<16x128xf32>
    %489 = arith.addf %485, %488 : vector<16x128xf32>
    %490 = math.tanh %489 : vector<16x128xf32>
    %491 = arith.mulf %490, %0 : vector<16x128xf32>
    %cst_194 = arith.constant dense<0.000000e+00> : vector<128xf32>
    %492 = vector.multi_reduction <add>, %491, %cst_194 [0] : vector<16x128xf32> to vector<128xf32>
    %493 = vector.shape_cast %492 : vector<128xf32> to vector<1x128xf32>
    %494 = math.tanh %493 : vector<1x128xf32>
    %c0_195 = arith.constant 0 : index
    %c2_196 = arith.constant 2 : index
    %495 = memref.load %arg4[%c0_195, %c2_196] : memref<1x17xf32, #tpu.memory_space<smem>>
    %496 = vector.broadcast %495 : f32 to vector<1x128xf32>
    %497 = arith.mulf %496, %494 : vector<1x128xf32>
    %498 = arith.addf %458, %497 : vector<1x128xf32>
    %c3_197 = arith.constant 3 : index
    %c0_198 = arith.constant 0 : index
    %499 = memref.load %arg3[%c3_197, %c0_198] : memref<16x8xf32, #tpu.memory_space<smem>>
    %500 = vector.broadcast %499 : f32 to vector<16x128xf32>
    %501 = arith.mulf %500, %48 : vector<16x128xf32>
    %c3_199 = arith.constant 3 : index
    %c1_200 = arith.constant 1 : index
    %502 = memref.load %arg3[%c3_199, %c1_200] : memref<16x8xf32, #tpu.memory_space<smem>>
    %503 = vector.broadcast %502 : f32 to vector<16x128xf32>
    %504 = arith.mulf %503, %95 : vector<16x128xf32>
    %505 = arith.addf %501, %504 : vector<16x128xf32>
    %c3_201 = arith.constant 3 : index
    %c2_202 = arith.constant 2 : index
    %506 = memref.load %arg3[%c3_201, %c2_202] : memref<16x8xf32, #tpu.memory_space<smem>>
    %507 = vector.broadcast %506 : f32 to vector<16x128xf32>
    %508 = arith.mulf %507, %142 : vector<16x128xf32>
    %509 = arith.addf %505, %508 : vector<16x128xf32>
    %c3_203 = arith.constant 3 : index
    %c3_204 = arith.constant 3 : index
    %510 = memref.load %arg3[%c3_203, %c3_204] : memref<16x8xf32, #tpu.memory_space<smem>>
    %511 = vector.broadcast %510 : f32 to vector<16x128xf32>
    %512 = arith.mulf %511, %189 : vector<16x128xf32>
    %513 = arith.addf %509, %512 : vector<16x128xf32>
    %c3_205 = arith.constant 3 : index
    %c4_206 = arith.constant 4 : index
    %514 = memref.load %arg3[%c3_205, %c4_206] : memref<16x8xf32, #tpu.memory_space<smem>>
    %515 = vector.broadcast %514 : f32 to vector<16x128xf32>
    %516 = arith.mulf %515, %236 : vector<16x128xf32>
    %517 = arith.addf %513, %516 : vector<16x128xf32>
    %c3_207 = arith.constant 3 : index
    %c5_208 = arith.constant 5 : index
    %518 = memref.load %arg3[%c3_207, %c5_208] : memref<16x8xf32, #tpu.memory_space<smem>>
    %519 = vector.broadcast %518 : f32 to vector<16x128xf32>
    %520 = arith.mulf %519, %283 : vector<16x128xf32>
    %521 = arith.addf %517, %520 : vector<16x128xf32>
    %c3_209 = arith.constant 3 : index
    %c6_210 = arith.constant 6 : index
    %522 = memref.load %arg3[%c3_209, %c6_210] : memref<16x8xf32, #tpu.memory_space<smem>>
    %523 = vector.broadcast %522 : f32 to vector<16x128xf32>
    %524 = arith.mulf %523, %330 : vector<16x128xf32>
    %525 = arith.addf %521, %524 : vector<16x128xf32>
    %c3_211 = arith.constant 3 : index
    %c7_212 = arith.constant 7 : index
    %526 = memref.load %arg3[%c3_211, %c7_212] : memref<16x8xf32, #tpu.memory_space<smem>>
    %527 = vector.broadcast %526 : f32 to vector<16x128xf32>
    %528 = arith.mulf %527, %377 : vector<16x128xf32>
    %529 = arith.addf %525, %528 : vector<16x128xf32>
    %530 = math.tanh %529 : vector<16x128xf32>
    %531 = arith.mulf %530, %0 : vector<16x128xf32>
    %cst_213 = arith.constant dense<0.000000e+00> : vector<128xf32>
    %532 = vector.multi_reduction <add>, %531, %cst_213 [0] : vector<16x128xf32> to vector<128xf32>
    %533 = vector.shape_cast %532 : vector<128xf32> to vector<1x128xf32>
    %534 = math.tanh %533 : vector<1x128xf32>
    %c0_214 = arith.constant 0 : index
    %c3_215 = arith.constant 3 : index
    %535 = memref.load %arg4[%c0_214, %c3_215] : memref<1x17xf32, #tpu.memory_space<smem>>
    %536 = vector.broadcast %535 : f32 to vector<1x128xf32>
    %537 = arith.mulf %536, %534 : vector<1x128xf32>
    %538 = arith.addf %498, %537 : vector<1x128xf32>
    %c4_216 = arith.constant 4 : index
    %c0_217 = arith.constant 0 : index
    %539 = memref.load %arg3[%c4_216, %c0_217] : memref<16x8xf32, #tpu.memory_space<smem>>
    %540 = vector.broadcast %539 : f32 to vector<16x128xf32>
    %541 = arith.mulf %540, %48 : vector<16x128xf32>
    %c4_218 = arith.constant 4 : index
    %c1_219 = arith.constant 1 : index
    %542 = memref.load %arg3[%c4_218, %c1_219] : memref<16x8xf32, #tpu.memory_space<smem>>
    %543 = vector.broadcast %542 : f32 to vector<16x128xf32>
    %544 = arith.mulf %543, %95 : vector<16x128xf32>
    %545 = arith.addf %541, %544 : vector<16x128xf32>
    %c4_220 = arith.constant 4 : index
    %c2_221 = arith.constant 2 : index
    %546 = memref.load %arg3[%c4_220, %c2_221] : memref<16x8xf32, #tpu.memory_space<smem>>
    %547 = vector.broadcast %546 : f32 to vector<16x128xf32>
    %548 = arith.mulf %547, %142 : vector<16x128xf32>
    %549 = arith.addf %545, %548 : vector<16x128xf32>
    %c4_222 = arith.constant 4 : index
    %c3_223 = arith.constant 3 : index
    %550 = memref.load %arg3[%c4_222, %c3_223] : memref<16x8xf32, #tpu.memory_space<smem>>
    %551 = vector.broadcast %550 : f32 to vector<16x128xf32>
    %552 = arith.mulf %551, %189 : vector<16x128xf32>
    %553 = arith.addf %549, %552 : vector<16x128xf32>
    %c4_224 = arith.constant 4 : index
    %c4_225 = arith.constant 4 : index
    %554 = memref.load %arg3[%c4_224, %c4_225] : memref<16x8xf32, #tpu.memory_space<smem>>
    %555 = vector.broadcast %554 : f32 to vector<16x128xf32>
    %556 = arith.mulf %555, %236 : vector<16x128xf32>
    %557 = arith.addf %553, %556 : vector<16x128xf32>
    %c4_226 = arith.constant 4 : index
    %c5_227 = arith.constant 5 : index
    %558 = memref.load %arg3[%c4_226, %c5_227] : memref<16x8xf32, #tpu.memory_space<smem>>
    %559 = vector.broadcast %558 : f32 to vector<16x128xf32>
    %560 = arith.mulf %559, %283 : vector<16x128xf32>
    %561 = arith.addf %557, %560 : vector<16x128xf32>
    %c4_228 = arith.constant 4 : index
    %c6_229 = arith.constant 6 : index
    %562 = memref.load %arg3[%c4_228, %c6_229] : memref<16x8xf32, #tpu.memory_space<smem>>
    %563 = vector.broadcast %562 : f32 to vector<16x128xf32>
    %564 = arith.mulf %563, %330 : vector<16x128xf32>
    %565 = arith.addf %561, %564 : vector<16x128xf32>
    %c4_230 = arith.constant 4 : index
    %c7_231 = arith.constant 7 : index
    %566 = memref.load %arg3[%c4_230, %c7_231] : memref<16x8xf32, #tpu.memory_space<smem>>
    %567 = vector.broadcast %566 : f32 to vector<16x128xf32>
    %568 = arith.mulf %567, %377 : vector<16x128xf32>
    %569 = arith.addf %565, %568 : vector<16x128xf32>
    %570 = math.tanh %569 : vector<16x128xf32>
    %571 = arith.mulf %570, %0 : vector<16x128xf32>
    %cst_232 = arith.constant dense<0.000000e+00> : vector<128xf32>
    %572 = vector.multi_reduction <add>, %571, %cst_232 [0] : vector<16x128xf32> to vector<128xf32>
    %573 = vector.shape_cast %572 : vector<128xf32> to vector<1x128xf32>
    %574 = math.tanh %573 : vector<1x128xf32>
    %c0_233 = arith.constant 0 : index
    %c4_234 = arith.constant 4 : index
    %575 = memref.load %arg4[%c0_233, %c4_234] : memref<1x17xf32, #tpu.memory_space<smem>>
    %576 = vector.broadcast %575 : f32 to vector<1x128xf32>
    %577 = arith.mulf %576, %574 : vector<1x128xf32>
    %578 = arith.addf %538, %577 : vector<1x128xf32>
    %c5_235 = arith.constant 5 : index
    %c0_236 = arith.constant 0 : index
    %579 = memref.load %arg3[%c5_235, %c0_236] : memref<16x8xf32, #tpu.memory_space<smem>>
    %580 = vector.broadcast %579 : f32 to vector<16x128xf32>
    %581 = arith.mulf %580, %48 : vector<16x128xf32>
    %c5_237 = arith.constant 5 : index
    %c1_238 = arith.constant 1 : index
    %582 = memref.load %arg3[%c5_237, %c1_238] : memref<16x8xf32, #tpu.memory_space<smem>>
    %583 = vector.broadcast %582 : f32 to vector<16x128xf32>
    %584 = arith.mulf %583, %95 : vector<16x128xf32>
    %585 = arith.addf %581, %584 : vector<16x128xf32>
    %c5_239 = arith.constant 5 : index
    %c2_240 = arith.constant 2 : index
    %586 = memref.load %arg3[%c5_239, %c2_240] : memref<16x8xf32, #tpu.memory_space<smem>>
    %587 = vector.broadcast %586 : f32 to vector<16x128xf32>
    %588 = arith.mulf %587, %142 : vector<16x128xf32>
    %589 = arith.addf %585, %588 : vector<16x128xf32>
    %c5_241 = arith.constant 5 : index
    %c3_242 = arith.constant 3 : index
    %590 = memref.load %arg3[%c5_241, %c3_242] : memref<16x8xf32, #tpu.memory_space<smem>>
    %591 = vector.broadcast %590 : f32 to vector<16x128xf32>
    %592 = arith.mulf %591, %189 : vector<16x128xf32>
    %593 = arith.addf %589, %592 : vector<16x128xf32>
    %c5_243 = arith.constant 5 : index
    %c4_244 = arith.constant 4 : index
    %594 = memref.load %arg3[%c5_243, %c4_244] : memref<16x8xf32, #tpu.memory_space<smem>>
    %595 = vector.broadcast %594 : f32 to vector<16x128xf32>
    %596 = arith.mulf %595, %236 : vector<16x128xf32>
    %597 = arith.addf %593, %596 : vector<16x128xf32>
    %c5_245 = arith.constant 5 : index
    %c5_246 = arith.constant 5 : index
    %598 = memref.load %arg3[%c5_245, %c5_246] : memref<16x8xf32, #tpu.memory_space<smem>>
    %599 = vector.broadcast %598 : f32 to vector<16x128xf32>
    %600 = arith.mulf %599, %283 : vector<16x128xf32>
    %601 = arith.addf %597, %600 : vector<16x128xf32>
    %c5_247 = arith.constant 5 : index
    %c6_248 = arith.constant 6 : index
    %602 = memref.load %arg3[%c5_247, %c6_248] : memref<16x8xf32, #tpu.memory_space<smem>>
    %603 = vector.broadcast %602 : f32 to vector<16x128xf32>
    %604 = arith.mulf %603, %330 : vector<16x128xf32>
    %605 = arith.addf %601, %604 : vector<16x128xf32>
    %c5_249 = arith.constant 5 : index
    %c7_250 = arith.constant 7 : index
    %606 = memref.load %arg3[%c5_249, %c7_250] : memref<16x8xf32, #tpu.memory_space<smem>>
    %607 = vector.broadcast %606 : f32 to vector<16x128xf32>
    %608 = arith.mulf %607, %377 : vector<16x128xf32>
    %609 = arith.addf %605, %608 : vector<16x128xf32>
    %610 = math.tanh %609 : vector<16x128xf32>
    %611 = arith.mulf %610, %0 : vector<16x128xf32>
    %cst_251 = arith.constant dense<0.000000e+00> : vector<128xf32>
    %612 = vector.multi_reduction <add>, %611, %cst_251 [0] : vector<16x128xf32> to vector<128xf32>
    %613 = vector.shape_cast %612 : vector<128xf32> to vector<1x128xf32>
    %614 = math.tanh %613 : vector<1x128xf32>
    %c0_252 = arith.constant 0 : index
    %c5_253 = arith.constant 5 : index
    %615 = memref.load %arg4[%c0_252, %c5_253] : memref<1x17xf32, #tpu.memory_space<smem>>
    %616 = vector.broadcast %615 : f32 to vector<1x128xf32>
    %617 = arith.mulf %616, %614 : vector<1x128xf32>
    %618 = arith.addf %578, %617 : vector<1x128xf32>
    %c6_254 = arith.constant 6 : index
    %c0_255 = arith.constant 0 : index
    %619 = memref.load %arg3[%c6_254, %c0_255] : memref<16x8xf32, #tpu.memory_space<smem>>
    %620 = vector.broadcast %619 : f32 to vector<16x128xf32>
    %621 = arith.mulf %620, %48 : vector<16x128xf32>
    %c6_256 = arith.constant 6 : index
    %c1_257 = arith.constant 1 : index
    %622 = memref.load %arg3[%c6_256, %c1_257] : memref<16x8xf32, #tpu.memory_space<smem>>
    %623 = vector.broadcast %622 : f32 to vector<16x128xf32>
    %624 = arith.mulf %623, %95 : vector<16x128xf32>
    %625 = arith.addf %621, %624 : vector<16x128xf32>
    %c6_258 = arith.constant 6 : index
    %c2_259 = arith.constant 2 : index
    %626 = memref.load %arg3[%c6_258, %c2_259] : memref<16x8xf32, #tpu.memory_space<smem>>
    %627 = vector.broadcast %626 : f32 to vector<16x128xf32>
    %628 = arith.mulf %627, %142 : vector<16x128xf32>
    %629 = arith.addf %625, %628 : vector<16x128xf32>
    %c6_260 = arith.constant 6 : index
    %c3_261 = arith.constant 3 : index
    %630 = memref.load %arg3[%c6_260, %c3_261] : memref<16x8xf32, #tpu.memory_space<smem>>
    %631 = vector.broadcast %630 : f32 to vector<16x128xf32>
    %632 = arith.mulf %631, %189 : vector<16x128xf32>
    %633 = arith.addf %629, %632 : vector<16x128xf32>
    %c6_262 = arith.constant 6 : index
    %c4_263 = arith.constant 4 : index
    %634 = memref.load %arg3[%c6_262, %c4_263] : memref<16x8xf32, #tpu.memory_space<smem>>
    %635 = vector.broadcast %634 : f32 to vector<16x128xf32>
    %636 = arith.mulf %635, %236 : vector<16x128xf32>
    %637 = arith.addf %633, %636 : vector<16x128xf32>
    %c6_264 = arith.constant 6 : index
    %c5_265 = arith.constant 5 : index
    %638 = memref.load %arg3[%c6_264, %c5_265] : memref<16x8xf32, #tpu.memory_space<smem>>
    %639 = vector.broadcast %638 : f32 to vector<16x128xf32>
    %640 = arith.mulf %639, %283 : vector<16x128xf32>
    %641 = arith.addf %637, %640 : vector<16x128xf32>
    %c6_266 = arith.constant 6 : index
    %c6_267 = arith.constant 6 : index
    %642 = memref.load %arg3[%c6_266, %c6_267] : memref<16x8xf32, #tpu.memory_space<smem>>
    %643 = vector.broadcast %642 : f32 to vector<16x128xf32>
    %644 = arith.mulf %643, %330 : vector<16x128xf32>
    %645 = arith.addf %641, %644 : vector<16x128xf32>
    %c6_268 = arith.constant 6 : index
    %c7_269 = arith.constant 7 : index
    %646 = memref.load %arg3[%c6_268, %c7_269] : memref<16x8xf32, #tpu.memory_space<smem>>
    %647 = vector.broadcast %646 : f32 to vector<16x128xf32>
    %648 = arith.mulf %647, %377 : vector<16x128xf32>
    %649 = arith.addf %645, %648 : vector<16x128xf32>
    %650 = math.tanh %649 : vector<16x128xf32>
    %651 = arith.mulf %650, %0 : vector<16x128xf32>
    %cst_270 = arith.constant dense<0.000000e+00> : vector<128xf32>
    %652 = vector.multi_reduction <add>, %651, %cst_270 [0] : vector<16x128xf32> to vector<128xf32>
    %653 = vector.shape_cast %652 : vector<128xf32> to vector<1x128xf32>
    %654 = math.tanh %653 : vector<1x128xf32>
    %c0_271 = arith.constant 0 : index
    %c6_272 = arith.constant 6 : index
    %655 = memref.load %arg4[%c0_271, %c6_272] : memref<1x17xf32, #tpu.memory_space<smem>>
    %656 = vector.broadcast %655 : f32 to vector<1x128xf32>
    %657 = arith.mulf %656, %654 : vector<1x128xf32>
    %658 = arith.addf %618, %657 : vector<1x128xf32>
    %c7_273 = arith.constant 7 : index
    %c0_274 = arith.constant 0 : index
    %659 = memref.load %arg3[%c7_273, %c0_274] : memref<16x8xf32, #tpu.memory_space<smem>>
    %660 = vector.broadcast %659 : f32 to vector<16x128xf32>
    %661 = arith.mulf %660, %48 : vector<16x128xf32>
    %c7_275 = arith.constant 7 : index
    %c1_276 = arith.constant 1 : index
    %662 = memref.load %arg3[%c7_275, %c1_276] : memref<16x8xf32, #tpu.memory_space<smem>>
    %663 = vector.broadcast %662 : f32 to vector<16x128xf32>
    %664 = arith.mulf %663, %95 : vector<16x128xf32>
    %665 = arith.addf %661, %664 : vector<16x128xf32>
    %c7_277 = arith.constant 7 : index
    %c2_278 = arith.constant 2 : index
    %666 = memref.load %arg3[%c7_277, %c2_278] : memref<16x8xf32, #tpu.memory_space<smem>>
    %667 = vector.broadcast %666 : f32 to vector<16x128xf32>
    %668 = arith.mulf %667, %142 : vector<16x128xf32>
    %669 = arith.addf %665, %668 : vector<16x128xf32>
    %c7_279 = arith.constant 7 : index
    %c3_280 = arith.constant 3 : index
    %670 = memref.load %arg3[%c7_279, %c3_280] : memref<16x8xf32, #tpu.memory_space<smem>>
    %671 = vector.broadcast %670 : f32 to vector<16x128xf32>
    %672 = arith.mulf %671, %189 : vector<16x128xf32>
    %673 = arith.addf %669, %672 : vector<16x128xf32>
    %c7_281 = arith.constant 7 : index
    %c4_282 = arith.constant 4 : index
    %674 = memref.load %arg3[%c7_281, %c4_282] : memref<16x8xf32, #tpu.memory_space<smem>>
    %675 = vector.broadcast %674 : f32 to vector<16x128xf32>
    %676 = arith.mulf %675, %236 : vector<16x128xf32>
    %677 = arith.addf %673, %676 : vector<16x128xf32>
    %c7_283 = arith.constant 7 : index
    %c5_284 = arith.constant 5 : index
    %678 = memref.load %arg3[%c7_283, %c5_284] : memref<16x8xf32, #tpu.memory_space<smem>>
    %679 = vector.broadcast %678 : f32 to vector<16x128xf32>
    %680 = arith.mulf %679, %283 : vector<16x128xf32>
    %681 = arith.addf %677, %680 : vector<16x128xf32>
    %c7_285 = arith.constant 7 : index
    %c6_286 = arith.constant 6 : index
    %682 = memref.load %arg3[%c7_285, %c6_286] : memref<16x8xf32, #tpu.memory_space<smem>>
    %683 = vector.broadcast %682 : f32 to vector<16x128xf32>
    %684 = arith.mulf %683, %330 : vector<16x128xf32>
    %685 = arith.addf %681, %684 : vector<16x128xf32>
    %c7_287 = arith.constant 7 : index
    %c7_288 = arith.constant 7 : index
    %686 = memref.load %arg3[%c7_287, %c7_288] : memref<16x8xf32, #tpu.memory_space<smem>>
    %687 = vector.broadcast %686 : f32 to vector<16x128xf32>
    %688 = arith.mulf %687, %377 : vector<16x128xf32>
    %689 = arith.addf %685, %688 : vector<16x128xf32>
    %690 = math.tanh %689 : vector<16x128xf32>
    %691 = arith.mulf %690, %0 : vector<16x128xf32>
    %cst_289 = arith.constant dense<0.000000e+00> : vector<128xf32>
    %692 = vector.multi_reduction <add>, %691, %cst_289 [0] : vector<16x128xf32> to vector<128xf32>
    %693 = vector.shape_cast %692 : vector<128xf32> to vector<1x128xf32>
    %694 = math.tanh %693 : vector<1x128xf32>
    %c0_290 = arith.constant 0 : index
    %c7_291 = arith.constant 7 : index
    %695 = memref.load %arg4[%c0_290, %c7_291] : memref<1x17xf32, #tpu.memory_space<smem>>
    %696 = vector.broadcast %695 : f32 to vector<1x128xf32>
    %697 = arith.mulf %696, %694 : vector<1x128xf32>
    %698 = arith.addf %658, %697 : vector<1x128xf32>
    %c8_292 = arith.constant 8 : index
    %c0_293 = arith.constant 0 : index
    %699 = memref.load %arg3[%c8_292, %c0_293] : memref<16x8xf32, #tpu.memory_space<smem>>
    %700 = vector.broadcast %699 : f32 to vector<16x128xf32>
    %701 = arith.mulf %700, %48 : vector<16x128xf32>
    %c8_294 = arith.constant 8 : index
    %c1_295 = arith.constant 1 : index
    %702 = memref.load %arg3[%c8_294, %c1_295] : memref<16x8xf32, #tpu.memory_space<smem>>
    %703 = vector.broadcast %702 : f32 to vector<16x128xf32>
    %704 = arith.mulf %703, %95 : vector<16x128xf32>
    %705 = arith.addf %701, %704 : vector<16x128xf32>
    %c8_296 = arith.constant 8 : index
    %c2_297 = arith.constant 2 : index
    %706 = memref.load %arg3[%c8_296, %c2_297] : memref<16x8xf32, #tpu.memory_space<smem>>
    %707 = vector.broadcast %706 : f32 to vector<16x128xf32>
    %708 = arith.mulf %707, %142 : vector<16x128xf32>
    %709 = arith.addf %705, %708 : vector<16x128xf32>
    %c8_298 = arith.constant 8 : index
    %c3_299 = arith.constant 3 : index
    %710 = memref.load %arg3[%c8_298, %c3_299] : memref<16x8xf32, #tpu.memory_space<smem>>
    %711 = vector.broadcast %710 : f32 to vector<16x128xf32>
    %712 = arith.mulf %711, %189 : vector<16x128xf32>
    %713 = arith.addf %709, %712 : vector<16x128xf32>
    %c8_300 = arith.constant 8 : index
    %c4_301 = arith.constant 4 : index
    %714 = memref.load %arg3[%c8_300, %c4_301] : memref<16x8xf32, #tpu.memory_space<smem>>
    %715 = vector.broadcast %714 : f32 to vector<16x128xf32>
    %716 = arith.mulf %715, %236 : vector<16x128xf32>
    %717 = arith.addf %713, %716 : vector<16x128xf32>
    %c8_302 = arith.constant 8 : index
    %c5_303 = arith.constant 5 : index
    %718 = memref.load %arg3[%c8_302, %c5_303] : memref<16x8xf32, #tpu.memory_space<smem>>
    %719 = vector.broadcast %718 : f32 to vector<16x128xf32>
    %720 = arith.mulf %719, %283 : vector<16x128xf32>
    %721 = arith.addf %717, %720 : vector<16x128xf32>
    %c8_304 = arith.constant 8 : index
    %c6_305 = arith.constant 6 : index
    %722 = memref.load %arg3[%c8_304, %c6_305] : memref<16x8xf32, #tpu.memory_space<smem>>
    %723 = vector.broadcast %722 : f32 to vector<16x128xf32>
    %724 = arith.mulf %723, %330 : vector<16x128xf32>
    %725 = arith.addf %721, %724 : vector<16x128xf32>
    %c8_306 = arith.constant 8 : index
    %c7_307 = arith.constant 7 : index
    %726 = memref.load %arg3[%c8_306, %c7_307] : memref<16x8xf32, #tpu.memory_space<smem>>
    %727 = vector.broadcast %726 : f32 to vector<16x128xf32>
    %728 = arith.mulf %727, %377 : vector<16x128xf32>
    %729 = arith.addf %725, %728 : vector<16x128xf32>
    %730 = math.tanh %729 : vector<16x128xf32>
    %731 = arith.mulf %730, %0 : vector<16x128xf32>
    %cst_308 = arith.constant dense<0.000000e+00> : vector<128xf32>
    %732 = vector.multi_reduction <add>, %731, %cst_308 [0] : vector<16x128xf32> to vector<128xf32>
    %733 = vector.shape_cast %732 : vector<128xf32> to vector<1x128xf32>
    %734 = math.tanh %733 : vector<1x128xf32>
    %c0_309 = arith.constant 0 : index
    %c8_310 = arith.constant 8 : index
    %735 = memref.load %arg4[%c0_309, %c8_310] : memref<1x17xf32, #tpu.memory_space<smem>>
    %736 = vector.broadcast %735 : f32 to vector<1x128xf32>
    %737 = arith.mulf %736, %734 : vector<1x128xf32>
    %738 = arith.addf %698, %737 : vector<1x128xf32>
    %c9_311 = arith.constant 9 : index
    %c0_312 = arith.constant 0 : index
    %739 = memref.load %arg3[%c9_311, %c0_312] : memref<16x8xf32, #tpu.memory_space<smem>>
    %740 = vector.broadcast %739 : f32 to vector<16x128xf32>
    %741 = arith.mulf %740, %48 : vector<16x128xf32>
    %c9_313 = arith.constant 9 : index
    %c1_314 = arith.constant 1 : index
    %742 = memref.load %arg3[%c9_313, %c1_314] : memref<16x8xf32, #tpu.memory_space<smem>>
    %743 = vector.broadcast %742 : f32 to vector<16x128xf32>
    %744 = arith.mulf %743, %95 : vector<16x128xf32>
    %745 = arith.addf %741, %744 : vector<16x128xf32>
    %c9_315 = arith.constant 9 : index
    %c2_316 = arith.constant 2 : index
    %746 = memref.load %arg3[%c9_315, %c2_316] : memref<16x8xf32, #tpu.memory_space<smem>>
    %747 = vector.broadcast %746 : f32 to vector<16x128xf32>
    %748 = arith.mulf %747, %142 : vector<16x128xf32>
    %749 = arith.addf %745, %748 : vector<16x128xf32>
    %c9_317 = arith.constant 9 : index
    %c3_318 = arith.constant 3 : index
    %750 = memref.load %arg3[%c9_317, %c3_318] : memref<16x8xf32, #tpu.memory_space<smem>>
    %751 = vector.broadcast %750 : f32 to vector<16x128xf32>
    %752 = arith.mulf %751, %189 : vector<16x128xf32>
    %753 = arith.addf %749, %752 : vector<16x128xf32>
    %c9_319 = arith.constant 9 : index
    %c4_320 = arith.constant 4 : index
    %754 = memref.load %arg3[%c9_319, %c4_320] : memref<16x8xf32, #tpu.memory_space<smem>>
    %755 = vector.broadcast %754 : f32 to vector<16x128xf32>
    %756 = arith.mulf %755, %236 : vector<16x128xf32>
    %757 = arith.addf %753, %756 : vector<16x128xf32>
    %c9_321 = arith.constant 9 : index
    %c5_322 = arith.constant 5 : index
    %758 = memref.load %arg3[%c9_321, %c5_322] : memref<16x8xf32, #tpu.memory_space<smem>>
    %759 = vector.broadcast %758 : f32 to vector<16x128xf32>
    %760 = arith.mulf %759, %283 : vector<16x128xf32>
    %761 = arith.addf %757, %760 : vector<16x128xf32>
    %c9_323 = arith.constant 9 : index
    %c6_324 = arith.constant 6 : index
    %762 = memref.load %arg3[%c9_323, %c6_324] : memref<16x8xf32, #tpu.memory_space<smem>>
    %763 = vector.broadcast %762 : f32 to vector<16x128xf32>
    %764 = arith.mulf %763, %330 : vector<16x128xf32>
    %765 = arith.addf %761, %764 : vector<16x128xf32>
    %c9_325 = arith.constant 9 : index
    %c7_326 = arith.constant 7 : index
    %766 = memref.load %arg3[%c9_325, %c7_326] : memref<16x8xf32, #tpu.memory_space<smem>>
    %767 = vector.broadcast %766 : f32 to vector<16x128xf32>
    %768 = arith.mulf %767, %377 : vector<16x128xf32>
    %769 = arith.addf %765, %768 : vector<16x128xf32>
    %770 = math.tanh %769 : vector<16x128xf32>
    %771 = arith.mulf %770, %0 : vector<16x128xf32>
    %cst_327 = arith.constant dense<0.000000e+00> : vector<128xf32>
    %772 = vector.multi_reduction <add>, %771, %cst_327 [0] : vector<16x128xf32> to vector<128xf32>
    %773 = vector.shape_cast %772 : vector<128xf32> to vector<1x128xf32>
    %774 = math.tanh %773 : vector<1x128xf32>
    %c0_328 = arith.constant 0 : index
    %c9_329 = arith.constant 9 : index
    %775 = memref.load %arg4[%c0_328, %c9_329] : memref<1x17xf32, #tpu.memory_space<smem>>
    %776 = vector.broadcast %775 : f32 to vector<1x128xf32>
    %777 = arith.mulf %776, %774 : vector<1x128xf32>
    %778 = arith.addf %738, %777 : vector<1x128xf32>
    %c10_330 = arith.constant 10 : index
    %c0_331 = arith.constant 0 : index
    %779 = memref.load %arg3[%c10_330, %c0_331] : memref<16x8xf32, #tpu.memory_space<smem>>
    %780 = vector.broadcast %779 : f32 to vector<16x128xf32>
    %781 = arith.mulf %780, %48 : vector<16x128xf32>
    %c10_332 = arith.constant 10 : index
    %c1_333 = arith.constant 1 : index
    %782 = memref.load %arg3[%c10_332, %c1_333] : memref<16x8xf32, #tpu.memory_space<smem>>
    %783 = vector.broadcast %782 : f32 to vector<16x128xf32>
    %784 = arith.mulf %783, %95 : vector<16x128xf32>
    %785 = arith.addf %781, %784 : vector<16x128xf32>
    %c10_334 = arith.constant 10 : index
    %c2_335 = arith.constant 2 : index
    %786 = memref.load %arg3[%c10_334, %c2_335] : memref<16x8xf32, #tpu.memory_space<smem>>
    %787 = vector.broadcast %786 : f32 to vector<16x128xf32>
    %788 = arith.mulf %787, %142 : vector<16x128xf32>
    %789 = arith.addf %785, %788 : vector<16x128xf32>
    %c10_336 = arith.constant 10 : index
    %c3_337 = arith.constant 3 : index
    %790 = memref.load %arg3[%c10_336, %c3_337] : memref<16x8xf32, #tpu.memory_space<smem>>
    %791 = vector.broadcast %790 : f32 to vector<16x128xf32>
    %792 = arith.mulf %791, %189 : vector<16x128xf32>
    %793 = arith.addf %789, %792 : vector<16x128xf32>
    %c10_338 = arith.constant 10 : index
    %c4_339 = arith.constant 4 : index
    %794 = memref.load %arg3[%c10_338, %c4_339] : memref<16x8xf32, #tpu.memory_space<smem>>
    %795 = vector.broadcast %794 : f32 to vector<16x128xf32>
    %796 = arith.mulf %795, %236 : vector<16x128xf32>
    %797 = arith.addf %793, %796 : vector<16x128xf32>
    %c10_340 = arith.constant 10 : index
    %c5_341 = arith.constant 5 : index
    %798 = memref.load %arg3[%c10_340, %c5_341] : memref<16x8xf32, #tpu.memory_space<smem>>
    %799 = vector.broadcast %798 : f32 to vector<16x128xf32>
    %800 = arith.mulf %799, %283 : vector<16x128xf32>
    %801 = arith.addf %797, %800 : vector<16x128xf32>
    %c10_342 = arith.constant 10 : index
    %c6_343 = arith.constant 6 : index
    %802 = memref.load %arg3[%c10_342, %c6_343] : memref<16x8xf32, #tpu.memory_space<smem>>
    %803 = vector.broadcast %802 : f32 to vector<16x128xf32>
    %804 = arith.mulf %803, %330 : vector<16x128xf32>
    %805 = arith.addf %801, %804 : vector<16x128xf32>
    %c10_344 = arith.constant 10 : index
    %c7_345 = arith.constant 7 : index
    %806 = memref.load %arg3[%c10_344, %c7_345] : memref<16x8xf32, #tpu.memory_space<smem>>
    %807 = vector.broadcast %806 : f32 to vector<16x128xf32>
    %808 = arith.mulf %807, %377 : vector<16x128xf32>
    %809 = arith.addf %805, %808 : vector<16x128xf32>
    %810 = math.tanh %809 : vector<16x128xf32>
    %811 = arith.mulf %810, %0 : vector<16x128xf32>
    %cst_346 = arith.constant dense<0.000000e+00> : vector<128xf32>
    %812 = vector.multi_reduction <add>, %811, %cst_346 [0] : vector<16x128xf32> to vector<128xf32>
    %813 = vector.shape_cast %812 : vector<128xf32> to vector<1x128xf32>
    %814 = math.tanh %813 : vector<1x128xf32>
    %c0_347 = arith.constant 0 : index
    %c10_348 = arith.constant 10 : index
    %815 = memref.load %arg4[%c0_347, %c10_348] : memref<1x17xf32, #tpu.memory_space<smem>>
    %816 = vector.broadcast %815 : f32 to vector<1x128xf32>
    %817 = arith.mulf %816, %814 : vector<1x128xf32>
    %818 = arith.addf %778, %817 : vector<1x128xf32>
    %c11_349 = arith.constant 11 : index
    %c0_350 = arith.constant 0 : index
    %819 = memref.load %arg3[%c11_349, %c0_350] : memref<16x8xf32, #tpu.memory_space<smem>>
    %820 = vector.broadcast %819 : f32 to vector<16x128xf32>
    %821 = arith.mulf %820, %48 : vector<16x128xf32>
    %c11_351 = arith.constant 11 : index
    %c1_352 = arith.constant 1 : index
    %822 = memref.load %arg3[%c11_351, %c1_352] : memref<16x8xf32, #tpu.memory_space<smem>>
    %823 = vector.broadcast %822 : f32 to vector<16x128xf32>
    %824 = arith.mulf %823, %95 : vector<16x128xf32>
    %825 = arith.addf %821, %824 : vector<16x128xf32>
    %c11_353 = arith.constant 11 : index
    %c2_354 = arith.constant 2 : index
    %826 = memref.load %arg3[%c11_353, %c2_354] : memref<16x8xf32, #tpu.memory_space<smem>>
    %827 = vector.broadcast %826 : f32 to vector<16x128xf32>
    %828 = arith.mulf %827, %142 : vector<16x128xf32>
    %829 = arith.addf %825, %828 : vector<16x128xf32>
    %c11_355 = arith.constant 11 : index
    %c3_356 = arith.constant 3 : index
    %830 = memref.load %arg3[%c11_355, %c3_356] : memref<16x8xf32, #tpu.memory_space<smem>>
    %831 = vector.broadcast %830 : f32 to vector<16x128xf32>
    %832 = arith.mulf %831, %189 : vector<16x128xf32>
    %833 = arith.addf %829, %832 : vector<16x128xf32>
    %c11_357 = arith.constant 11 : index
    %c4_358 = arith.constant 4 : index
    %834 = memref.load %arg3[%c11_357, %c4_358] : memref<16x8xf32, #tpu.memory_space<smem>>
    %835 = vector.broadcast %834 : f32 to vector<16x128xf32>
    %836 = arith.mulf %835, %236 : vector<16x128xf32>
    %837 = arith.addf %833, %836 : vector<16x128xf32>
    %c11_359 = arith.constant 11 : index
    %c5_360 = arith.constant 5 : index
    %838 = memref.load %arg3[%c11_359, %c5_360] : memref<16x8xf32, #tpu.memory_space<smem>>
    %839 = vector.broadcast %838 : f32 to vector<16x128xf32>
    %840 = arith.mulf %839, %283 : vector<16x128xf32>
    %841 = arith.addf %837, %840 : vector<16x128xf32>
    %c11_361 = arith.constant 11 : index
    %c6_362 = arith.constant 6 : index
    %842 = memref.load %arg3[%c11_361, %c6_362] : memref<16x8xf32, #tpu.memory_space<smem>>
    %843 = vector.broadcast %842 : f32 to vector<16x128xf32>
    %844 = arith.mulf %843, %330 : vector<16x128xf32>
    %845 = arith.addf %841, %844 : vector<16x128xf32>
    %c11_363 = arith.constant 11 : index
    %c7_364 = arith.constant 7 : index
    %846 = memref.load %arg3[%c11_363, %c7_364] : memref<16x8xf32, #tpu.memory_space<smem>>
    %847 = vector.broadcast %846 : f32 to vector<16x128xf32>
    %848 = arith.mulf %847, %377 : vector<16x128xf32>
    %849 = arith.addf %845, %848 : vector<16x128xf32>
    %850 = math.tanh %849 : vector<16x128xf32>
    %851 = arith.mulf %850, %0 : vector<16x128xf32>
    %cst_365 = arith.constant dense<0.000000e+00> : vector<128xf32>
    %852 = vector.multi_reduction <add>, %851, %cst_365 [0] : vector<16x128xf32> to vector<128xf32>
    %853 = vector.shape_cast %852 : vector<128xf32> to vector<1x128xf32>
    %854 = math.tanh %853 : vector<1x128xf32>
    %c0_366 = arith.constant 0 : index
    %c11_367 = arith.constant 11 : index
    %855 = memref.load %arg4[%c0_366, %c11_367] : memref<1x17xf32, #tpu.memory_space<smem>>
    %856 = vector.broadcast %855 : f32 to vector<1x128xf32>
    %857 = arith.mulf %856, %854 : vector<1x128xf32>
    %858 = arith.addf %818, %857 : vector<1x128xf32>
    %c12_368 = arith.constant 12 : index
    %c0_369 = arith.constant 0 : index
    %859 = memref.load %arg3[%c12_368, %c0_369] : memref<16x8xf32, #tpu.memory_space<smem>>
    %860 = vector.broadcast %859 : f32 to vector<16x128xf32>
    %861 = arith.mulf %860, %48 : vector<16x128xf32>
    %c12_370 = arith.constant 12 : index
    %c1_371 = arith.constant 1 : index
    %862 = memref.load %arg3[%c12_370, %c1_371] : memref<16x8xf32, #tpu.memory_space<smem>>
    %863 = vector.broadcast %862 : f32 to vector<16x128xf32>
    %864 = arith.mulf %863, %95 : vector<16x128xf32>
    %865 = arith.addf %861, %864 : vector<16x128xf32>
    %c12_372 = arith.constant 12 : index
    %c2_373 = arith.constant 2 : index
    %866 = memref.load %arg3[%c12_372, %c2_373] : memref<16x8xf32, #tpu.memory_space<smem>>
    %867 = vector.broadcast %866 : f32 to vector<16x128xf32>
    %868 = arith.mulf %867, %142 : vector<16x128xf32>
    %869 = arith.addf %865, %868 : vector<16x128xf32>
    %c12_374 = arith.constant 12 : index
    %c3_375 = arith.constant 3 : index
    %870 = memref.load %arg3[%c12_374, %c3_375] : memref<16x8xf32, #tpu.memory_space<smem>>
    %871 = vector.broadcast %870 : f32 to vector<16x128xf32>
    %872 = arith.mulf %871, %189 : vector<16x128xf32>
    %873 = arith.addf %869, %872 : vector<16x128xf32>
    %c12_376 = arith.constant 12 : index
    %c4_377 = arith.constant 4 : index
    %874 = memref.load %arg3[%c12_376, %c4_377] : memref<16x8xf32, #tpu.memory_space<smem>>
    %875 = vector.broadcast %874 : f32 to vector<16x128xf32>
    %876 = arith.mulf %875, %236 : vector<16x128xf32>
    %877 = arith.addf %873, %876 : vector<16x128xf32>
    %c12_378 = arith.constant 12 : index
    %c5_379 = arith.constant 5 : index
    %878 = memref.load %arg3[%c12_378, %c5_379] : memref<16x8xf32, #tpu.memory_space<smem>>
    %879 = vector.broadcast %878 : f32 to vector<16x128xf32>
    %880 = arith.mulf %879, %283 : vector<16x128xf32>
    %881 = arith.addf %877, %880 : vector<16x128xf32>
    %c12_380 = arith.constant 12 : index
    %c6_381 = arith.constant 6 : index
    %882 = memref.load %arg3[%c12_380, %c6_381] : memref<16x8xf32, #tpu.memory_space<smem>>
    %883 = vector.broadcast %882 : f32 to vector<16x128xf32>
    %884 = arith.mulf %883, %330 : vector<16x128xf32>
    %885 = arith.addf %881, %884 : vector<16x128xf32>
    %c12_382 = arith.constant 12 : index
    %c7_383 = arith.constant 7 : index
    %886 = memref.load %arg3[%c12_382, %c7_383] : memref<16x8xf32, #tpu.memory_space<smem>>
    %887 = vector.broadcast %886 : f32 to vector<16x128xf32>
    %888 = arith.mulf %887, %377 : vector<16x128xf32>
    %889 = arith.addf %885, %888 : vector<16x128xf32>
    %890 = math.tanh %889 : vector<16x128xf32>
    %891 = arith.mulf %890, %0 : vector<16x128xf32>
    %cst_384 = arith.constant dense<0.000000e+00> : vector<128xf32>
    %892 = vector.multi_reduction <add>, %891, %cst_384 [0] : vector<16x128xf32> to vector<128xf32>
    %893 = vector.shape_cast %892 : vector<128xf32> to vector<1x128xf32>
    %894 = math.tanh %893 : vector<1x128xf32>
    %c0_385 = arith.constant 0 : index
    %c12_386 = arith.constant 12 : index
    %895 = memref.load %arg4[%c0_385, %c12_386] : memref<1x17xf32, #tpu.memory_space<smem>>
    %896 = vector.broadcast %895 : f32 to vector<1x128xf32>
    %897 = arith.mulf %896, %894 : vector<1x128xf32>
    %898 = arith.addf %858, %897 : vector<1x128xf32>
    %c13_387 = arith.constant 13 : index
    %c0_388 = arith.constant 0 : index
    %899 = memref.load %arg3[%c13_387, %c0_388] : memref<16x8xf32, #tpu.memory_space<smem>>
    %900 = vector.broadcast %899 : f32 to vector<16x128xf32>
    %901 = arith.mulf %900, %48 : vector<16x128xf32>
    %c13_389 = arith.constant 13 : index
    %c1_390 = arith.constant 1 : index
    %902 = memref.load %arg3[%c13_389, %c1_390] : memref<16x8xf32, #tpu.memory_space<smem>>
    %903 = vector.broadcast %902 : f32 to vector<16x128xf32>
    %904 = arith.mulf %903, %95 : vector<16x128xf32>
    %905 = arith.addf %901, %904 : vector<16x128xf32>
    %c13_391 = arith.constant 13 : index
    %c2_392 = arith.constant 2 : index
    %906 = memref.load %arg3[%c13_391, %c2_392] : memref<16x8xf32, #tpu.memory_space<smem>>
    %907 = vector.broadcast %906 : f32 to vector<16x128xf32>
    %908 = arith.mulf %907, %142 : vector<16x128xf32>
    %909 = arith.addf %905, %908 : vector<16x128xf32>
    %c13_393 = arith.constant 13 : index
    %c3_394 = arith.constant 3 : index
    %910 = memref.load %arg3[%c13_393, %c3_394] : memref<16x8xf32, #tpu.memory_space<smem>>
    %911 = vector.broadcast %910 : f32 to vector<16x128xf32>
    %912 = arith.mulf %911, %189 : vector<16x128xf32>
    %913 = arith.addf %909, %912 : vector<16x128xf32>
    %c13_395 = arith.constant 13 : index
    %c4_396 = arith.constant 4 : index
    %914 = memref.load %arg3[%c13_395, %c4_396] : memref<16x8xf32, #tpu.memory_space<smem>>
    %915 = vector.broadcast %914 : f32 to vector<16x128xf32>
    %916 = arith.mulf %915, %236 : vector<16x128xf32>
    %917 = arith.addf %913, %916 : vector<16x128xf32>
    %c13_397 = arith.constant 13 : index
    %c5_398 = arith.constant 5 : index
    %918 = memref.load %arg3[%c13_397, %c5_398] : memref<16x8xf32, #tpu.memory_space<smem>>
    %919 = vector.broadcast %918 : f32 to vector<16x128xf32>
    %920 = arith.mulf %919, %283 : vector<16x128xf32>
    %921 = arith.addf %917, %920 : vector<16x128xf32>
    %c13_399 = arith.constant 13 : index
    %c6_400 = arith.constant 6 : index
    %922 = memref.load %arg3[%c13_399, %c6_400] : memref<16x8xf32, #tpu.memory_space<smem>>
    %923 = vector.broadcast %922 : f32 to vector<16x128xf32>
    %924 = arith.mulf %923, %330 : vector<16x128xf32>
    %925 = arith.addf %921, %924 : vector<16x128xf32>
    %c13_401 = arith.constant 13 : index
    %c7_402 = arith.constant 7 : index
    %926 = memref.load %arg3[%c13_401, %c7_402] : memref<16x8xf32, #tpu.memory_space<smem>>
    %927 = vector.broadcast %926 : f32 to vector<16x128xf32>
    %928 = arith.mulf %927, %377 : vector<16x128xf32>
    %929 = arith.addf %925, %928 : vector<16x128xf32>
    %930 = math.tanh %929 : vector<16x128xf32>
    %931 = arith.mulf %930, %0 : vector<16x128xf32>
    %cst_403 = arith.constant dense<0.000000e+00> : vector<128xf32>
    %932 = vector.multi_reduction <add>, %931, %cst_403 [0] : vector<16x128xf32> to vector<128xf32>
    %933 = vector.shape_cast %932 : vector<128xf32> to vector<1x128xf32>
    %934 = math.tanh %933 : vector<1x128xf32>
    %c0_404 = arith.constant 0 : index
    %c13_405 = arith.constant 13 : index
    %935 = memref.load %arg4[%c0_404, %c13_405] : memref<1x17xf32, #tpu.memory_space<smem>>
    %936 = vector.broadcast %935 : f32 to vector<1x128xf32>
    %937 = arith.mulf %936, %934 : vector<1x128xf32>
    %938 = arith.addf %898, %937 : vector<1x128xf32>
    %c14_406 = arith.constant 14 : index
    %c0_407 = arith.constant 0 : index
    %939 = memref.load %arg3[%c14_406, %c0_407] : memref<16x8xf32, #tpu.memory_space<smem>>
    %940 = vector.broadcast %939 : f32 to vector<16x128xf32>
    %941 = arith.mulf %940, %48 : vector<16x128xf32>
    %c14_408 = arith.constant 14 : index
    %c1_409 = arith.constant 1 : index
    %942 = memref.load %arg3[%c14_408, %c1_409] : memref<16x8xf32, #tpu.memory_space<smem>>
    %943 = vector.broadcast %942 : f32 to vector<16x128xf32>
    %944 = arith.mulf %943, %95 : vector<16x128xf32>
    %945 = arith.addf %941, %944 : vector<16x128xf32>
    %c14_410 = arith.constant 14 : index
    %c2_411 = arith.constant 2 : index
    %946 = memref.load %arg3[%c14_410, %c2_411] : memref<16x8xf32, #tpu.memory_space<smem>>
    %947 = vector.broadcast %946 : f32 to vector<16x128xf32>
    %948 = arith.mulf %947, %142 : vector<16x128xf32>
    %949 = arith.addf %945, %948 : vector<16x128xf32>
    %c14_412 = arith.constant 14 : index
    %c3_413 = arith.constant 3 : index
    %950 = memref.load %arg3[%c14_412, %c3_413] : memref<16x8xf32, #tpu.memory_space<smem>>
    %951 = vector.broadcast %950 : f32 to vector<16x128xf32>
    %952 = arith.mulf %951, %189 : vector<16x128xf32>
    %953 = arith.addf %949, %952 : vector<16x128xf32>
    %c14_414 = arith.constant 14 : index
    %c4_415 = arith.constant 4 : index
    %954 = memref.load %arg3[%c14_414, %c4_415] : memref<16x8xf32, #tpu.memory_space<smem>>
    %955 = vector.broadcast %954 : f32 to vector<16x128xf32>
    %956 = arith.mulf %955, %236 : vector<16x128xf32>
    %957 = arith.addf %953, %956 : vector<16x128xf32>
    %c14_416 = arith.constant 14 : index
    %c5_417 = arith.constant 5 : index
    %958 = memref.load %arg3[%c14_416, %c5_417] : memref<16x8xf32, #tpu.memory_space<smem>>
    %959 = vector.broadcast %958 : f32 to vector<16x128xf32>
    %960 = arith.mulf %959, %283 : vector<16x128xf32>
    %961 = arith.addf %957, %960 : vector<16x128xf32>
    %c14_418 = arith.constant 14 : index
    %c6_419 = arith.constant 6 : index
    %962 = memref.load %arg3[%c14_418, %c6_419] : memref<16x8xf32, #tpu.memory_space<smem>>
    %963 = vector.broadcast %962 : f32 to vector<16x128xf32>
    %964 = arith.mulf %963, %330 : vector<16x128xf32>
    %965 = arith.addf %961, %964 : vector<16x128xf32>
    %c14_420 = arith.constant 14 : index
    %c7_421 = arith.constant 7 : index
    %966 = memref.load %arg3[%c14_420, %c7_421] : memref<16x8xf32, #tpu.memory_space<smem>>
    %967 = vector.broadcast %966 : f32 to vector<16x128xf32>
    %968 = arith.mulf %967, %377 : vector<16x128xf32>
    %969 = arith.addf %965, %968 : vector<16x128xf32>
    %970 = math.tanh %969 : vector<16x128xf32>
    %971 = arith.mulf %970, %0 : vector<16x128xf32>
    %cst_422 = arith.constant dense<0.000000e+00> : vector<128xf32>
    %972 = vector.multi_reduction <add>, %971, %cst_422 [0] : vector<16x128xf32> to vector<128xf32>
    %973 = vector.shape_cast %972 : vector<128xf32> to vector<1x128xf32>
    %974 = math.tanh %973 : vector<1x128xf32>
    %c0_423 = arith.constant 0 : index
    %c14_424 = arith.constant 14 : index
    %975 = memref.load %arg4[%c0_423, %c14_424] : memref<1x17xf32, #tpu.memory_space<smem>>
    %976 = vector.broadcast %975 : f32 to vector<1x128xf32>
    %977 = arith.mulf %976, %974 : vector<1x128xf32>
    %978 = arith.addf %938, %977 : vector<1x128xf32>
    %c15_425 = arith.constant 15 : index
    %c0_426 = arith.constant 0 : index
    %979 = memref.load %arg3[%c15_425, %c0_426] : memref<16x8xf32, #tpu.memory_space<smem>>
    %980 = vector.broadcast %979 : f32 to vector<16x128xf32>
    %981 = arith.mulf %980, %48 : vector<16x128xf32>
    %c15_427 = arith.constant 15 : index
    %c1_428 = arith.constant 1 : index
    %982 = memref.load %arg3[%c15_427, %c1_428] : memref<16x8xf32, #tpu.memory_space<smem>>
    %983 = vector.broadcast %982 : f32 to vector<16x128xf32>
    %984 = arith.mulf %983, %95 : vector<16x128xf32>
    %985 = arith.addf %981, %984 : vector<16x128xf32>
    %c15_429 = arith.constant 15 : index
    %c2_430 = arith.constant 2 : index
    %986 = memref.load %arg3[%c15_429, %c2_430] : memref<16x8xf32, #tpu.memory_space<smem>>
    %987 = vector.broadcast %986 : f32 to vector<16x128xf32>
    %988 = arith.mulf %987, %142 : vector<16x128xf32>
    %989 = arith.addf %985, %988 : vector<16x128xf32>
    %c15_431 = arith.constant 15 : index
    %c3_432 = arith.constant 3 : index
    %990 = memref.load %arg3[%c15_431, %c3_432] : memref<16x8xf32, #tpu.memory_space<smem>>
    %991 = vector.broadcast %990 : f32 to vector<16x128xf32>
    %992 = arith.mulf %991, %189 : vector<16x128xf32>
    %993 = arith.addf %989, %992 : vector<16x128xf32>
    %c15_433 = arith.constant 15 : index
    %c4_434 = arith.constant 4 : index
    %994 = memref.load %arg3[%c15_433, %c4_434] : memref<16x8xf32, #tpu.memory_space<smem>>
    %995 = vector.broadcast %994 : f32 to vector<16x128xf32>
    %996 = arith.mulf %995, %236 : vector<16x128xf32>
    %997 = arith.addf %993, %996 : vector<16x128xf32>
    %c15_435 = arith.constant 15 : index
    %c5_436 = arith.constant 5 : index
    %998 = memref.load %arg3[%c15_435, %c5_436] : memref<16x8xf32, #tpu.memory_space<smem>>
    %999 = vector.broadcast %998 : f32 to vector<16x128xf32>
    %1000 = arith.mulf %999, %283 : vector<16x128xf32>
    %1001 = arith.addf %997, %1000 : vector<16x128xf32>
    %c15_437 = arith.constant 15 : index
    %c6_438 = arith.constant 6 : index
    %1002 = memref.load %arg3[%c15_437, %c6_438] : memref<16x8xf32, #tpu.memory_space<smem>>
    %1003 = vector.broadcast %1002 : f32 to vector<16x128xf32>
    %1004 = arith.mulf %1003, %330 : vector<16x128xf32>
    %1005 = arith.addf %1001, %1004 : vector<16x128xf32>
    %c15_439 = arith.constant 15 : index
    %c7_440 = arith.constant 7 : index
    %1006 = memref.load %arg3[%c15_439, %c7_440] : memref<16x8xf32, #tpu.memory_space<smem>>
    %1007 = vector.broadcast %1006 : f32 to vector<16x128xf32>
    %1008 = arith.mulf %1007, %377 : vector<16x128xf32>
    %1009 = arith.addf %1005, %1008 : vector<16x128xf32>
    %1010 = math.tanh %1009 : vector<16x128xf32>
    %1011 = arith.mulf %1010, %0 : vector<16x128xf32>
    %cst_441 = arith.constant dense<0.000000e+00> : vector<128xf32>
    %1012 = vector.multi_reduction <add>, %1011, %cst_441 [0] : vector<16x128xf32> to vector<128xf32>
    %1013 = vector.shape_cast %1012 : vector<128xf32> to vector<1x128xf32>
    %1014 = math.tanh %1013 : vector<1x128xf32>
    %c0_442 = arith.constant 0 : index
    %c15_443 = arith.constant 15 : index
    %1015 = memref.load %arg4[%c0_442, %c15_443] : memref<1x17xf32, #tpu.memory_space<smem>>
    %1016 = vector.broadcast %1015 : f32 to vector<1x128xf32>
    %1017 = arith.mulf %1016, %1014 : vector<1x128xf32>
    %1018 = arith.addf %978, %1017 : vector<1x128xf32>
    %c0_444 = arith.constant 0 : index
    %c16_445 = arith.constant 16 : index
    %1019 = memref.load %arg4[%c0_444, %c16_445] : memref<1x17xf32, #tpu.memory_space<smem>>
    %1020 = vector.broadcast %1019 : f32 to vector<1x128xf32>
    %1021 = arith.addf %1018, %1020 : vector<1x128xf32>
    %1022 = math.tanh %1021 : vector<1x128xf32>
    %c0_446 = arith.constant 0 : index
    %c0_447 = arith.constant 0 : index
    %1023 = vector.load %arg5[%c0_446, %c0_447] : memref<1x128xf32, #tpu.memory_space<vmem>>, vector<1x128xf32>
    tpu.vector_store %arg5[%c0_446, %c0_447], %1022 {strides = array<i32>} : memref<1x128xf32, #tpu.memory_space<vmem>>, vector<1x128xf32>,
    return
  }
  func.func @transform_0(%arg0: i32) -> (i32, i32) {
    %c0_i32 = arith.constant 0 : i32
    %c0_i32_0 = arith.constant 0 : i32
    return %c0_i32, %arg0 : i32, i32
  }
  func.func @transform_1(%arg0: i32) -> (i32, i32) {
    %c0_i32 = arith.constant 0 : i32
    %c0_i32_0 = arith.constant 0 : i32
    %c0_i32_1 = arith.constant 0 : i32
    return %c0_i32, %c0_i32_0 : i32, i32
  }
  func.func @transform_2(%arg0: i32) -> (i32, i32) {
    %c0_i32 = arith.constant 0 : i32
    %c0_i32_0 = arith.constant 0 : i32
    %c0_i32_1 = arith.constant 0 : i32
    return %c0_i32, %c0_i32_0 : i32, i32
  }
  func.func @transform_3(%arg0: i32) -> (i32, i32) {
    %c0_i32 = arith.constant 0 : i32
    %c0_i32_0 = arith.constant 0 : i32
    %c0_i32_1 = arith.constant 0 : i32
    return %c0_i32, %c0_i32_0 : i32, i32
  }
  func.func @transform_4(%arg0: i32) -> (i32, i32) {
    %c0_i32 = arith.constant 0 : i32
    %c0_i32_0 = arith.constant 0 : i32
    return %c0_i32, %arg0 : i32, i32
  }
}

</mosaic_0001>

<bundles_post_ra>
// kernel: tpu_custom_call.1
= control target key start
LH: loop header
LB: loop body
LE: loop exit
PB: predicated region body
PF: predicated region fallthrough
CT: control target
= control target key end

     0   :  { %9 = vsyncpa [#allocation4], 0  ;;  %s3647_s0 = inlined_call_operand.vmem [shape: f32[17,128], index: 0, kind: input, shape index: {}]   ;;  %s3648_s1 = inlined_call_operand.vmem [shape: f32[24,3], index: 1, kind: input, shape index: {}]   ;;  %s3649_s2 = inlined_call_operand.vmem [shape: f32[16,8], index: 2, kind: input, shape index: {}]   ;;  %s3650_s3 = inlined_call_operand.vmem [shape: f32[1,17], index: 3, kind: input, shape index: {}]   ;;  %s3651_s4 = inlined_call_operand.hbm [shape: f32[1,128], index: 4, kind: output, shape index: {}]  }
   0x1   :  { %10 = vsyncpa [#allocation6], 0 }
   0x2   :  { %11 = vsyncpa [#allocation3], 0  ;;  %s31_s17 = sshll.u32 %s3649_s2, 4  ;;  %s19_s20 = sshll.u32 %s3648_s1, 4  ;;  %s32_s17 = int_to_ptr.vmem [resolvable:$true] %s31_s17  ;;  %s20_s20 = int_to_ptr.vmem [resolvable:$true] %s19_s20 }
   0x3   :  { %s2260_s21 = scalar_lea.vmem %s32_s17, 256  ;;  %p2265_p1 = scmp.lt.s32.totalorder %s32_s17, %s32_s17 }
   0x4   :  { %p2261_p0 = scmp.ne.s32.totalorder %s32_s17, %s2260_s21  ;;  %p2266_p2 = scmp.lt.s32.totalorder %s2260_s21, %s2260_s21 }
   0x6   :  { %p2267_p3 = por %p2266_p2, %p2265_p1 }
   0x8   :  { %p2268_p4 = pnand %p2267_p3, %p2261_p0 }
   0xa   :  { %2271 = shalt.err (!%p2268_p4)
}
   0xb   :  { %s2322_s22 = smov [#allocation5]   ;;  %s2323_s23 = smov 128  }
   0xc   :  { %s2324_s24 = smov 8   ;;  %s2272_s25 = scalar_lea.vmem %s20_s20, 384 }
   0xd   :  { %37 = dma.vmem_to_smem %s32_s17, 256, %s2322_s22, [#allocation6], %s2323_s23, %s2323_s23, %s2324_s24  }
   0xe   :  { %p2273_p5 = scmp.ne.s32.totalorder %s20_s20, %s2272_s25  ;;  %p2277_p6 = scmp.lt.s32.totalorder %s20_s20, %s20_s20 }
   0xf   :  { %p2278_p7 = scmp.lt.s32.totalorder %s2272_s25, %s2272_s25 }
  0x11   :  { %p2279_p8 = por %p2278_p7, %p2277_p6 }
  0x13   :  { %p2280_p9 = pnand %p2279_p8, %p2273_p5 }
  0x15   :  { %2283 = shalt.err (!%p2280_p9)
}
  0x16   :  { %s2325_s1 = smov [#allocation2]   ;;  %s44_s27 = sshll.u32 %s3650_s3, 4  ;;  %s45_s27 = int_to_ptr.vmem [resolvable:$true] %s44_s27 }
  0x17   :  { %25 = dma.vmem_to_smem %s20_s20, 384, %s2325_s1, [#allocation4], %s2323_s23, %s2323_s23, %s2324_s24  }
  0x18   :  { %s2284_s28 = scalar_lea.vmem %s45_s27, 16  ;;  %p2289_p11 = scmp.lt.s32.totalorder %s45_s27, %s45_s27 }
  0x19   :  { %p2285_p10 = scmp.ne.s32.totalorder %s45_s27, %s2284_s28  ;;  %p2290_p12 = scmp.lt.s32.totalorder %s2284_s28, %s2284_s28 }
  0x1b   :  { %p2291_p13 = por %p2290_p12, %p2289_p11 }
  0x1d   :  { %p2292_p0 = pnand %p2291_p13, %p2285_p10 }
  0x1f   :  { %2295 = shalt.err (!%p2292_p0)
}
  0x20   :  { %s2326_s29 = smov [#allocation7]  }
  0x21   :  { %47 = dma.vmem_to_smem %s45_s27, 16, %s2326_s29, [#allocation6]  }
  0x22   :  { %2316 = dma.done.wait [#allocation4], 384  }
  0x23   :  { %2317 = vsyncadd [#allocation4], 4294966912 }
  0x24   :  { %2318 = dma.done.wait [#allocation6], 272  }
  0x25   :  { %2319 = vsyncadd [#allocation6], 4294967024 }
  0x26   :  { %57 = sfence }
  0x27   :  { %s61_s30 = sld [smem:[#allocation2]]  ;;  %v71_v0 = vlaneseq  ;;  %v2365_v2 = vld [vmem:[%s3647_s0 + $0x10] sm:$0x1]  ;;  %v2370_v3 = vld [vmem:[%s3647_s0] sm:$0xff]  ;;  %v2377_v5 = vld [vmem:[%s3647_s0 + $0x8] sm:$0xff] }
  0x28   :  { %s1714_s5 = sld [smem:[#allocation2 + $0x1]] }
  0x29   :  { %s1715_s6 = sld [smem:[#allocation2 + $0x2]]  ;;  %v72_v1 = vshrl.u32 %v71_v0, 7 }
  0x2a   :  { %s1716_s3 = sld [smem:[#allocation2 + $0x400]] }
  0x2b   :  { %s1717_s7 = sld [smem:[#allocation2 + $0x401]]  ;;  %v2380_v9 = vsub.s32 0, %v72_v1 }
  0x2c   :  { %s1718_s10 = sld [smem:[#allocation2 + $0x402]] }
  0x2d   :  { %v62_v4 = vstv %s61_s30  ;;  %s2372_s13 = sld [smem:[#allocation2 + $0x800]] }
  0x2e   :  { %v66_v6 = vstv %s1714_s5  ;;  %s1720_s16 = sld [smem:[#allocation2 + $0x801]]  ;;  %v63_v10 = vmul.f32 %v62_v4, %v2370_v3  ;;  %v64_v11 = vmul.f32 %v62_v4, %v2377_v5 }
  0x2f   :  { %v67_v7 = vmul.f32 %v66_v6, %v2365_v2  ;;  %v69_v8 = vstv %s1715_s6  ;;  %s1721_s17 = sld [smem:[#allocation2 + $0x802]] }
  0x30   :  { %s2383_s18 = sld [smem:[#allocation2 + $0x80]]  ;;  %v78_v13 = vstv %s1716_s3 }
  0x31   :  { %v70_v12 = vadd.f32 %v69_v8, %v67_v7  ;;  %v82_v14 = vstv %s1717_s7  ;;  %s2386_s19 = sld [smem:[#allocation2 + $0x81]]  ;;  %v79_v19 = vmul.f32 %v78_v13, %v2370_v3  ;;  %v80_v20 = vmul.f32 %v78_v13, %v2377_v5 }
  0x32   :  { %v83_v15 = vmul.f32 %v82_v14, %v2365_v2  ;;  %v85_v16 = vstv %s1718_s10  ;;  %s2389_s20 = sld [smem:[#allocation2 + $0x82]] }
  0x33   :  { %v74_v17 = vrot.slane %v70_v12, %v2380_v9  ;;  %v94_v18 = vstv %s2372_s13  ;;  %s2393_s21 = sld [smem:[#allocation2 + $0x480]] }
  0x34   :  { %v86_v21 = vadd.f32 %v85_v16, %v83_v15  ;;  %v98_v22 = vstv %s1720_s16  ;;  %s2397_s22 = sld [smem:[#allocation2 + $0x481]]  ;;  %v95_v28 = vmul.f32 %v94_v18, %v2370_v3  ;;  %v96_v30 = vmul.f32 %v94_v18, %v2377_v5 }
  0x35   :  { %v75_v23 = vadd.f32 %v74_v17, %v63_v10  ;;  %v76_v24 = vadd.f32 %v74_v17, %v64_v11  ;;  %v99_v25 = vmul.f32 %v98_v22, %v2365_v2  ;;  %v101_v26 = vstv %s1721_s17  ;;  %s2400_s23 = sld [smem:[#allocation2 + $0x482]] }
  0x36   :  { %v90_v27 = vrot.slane %v86_v21, %v2380_v9  ;;  %v142_v29 = vstv %s2383_s18  ;;  %s2405_s24 = sld [smem:[#allocation2 + $0x880]] }
  0x37   :  { %v102_v31 = vadd.f32 %v101_v26, %v99_v25  ;;  %v1722_v32 = vmul.f32 -1.442695, %v75_v23  ;;  %v1723_v33 = vmul.f32 -1.442695, %v76_v24  ;;  %s2408_s25 = sld [smem:[#allocation2 + $0x881]]  ;;  %v143_v36 = vmul.f32 %v142_v29, %v2370_v3 }
  0x38   :  { %v91_v34 = vadd.f32 %v90_v27, %v79_v19  ;;  %v92_v35 = vadd.f32 %v90_v27, %v80_v20  ;;  %v146_v37 = vstv %s2386_s19  ;;  %s2412_s1 = sld [smem:[#allocation2 + $0x882]]  ;;  %v149_v40 = vstv %s2389_s20 }
  0x39   :  { %v106_v38 = vrot.slane %v102_v31, %v2380_v9  ;;  %1966 = vpow2.f32 %v1722_v32  ;;  %v147_v39 = vmul.f32 %v146_v37, %v2365_v2  ;;  %s2417_s2 = sld [smem:[#allocation2 + $0x100]]  ;;  %v144_v41 = vmul.f32 %v142_v29, %v2377_v5 }
  0x3a   :  { %1968 = vpow2.f32 %v1723_v33  ;;  %v158_v42 = vstv %s2393_s21  ;;  %v162_v43 = vstv %s2397_s22  ;;  %s2422_s26 = sld [smem:[#allocation2 + $0x101]] }
  0x3b   :  { %v107_v44 = vadd.f32 %v106_v38, %v95_v28  ;;  %v108_v45 = vadd.f32 %v106_v38, %v96_v30  ;;  %1970 = vtanh.f32 %v91_v34  ;;  %v150_v46 = vadd.f32 %v149_v40, %v147_v39  ;;  %s2424_s27 = sld [smem:[#allocation2 + $0x102]] }
  0x3c   :  { %1972 = vtanh.f32 %v92_v35  ;;  %v159_v47 = vmul.f32 %v158_v42, %v2370_v3  ;;  %v163_v48 = vmul.f32 %v162_v43, %v2365_v2  ;;  %s2428_s28 = sld [smem:[#allocation2 + $0x500]]  ;;  %v165_v52 = vstv %s2400_s23 }
  0x3d   :  { %v1724_v49 = vmul.f32 -1.442695, %v107_v44  ;;  %v1725_v50 = vmul.f32 -1.442695, %v108_v45  ;;  %v154_v51 = vrot.slane %v150_v46, %v2380_v9  ;;  %s2432_s29 = sld [smem:[#allocation2 + $0x501]]  ;;  %v160_v53 = vmul.f32 %v158_v42, %v2377_v5 }
  0x3e   :  { %v166_v54 = vadd.f32 %v165_v52, %v163_v48  ;;  %v174_v55 = vstv %s2405_s24  ;;  %v178_v56 = vstv %s2408_s25  ;;  %v181_v59 = vstv %s2412_s1  ;;  %s2438_s30 = sld [smem:[#allocation2 + $0x502]] }
  0x3f   :  { %1974 = vpow2.f32 %v1724_v49  ;;  %v155_v57 = vadd.f32 %v154_v51, %v143_v36  ;;  %v156_v58 = vadd.f32 %v154_v51, %v144_v41  ;;  %v179_v61 = vmul.f32 %v178_v56, %v2365_v2  ;;  %s2444_s5 = sld [smem:[#allocation2 + $0x900]] }
  0x40   :  { %1976 = vpow2.f32 %v1725_v50  ;;  %v170_v60 = vrot.slane %v166_v54, %v2380_v9  ;;  %v175_v62 = vmul.f32 %v174_v55, %v2370_v3  ;;  %v226_v1 = vstv %s2422_s26  ;;  %s2448_s6 = sld [smem:[#allocation2 + $0x901]] }
  0x41   :  { %v1735_v63 = vmul.f32 -1.442695, %v155_v57  ;;  %v1736_v0 = vmul.f32 -1.442695, %v156_v58  ;;  %v176_v6 = vmul.f32 %v174_v55, %v2377_v5  ;;  %v182_v7 = vadd.f32 %v181_v59, %v179_v61  ;;  %s2452_s3 = sld [smem:[#allocation2 + $0x902]] }
  0x42   :  { %v171_v4 = vadd.f32 %v170_v60, %v159_v47  ;;  %v222_v8 = vstv %s2417_s2  ;;  %v172_v10 = vadd.f32 %v170_v60, %v160_v53  ;;  %v227_v11 = vmul.f32 %v226_v1, %v2365_v2  ;;  %s2459_s7 = sld [smem:[#allocation2 + $0x180]] }
  0x43   :  { %1978 = vpow2.f32 %v1735_v63  ;;  %v229_v12 = vstv %s2424_s27  ;;  %v186_v13 = vrot.slane %v182_v7, %v2380_v9  ;;  %v242_v14 = vstv %s2432_s29  ;;  %s2462_s8 = sld [smem:[#allocation2 + $0x181]] }
  0x44   :  { %1980 = vpow2.f32 %v1736_v0  ;;  %v223_v15 = vmul.f32 %v222_v8, %v2370_v3  ;;  %v224_v16 = vmul.f32 %v222_v8, %v2377_v5  ;;  %v230_v17 = vadd.f32 %v229_v12, %v227_v11  ;;  %s2466_s9 = sld [smem:[#allocation2 + $0x182]] }
  0x45   :  { %v238_v18 = vstv %s2428_s28  ;;  %v187_v20 = vadd.f32 %v186_v13, %v175_v62  ;;  %v188_v21 = vadd.f32 %v186_v13, %v176_v6  ;;  %1982 = vtanh.f32 %v171_v4  ;;  %s2473_s10 = sld [smem:[#allocation2 + $0x581]] }
  0x46   :  { %v1967_v19 = vpop.eup %1966  ;;  %v243_v22 = vmul.f32 %v242_v14, %v2365_v2  ;;  %1984 = vtanh.f32 %v172_v10  ;;  %v234_v25 = vrot.slane %v230_v17, %v2380_v9  ;;  %v245_v26 = vstv %s2438_s30  ;;  %s2478_s11 = sld [smem:[#allocation2 + $0x580]] }
  0x47   :  { %v1969_v23 = vpop.eup %1968  ;;  %v115_v24 = vadd.f32 1.0, %v1967_v19  ;;  %v1737_v29 = vmul.f32 -1.442695, %v187_v20  ;;  %v1738_v30 = vmul.f32 -1.442695, %v188_v21  ;;  %v254_v35 = vstv %s2444_s5  ;;  %s2482_s12 = sld [smem:[#allocation2 + $0x582]] }
  0x48   :  { %v2468_v27 = vpop.eup %1970  ;;  %v116_v28 = vadd.f32 1.0, %v1969_v23  ;;  %v246_v31 = vadd.f32 %v245_v26, %v243_v22  ;;  %v235_v33 = vadd.f32 %v234_v25, %v223_v15  ;;  %v236_v34 = vadd.f32 %v234_v25, %v224_v16  ;;  %s2486_s13 = sld [smem:[#allocation2 + $0x980]] }
  0x49   :  { %v2470_v32 = vpop.eup %1972  ;;  %1986 = vrcp.f32 %v115_v24  ;;  %v239_v36 = vmul.f32 %v238_v18, %v2370_v3  ;;  %v258_v38 = vstv %s2448_s6  ;;  %v261_v40 = vstv %s2452_s3  ;;  %s2489_s14 = sld [smem:[#allocation2 + $0x981]] }
  0x4a   :  { %1988 = vrcp.f32 %v116_v28  ;;  %v250_v37 = vrot.slane %v246_v31, %v2380_v9  ;;  %v259_v39 = vmul.f32 %v258_v38, %v2365_v2  ;;  %v1748_v41 = vmul.f32 -1.442695, %v235_v33  ;;  %s2492_s15 = sld [smem:[#allocation2 + $0x982]] }
  0x4b   :  { %1990 = vpow2.f32 %v1737_v29  ;;  %v240_v43 = vmul.f32 %v238_v18, %v2377_v5  ;;  %v255_v44 = vmul.f32 %v254_v35, %v2370_v3  ;;  %v1749_v45 = vmul.f32 -1.442695, %v236_v34  ;;  %s2503_s16 = sld [smem:[#allocation2 + $0x200]] }
  0x4c   :  { %v1975_v42 = vpop.eup %1974  ;;  %1992 = vpow2.f32 %v1738_v30  ;;  %v256_v48 = vmul.f32 %v254_v35, %v2377_v5  ;;  %v262_v49 = vadd.f32 %v261_v40, %v259_v39  ;;  %v251_v51 = vadd.f32 %v250_v37, %v239_v36  ;;  %s2510_s17 = sld [smem:[#allocation2 + $0x201]] }
  0x4d   :  { %v1977_v46 = vpop.eup %1976  ;;  %v131_v47 = vadd.f32 1.0, %v1975_v42  ;;  %1994 = vpow2.f32 %v1748_v41  ;;  %v302_v52 = vstv %s2459_s7  ;;  %v306_v54 = vstv %s2462_s8  ;;  %s2515_s18 = sld [smem:[#allocation2 + $0x202]] }
  0x4e   :  { %v132_v50 = vadd.f32 1.0, %v1977_v46  ;;  %1996 = vpow2.f32 %v1749_v45  ;;  %v266_v53 = vrot.slane %v262_v49, %v2380_v9  ;;  %v309_v55 = vstv %s2466_s9  ;;  %s2518_s19 = sld [smem:[#allocation2 + $0x601]] }
  0x4f   :  { %1998 = vrcp.f32 %v131_v47  ;;  %v252_v57 = vadd.f32 %v250_v37, %v240_v43  ;;  %v307_v58 = vmul.f32 %v306_v54, %v2365_v2  ;;  %v322_v63 = vstv %s2473_s10  ;;  %s2526_s20 = sld [smem:[#allocation2 + $0x600]] }
  0x50   :  { %v1979_v56 = vpop.eup %1978  ;;  %2000 = vrcp.f32 %v132_v50  ;;  %v267_v61 = vadd.f32 %v266_v53, %v255_v44  ;;  %v268_v62 = vadd.f32 %v266_v53, %v256_v48  ;;  %v303_v1 = vmul.f32 %v302_v52, %v2370_v3  ;;  %s2529_s21 = sld [smem:[#allocation2 + $0x602]] }
  0x51   :  { %v1981_v59 = vpop.eup %1980  ;;  %v195_v60 = vadd.f32 1.0, %v1979_v56  ;;  %2002 = vtanh.f32 %v251_v51  ;;  %v310_v4 = vadd.f32 %v309_v55, %v307_v58  ;;  %v304_v10 = vmul.f32 %v302_v52, %v2377_v5  ;;  %s2533_s22 = sld [smem:[#allocation2 + $0xa00]] }
  0x52   :  { %v196_v0 = vadd.f32 1.0, %v1981_v59  ;;  %v2500_v6 = vpop.eup %1982  ;;  %v1750_v7 = vmul.f32 -1.442695, %v267_v61  ;;  %v1751_v8 = vmul.f32 -1.442695, %v268_v62  ;;  %v323_v13 = vmul.f32 %v322_v63, %v2365_v2  ;;  %s2539_s23 = sld [smem:[#allocation2 + $0xa01]] }
  0x53   :  { %2004 = vrcp.f32 %v195_v60  ;;  %v2505_v11 = vpop.eup %1984  ;;  %v314_v12 = vrot.slane %v310_v4, %v2380_v9  ;;  %v325_v14 = vstv %s2482_s12  ;;  %v318_v15 = vstv %s2478_s11  ;;  %s2544_s24 = sld [smem:[#allocation2 + $0xa02]] }
  0x54   :  { %2006 = vrcp.f32 %v196_v0  ;;  %v334_v16 = vstv %s2486_s13  ;;  %v338_v17 = vstv %s2489_s14  ;;  %v326_v20 = vadd.f32 %v325_v14, %v323_v13  ;;  %s2554_s25 = sld [smem:[#allocation2 + $0x280]] }
  0x55   :  { %2008 = vpow2.f32 %v1750_v7  ;;  %v315_v19 = vadd.f32 %v314_v12, %v303_v1  ;;  %v341_v21 = vstv %s2492_s15  ;;  %v316_v24 = vadd.f32 %v314_v12, %v304_v10  ;;  %s2559_s1 = sld [smem:[#allocation2 + $0x281]] }
  0x56   :  { %v1987_v18 = vpop.eup %1986  ;;  %2010 = vpow2.f32 %v1751_v8  ;;  %v339_v25 = vmul.f32 %v338_v17, %v2365_v2  ;;  %v319_v29 = vmul.f32 %v318_v15, %v2370_v3  ;;  %v320_v30 = vmul.f32 %v318_v15, %v2377_v5  ;;  %s2562_s2 = sld [smem:[#allocation2 + $0x282]] }
  0x57   :  { %v1989_v22 = vpop.eup %1988  ;;  %v123_v23 = vmul.f32 %v1987_v18, %v2468_v27  ;;  %2012 = vtanh.f32 %v252_v57  ;;  %v335_v31 = vmul.f32 %v334_v16, %v2370_v3  ;;  %v330_v27 = vrot.slane %v326_v20, %v2380_v9  ;;  %s2567_s26 = sld [smem:[#allocation2 + $0x681]] }
  0x58   :  { %v1991_v26 = vpop.eup %1990  ;;  %v124_v28 = vmul.f32 %v1989_v22, %v2470_v32  ;;  %v342_v35 = vadd.f32 %v341_v21, %v339_v25  ;;  %v336_v37 = vmul.f32 %v334_v16, %v2377_v5  ;;  %v1761_v38 = vmul.f32 -1.442695, %v315_v19  ;;  %s2572_s27 = sld [smem:[#allocation2 + $0x680]] }
  0x59   :  { %v1993_v33 = vpop.eup %1992  ;;  %2014 = vtanh.f32 %v123_v23  ;;  %v211_v34 = vadd.f32 1.0, %v1991_v26  ;;  %v1762_v42 = vmul.f32 -1.442695, %v316_v24  ;;  %v382_v45 = vstv %s2503_s16  ;;  %s2581_s28 = sld [smem:[#allocation2 + $0x682]] }
  0x5a   :  { %v1995_v36 = vpop.eup %1994  ;;  %2016 = vtanh.f32 %v124_v28  ;;  %v212_v32 = vadd.f32 1.0, %v1993_v33  ;;  %v346_v41 = vrot.slane %v342_v35, %v2380_v9  ;;  %v386_v46 = vstv %s2510_s17  ;;  %s2586_s29 = sld [smem:[#allocation2 + $0xa81]] }
  0x5b   :  { %v1997_v39 = vpop.eup %1996  ;;  %2018 = vrcp.f32 %v211_v34  ;;  %v275_v40 = vadd.f32 1.0, %v1995_v36  ;;  %v331_v48 = vadd.f32 %v330_v27, %v319_v29  ;;  %v332_v49 = vadd.f32 %v330_v27, %v320_v30  ;;  %s2591_s30 = sld [smem:[#allocation2 + $0xa80]] }
  0x5c   :  { %v2535_v43 = vpop.eup %1998  ;;  %2020 = vrcp.f32 %v212_v32  ;;  %v276_v44 = vadd.f32 1.0, %v1997_v39  ;;  %v387_v50 = vmul.f32 %v386_v46, %v2365_v2  ;;  %v347_v51 = vadd.f32 %v346_v41, %v335_v31  ;;  %s2599_s5 = sld [smem:[#allocation2 + $0xa82]] }
  0x5d   :  { %v2541_v47 = vpop.eup %2000  ;;  %2022 = vrcp.f32 %v275_v40  ;;  %v389_v52 = vstv %s2515_s18  ;;  %v402_v53 = vstv %s2518_s19  ;;  %v383_v55 = vmul.f32 %v382_v45, %v2370_v3  ;;  %s2602_s6 = sld [smem:[#allocation2 + $0x300]] }
  0x5e   :  { %2024 = vrcp.f32 %v276_v44  ;;  %v2548_v54 = vpop.eup %2002  ;;  %v384_v56 = vmul.f32 %v382_v45, %v2377_v5  ;;  %v390_v57 = vadd.f32 %v389_v52, %v387_v50  ;;  %v348_v59 = vadd.f32 %v346_v41, %v336_v37  ;;  %s2605_s3 = sld [smem:[#allocation2 + $0x301]] }
  0x5f   :  { %2026 = vpow2.f32 %v1761_v38  ;;  %v398_v60 = vstv %s2526_s20  ;;  %v403_v61 = vmul.f32 %v402_v53, %v2365_v2  ;;  %v405_v1 = vstv %s2529_s21  ;;  %s2615_s7 = sld [smem:[#allocation2 + $0x302]] }
  0x60   :  { %v2005_v58 = vpop.eup %2004  ;;  %2028 = vpow2.f32 %v1762_v42  ;;  %v394_v0 = vrot.slane %v390_v57, %v2380_v9  ;;  %v1763_v8 = vmul.f32 -1.442695, %v347_v51  ;;  %v414_v15 = vstv %s2533_s22  ;;  %s2627_s8 = sld [smem:[#allocation2 + $0x700]] }
  0x61   :  { %v2007_v62 = vpop.eup %2006  ;;  %v203_v63 = vmul.f32 %v2005_v58, %v2500_v6  ;;  %2030 = vtanh.f32 %v331_v48  ;;  %v406_v10 = vadd.f32 %v405_v1, %v403_v61  ;;  %v1764_v17 = vmul.f32 -1.442695, %v348_v59  ;;  %s2632_s9 = sld [smem:[#allocation2 + $0x701]] }
  0x62   :  { %v2009_v4 = vpop.eup %2008  ;;  %v204_v7 = vmul.f32 %v2007_v62, %v2505_v11  ;;  %2032 = vtanh.f32 %v332_v49  ;;  %v395_v14 = vadd.f32 %v394_v0, %v383_v55  ;;  %v396_v6 = vadd.f32 %v394_v0, %v384_v56  ;;  %s2635_s10 = sld [smem:[#allocation2 + $0x702]] }
  0x63   :  { %v2011_v12 = vpop.eup %2010  ;;  %v291_v13 = vadd.f32 1.0, %v2009_v4  ;;  %2034 = vtanh.f32 %v203_v63  ;;  %v399_v18 = vmul.f32 %v398_v60, %v2370_v3  ;;  %v410_v19 = vrot.slane %v406_v10, %v2380_v9  ;;  %s2640_s11 = sld [smem:[#allocation2 + $0xb00]] }
  0x64   :  { %v2013_v16 = vpop.eup %2012  ;;  %2036 = vtanh.f32 %v204_v7  ;;  %v400_v11 = vmul.f32 %v398_v60, %v2377_v5  ;;  %v418_v20 = vstv %s2539_s23  ;;  %v421_v21 = vstv %s2544_s24  ;;  %s2646_s12 = sld [smem:[#allocation2 + $0xb01]] }
  0x65   :  { %v292_v23 = vadd.f32 1.0, %v2011_v12  ;;  %2038 = vrcp.f32 %v291_v13  ;;  %v415_v24 = vmul.f32 %v414_v15, %v2370_v3  ;;  %v419_v25 = vmul.f32 %v418_v20, %v2365_v2  ;;  %s2650_s13 = sld [smem:[#allocation2 + $0xb02]] }
  0x66   :  { %v2574_v22 = vpop.eup %2014  ;;  %2040 = vpow2.f32 %v1763_v8  ;;  %v416_v28 = vmul.f32 %v414_v15, %v2377_v5  ;;  %v1774_v29 = vmul.f32 -1.442695, %v395_v14  ;;  %v1775_v30 = vmul.f32 -1.442695, %v396_v6  ;;  %s2661_s14 = sld [smem:[#allocation2 + $0x380]] }
  0x67   :  { %v2578_v26 = vpop.eup %2016  ;;  %2042 = vpow2.f32 %v1764_v17  ;;  %v411_v33 = vadd.f32 %v410_v19, %v399_v18  ;;  %v422_v34 = vadd.f32 %v421_v21, %v419_v25  ;;  %v462_v27 = vstv %s2554_s25  ;;  %s2666_s15 = sld [smem:[#allocation2 + $0x381]] }
  0x68   :  { %v2583_v31 = vpop.eup %2018  ;;  %v412_v36 = vadd.f32 %v410_v19, %v400_v11  ;;  %2044 = vpow2.f32 %v1774_v29  ;;  %v466_v32 = vstv %s2559_s1  ;;  %v469_v40 = vstv %s2562_s2  ;;  %s2673_s16 = sld [smem:[#allocation2 + $0x382]] }
  0x69   :  { %v2588_v35 = vpop.eup %2020  ;;  %v426_v38 = vrot.slane %v422_v34, %v2380_v9  ;;  %2046 = vpow2.f32 %v1775_v30  ;;  %v467_v39 = vmul.f32 %v466_v32, %v2365_v2  ;;  %v463_v44 = vmul.f32 %v462_v27, %v2370_v3  ;;  %s2682_s17 = sld [smem:[#allocation2 + $0x781]] }
  0x6a   :  { %v2023_v37 = vpop.eup %2022  ;;  %2048 = vrcp.f32 %v292_v23  ;;  %v464_v45 = vmul.f32 %v462_v27, %v2377_v5  ;;  %v482_v50 = vstv %s2567_s26  ;;  %v485_v63 = vstv %s2581_s28  ;;  %s2686_s18 = sld [smem:[#allocation2 + $0x782]] }
  0x6b   :  { %v2025_v41 = vpop.eup %2024  ;;  %v283_v42 = vmul.f32 %v2023_v37, %v2548_v54  ;;  %v427_v48 = vadd.f32 %v426_v38, %v415_v24  ;;  %v428_v49 = vadd.f32 %v426_v38, %v416_v28  ;;  %2050 = vtanh.f32 %v411_v33  ;;  %s2689_s19 = sld [smem:[#allocation2 + $0x780]] }
  0x6c   :  { %v2027_v46 = vpop.eup %2026  ;;  %2052 = vtanh.f32 %v412_v36  ;;  %v470_v53 = vadd.f32 %v469_v40, %v467_v39  ;;  %v478_v54 = vstv %s2572_s27  ;;  %v284_v60 = vmul.f32 %v2025_v41, %v2013_v16  ;;  %s2696_s20 = sld [smem:[#allocation2 + $0xb80]] }
  0x6d   :  { %v2029_v51 = vpop.eup %2028  ;;  %v355_v52 = vadd.f32 1.0, %v2027_v46  ;;  %2054 = vtanh.f32 %v283_v42  ;;  %v1776_v57 = vmul.f32 -1.442695, %v427_v48  ;;  %v1777_v58 = vmul.f32 -1.442695, %v428_v49  ;;  %s2701_s21 = sld [smem:[#allocation2 + $0xb81]] }
  0x6e   :  { %v2607_v55 = vpop.eup %2030  ;;  %v356_v56 = vadd.f32 1.0, %v2029_v51  ;;  %v474_v61 = vrot.slane %v470_v53, %v2380_v9  ;;  %v483_v62 = vmul.f32 %v482_v50, %v2365_v2  ;;  %v498_v0 = vstv %s2586_s29  ;;  %s2708_s22 = sld [smem:[#allocation2 + $0xb82]] }
  0x6f   :  { %v2609_v59 = vpop.eup %2032  ;;  %2056 = vrcp.f32 %v355_v52  ;;  %v494_v8 = vstv %s2591_s30  ;;  %v479_v12 = vmul.f32 %v478_v54, %v2370_v3  ;;  %v499_v6 = vmul.f32 %v498_v0, %v2365_v2  ;;  %s2715_s23 = sld [smem:[#allocation5]] }
  0x70   :  { %2058 = vrcp.f32 %v356_v56  ;;  %v2617_v1 = vpop.eup %2034  ;;  %v475_v4 = vadd.f32 %v474_v61, %v463_v44  ;;  %v476_v7 = vadd.f32 %v474_v61, %v464_v45  ;;  %v486_v13 = vadd.f32 %v485_v63, %v483_v62  ;;  %s2718_s24 = sld [smem:[#allocation5 + $0x1]] }
  0x71   :  { %2060 = vpow2.f32 %v1776_v57  ;;  %v2620_v10 = vpop.eup %2036  ;;  %v501_v15 = vstv %s2599_s5  ;;  %v495_v19 = vmul.f32 %v494_v8, %v2370_v3  ;;  %v496_v11 = vmul.f32 %v494_v8, %v2377_v5  ;;  %s2739_s25 = sld [smem:[#allocation5 + $0x2]] }
  0x72   :  { %2062 = vpow2.f32 %v1777_v58  ;;  %v2623_v14 = vpop.eup %2038  ;;  %v1787_v16 = vmul.f32 -1.442695, %v475_v4  ;;  %v490_v18 = vrot.slane %v486_v13, %v2380_v9  ;;  %v1788_v20 = vmul.f32 -1.442695, %v476_v7  ;;  %s2767_s26 = sld [smem:[#allocation5 + $0x3]] }
  0x73   :  { %2064 = vtanh.f32 %v284_v60  ;;  %v2041_v17 = vpop.eup %2040  ;;  %v502_v24 = vadd.f32 %v501_v15, %v499_v6  ;;  %v546_v25 = vstv %s2605_s3  ;;  %v480_v29 = vmul.f32 %v478_v54, %v2377_v5  ;;  %s2771_s27 = sld [smem:[#allocation5 + $0x80]] }
  0x74   :  { %v2043_v21 = vpop.eup %2042  ;;  %v371_v23 = vadd.f32 1.0, %v2041_v17  ;;  %2066 = vpow2.f32 %v1787_v16  ;;  %v542_v30 = vstv %s2602_s6  ;;  %v491_v36 = vadd.f32 %v490_v18, %v479_v12  ;;  %s2775_s28 = sld [smem:[#allocation5 + $0x81]] }
  0x75   :  { %v2045_v28 = vpop.eup %2044  ;;  %2068 = vpow2.f32 %v1788_v20  ;;  %v372_v34 = vadd.f32 1.0, %v2043_v21  ;;  %v506_v32 = vrot.slane %v502_v24, %v2380_v9  ;;  %v547_v39 = vmul.f32 %v546_v25, %v2365_v2  ;;  %s2780_s29 = sld [smem:[#allocation5 + $0x4]] }
  0x76   :  { %v2047_v33 = vpop.eup %2046  ;;  %v435_v27 = vadd.f32 1.0, %v2045_v28  ;;  %2070 = vrcp.f32 %v371_v23  ;;  %v549_v40 = vstv %s2615_s7  ;;  %v492_v46 = vadd.f32 %v490_v18, %v480_v29  ;;  %s2783_s30 = sld [smem:[#allocation5 + $0x82]] }
  0x77   :  { %v2642_v37 = vpop.eup %2048  ;;  %v436_v38 = vadd.f32 1.0, %v2047_v33  ;;  %v507_v42 = vadd.f32 %v506_v32, %v495_v19  ;;  %v508_v44 = vadd.f32 %v506_v32, %v496_v11  ;;  %v543_v48 = vmul.f32 %v542_v30, %v2370_v3  ;;  %s2790_s5 = sld [smem:[#allocation5 + $0x83]] }
  0x78   :  { %v2648_v41 = vpop.eup %2050  ;;  %2072 = vrcp.f32 %v435_v27  ;;  %v550_v49 = vadd.f32 %v549_v40, %v547_v39  ;;  %v544_v53 = vmul.f32 %v542_v30, %v2377_v5  ;;  %v558_v57 = vstv %s2627_s8  ;;  %s2797_s6 = sld [smem:[#allocation5 + $0x5]] }
  0x79   :  { %v2652_v45 = vpop.eup %2052  ;;  %2074 = vrcp.f32 %v436_v38  ;;  %v1789_v51 = vmul.f32 -1.442695, %v507_v42  ;;  %v1790_v52 = vmul.f32 -1.442695, %v508_v44  ;;  %v562_v58 = vstv %s2632_s9  ;;  %s2802_s3 = sld [smem:[#allocation5 + $0x6]] }
  0x7a   :  { %v2655_v50 = vpop.eup %2054  ;;  %2076 = vrcp.f32 %v372_v34  ;;  %v554_v56 = vrot.slane %v550_v49, %v2380_v9  ;;  %v563_v62 = vmul.f32 %v562_v58, %v2365_v2  ;;  %v565_v63 = vstv %s2635_s10  ;;  %s2809_s7 = sld [smem:[#allocation5 + $0x84]] }
  0x7b   :  { %2078 = vtanh.f32 %v491_v36  ;;  %v2670_v4 = vmul.f32 %v2574_v22, %v2535_v43  ;;  %v559_v43 = vmul.f32 %v558_v57, %v2370_v3  ;;  %v574_v22 = vstv %s2640_s11  ;;  %s2813_s8 = sld [smem:[#allocation5 + $0x7]] }
  0x7c   :  { %v2057_v54 = vpop.eup %2056  ;;  %2080 = vpow2.f32 %v1789_v51  ;;  %v555_v8 = vadd.f32 %v554_v56, %v543_v48  ;;  %v556_v13 = vadd.f32 %v554_v56, %v544_v53  ;;  %v566_v6 = vadd.f32 %v565_v63, %v563_v62  ;;  %s2818_s9 = sld [smem:[#allocation5 + $0x85]] }
  0x7d   :  { %v2059_v60 = vpop.eup %2058  ;;  %v363_v61 = vmul.f32 %v2057_v54, %v2607_v55  ;;  %2082 = vtanh.f32 %v492_v46  ;;  %v578_v17 = vstv %s2646_s12  ;;  %v581_v18 = vstv %s2650_s13  ;;  %s2823_s10 = sld [smem:[#allocation5 + $0x100]] }
  0x7e   :  { %v2061_v0 = vpop.eup %2060  ;;  %v364_v7 = vmul.f32 %v2059_v60, %v2609_v59  ;;  %2084 = vpow2.f32 %v1790_v52  ;;  %v570_v59 = vrot.slane %v566_v6, %v2380_v9  ;;  %v560_v11 = vmul.f32 %v558_v57, %v2377_v5  ;;  %s2826_s11 = sld [smem:[#allocation5 + $0x101]] }
  0x7f   :  { %v2063_v55 = vpop.eup %2062  ;;  %v451_v12 = vadd.f32 1.0, %v2061_v0  ;;  %2086 = vtanh.f32 %v363_v61  ;;  %v579_v20 = vmul.f32 %v578_v17, %v2365_v2  ;;  %v1800_v21 = vmul.f32 -1.442695, %v555_v8  ;;  %s2831_s12 = sld [smem:[#allocation5 + $0x102]] }
  0x80   :  { %v2675_v15 = vpop.eup %2064  ;;  %v452_v16 = vadd.f32 1.0, %v2063_v55  ;;  %2088 = vtanh.f32 %v364_v7  ;;  %v575_v25 = vmul.f32 %v574_v22, %v2370_v3  ;;  %v1801_v28 = vmul.f32 -1.442695, %v556_v13  ;;  %s2834_s13 = sld [smem:[#allocation5 + $0x103]] }
  0x81   :  { %v2067_v19 = vpop.eup %2066  ;;  %2090 = vrcp.f32 %v451_v12  ;;  %v576_v30 = vmul.f32 %v574_v22, %v2377_v5  ;;  %v582_v33 = vadd.f32 %v581_v18, %v579_v20  ;;  %v571_v27 = vadd.f32 %v570_v59, %v559_v43  ;;  %s2912_s1 = sld [smem:[#allocation5 + $0x200]] }
  0x82   :  { %v2069_v23 = vpop.eup %2068  ;;  %2092 = vrcp.f32 %v452_v16  ;;  %v515_v24 = vadd.f32 1.0, %v2067_v19  ;;  %v622_v36 = vstv %s2661_s14  ;;  %v626_v32 = vstv %s2666_s15  ;;  %s2842_s14 = sld [smem:[#allocation5 + $0x104]] }
  0x83   :  { %v516_v29 = vadd.f32 1.0, %v2069_v23  ;;  %2094 = vpow2.f32 %v1800_v21  ;;  %v2692_v34 = vpop.eup %2070  ;;  %v586_v39 = vrot.slane %v582_v33, %v2380_v9  ;;  %v627_v40 = vmul.f32 %v626_v32, %v2365_v2  ;;  %s2850_s15 = sld [smem:[#allocation5 + $0x105]] }
  0x84   :  { %2096 = vrcp.f32 %v515_v24  ;;  %v629_v42 = vstv %s2673_s16  ;;  %v2705_v46 = vmul.f32 %v2578_v26, %v2541_v47  ;;  %v572_v49 = vadd.f32 %v570_v59, %v560_v11  ;;  %s2856_s16 = sld [smem:[#allocation5 + $0x180]] }
  0x85   :  { %v2073_v38 = vpop.eup %2072  ;;  %2098 = vrcp.f32 %v516_v29  ;;  %v587_v53 = vadd.f32 %v586_v39, %v575_v25  ;;  %v623_v54 = vmul.f32 %v622_v36, %v2370_v3  ;;  %v624_v56 = vmul.f32 %v622_v36, %v2377_v5  ;;  %v2762_v29 = vld [vmem:[%s3647_s0 + $0x8] sm:$0xff]  ;;  %s2915_s2 = sld [smem:[#allocation5 + $0x201]] }
  0x86   :  { %v2075_v44 = vpop.eup %2074  ;;  %v443_v48 = vmul.f32 %v2073_v38, %v2648_v41  ;;  %2100 = vpow2.f32 %v1801_v28  ;;  %v588_v26 = vadd.f32 %v586_v39, %v576_v30  ;;  %v630_v41 = vadd.f32 %v629_v42, %v627_v40 }
  0x87   :  { %v2710_v51 = vpop.eup %2076  ;;  %v444_v52 = vmul.f32 %v2075_v44, %v2652_v45  ;;  %2102 = vtanh.f32 %v571_v27  ;;  %v642_v57 = vstv %s2682_s17  ;;  %v1802_v60 = vmul.f32 -1.442695, %v587_v53  ;;  %s2860_s17 = sld [smem:[#allocation5 + $0x181]] }
  0x88   :  { %v2079_v47 = vpop.eup %2078  ;;  %2104 = vtanh.f32 %v443_v48  ;;  %v643_v45 = vmul.f32 %v642_v57, %v2365_v2  ;;  %v645_v61 = vstv %s2686_s18  ;;  %v2724_v5 = vmul.f32 %v2617_v1, %v2583_v31  ;;  %s2869_s18 = sld [smem:[#allocation5 + $0x86]] }
  0x89   :  { %v2081_v58 = vpop.eup %2080  ;;  %2106 = vtanh.f32 %v444_v52  ;;  %v634_v63 = vrot.slane %v630_v41, %v2380_v9  ;;  %v638_v0 = vstv %s2689_s19  ;;  %v2730_v8 = vmul.f32 %v2620_v10, %v2588_v35  ;;  %s2876_s19 = sld [smem:[#allocation5 + $0x87]] }
  0x8a   :  { %v2083_v62 = vpop.eup %2082  ;;  %v2734_v55 = vmul.f32 %v2655_v50, %v2623_v14  ;;  %v531_v12 = vadd.f32 1.0, %v2081_v58  ;;  %2108 = vpow2.f32 %v1802_v60  ;;  %v646_v6 = vadd.f32 %v645_v61, %v643_v45 }
  0x8b   :  { %v2085_v7 = vpop.eup %2084  ;;  %v635_v31 = vadd.f32 %v634_v63, %v623_v54  ;;  %v636_v1 = vadd.f32 %v634_v63, %v624_v56  ;;  %v654_v16 = vstv %s2696_s20  ;;  %v2745_v35 = vmul.f32 %v2675_v15, %v2642_v37  ;;  %s2880_s20 = sld [smem:[#allocation5 + $0x106]] }
  0x8c   :  { %v2736_v13 = vpop.eup %2086  ;;  %2110 = vtanh.f32 %v572_v49  ;;  %v1803_v10 = vmul.f32 -1.442695, %v588_v26  ;;  %v639_v14 = vmul.f32 %v638_v0, %v2370_v3  ;;  %v532_v22 = vadd.f32 1.0, %v2085_v7 }
  0x8d   :  { %v2741_v43 = vpop.eup %2088  ;;  %v658_v59 = vstv %s2701_s21  ;;  %v661_v17 = vstv %s2708_s22  ;;  %v1813_v18 = vmul.f32 -1.442695, %v635_v31  ;;  %2112 = vrcp.f32 %v531_v12  ;;  %s2883_s21 = sld [smem:[#allocation5 + $0x182]] }
  0x8e   :  { %v2748_v50 = vpop.eup %2090  ;;  %v655_v11 = vmul.f32 %v654_v16, %v2370_v3  ;;  %v659_v37 = vmul.f32 %v658_v59, %v2365_v2  ;;  %v1814_v15 = vmul.f32 -1.442695, %v636_v1  ;;  %v650_v21 = vrot.slane %v646_v6, %v2380_v9  ;;  %s2887_s22 = sld [smem:[#allocation5 + $0x183]] }
  0x8f   :  { %v2752_v19 = vpop.eup %2092  ;;  %2114 = vpow2.f32 %v1813_v18  ;;  %v702_v23 = vstv %s2715_s23  ;;  %v706_v24 = vstv %s2718_s24  ;;  %v656_v30 = vmul.f32 %v2762_v29, %v654_v16  ;;  %s2894_s23 = sld [smem:[#allocation5 + $0x184]] }
  0x90   :  { %v2095_v20 = vpop.eup %2094  ;;  %v662_v33 = vadd.f32 %v661_v17, %v659_v37  ;;  %2116 = vpow2.f32 %v1814_v15  ;;  %v703_v27 = vmul.f32 %v702_v23, %v2670_v4  ;;  %v707_v36 = vmul.f32 %v706_v24, %v2724_v5  ;;  %s2896_s24 = sld [smem:[#allocation5 + $0x107]] }
  0x91   :  { %v2097_v25 = vpop.eup %2096  ;;  %v595_v28 = vadd.f32 1.0, %v2095_v20  ;;  %2118 = vpow2.f32 %v1803_v10  ;;  %v640_v39 = vmul.f32 %v2762_v29, %v638_v0  ;;  %v704_v44 = vmul.f32 %v702_v23, %v2705_v46 }
  0x92   :  { %v2099_v2 = vpop.eup %2098  ;;  %v523_v3 = vmul.f32 %v2097_v25, %v2079_v47  ;;  %v666_v40 = vrot.slane %v662_v33, %v2380_v9  ;;  %v712_v48 = vstv %s2739_s25  ;;  %v708_v54 = vmul.f32 %v706_v24, %v2730_v8  ;;  %s2908_s25 = sld [smem:[#allocation5 + $0x185]] }
  0x93   :  { %v2101_v32 = vpop.eup %2100  ;;  %v524_v38 = vmul.f32 %v2099_v2, %v2083_v62  ;;  %2120 = vrcp.f32 %v595_v28  ;;  %v651_v9 = vadd.f32 %v650_v21, %v639_v14  ;;  %v709_v47 = vadd.f32 %v707_v36, %v703_v27 }
  0x94   :  { %2122 = vrcp.f32 %v532_v22  ;;  %v596_v42 = vadd.f32 1.0, %v2101_v32  ;;  %v2777_v49 = vpop.eup %2102  ;;  %v667_v52 = vadd.f32 %v666_v40, %v655_v11  ;;  %v668_v53 = vadd.f32 %v666_v40, %v656_v30 }
  0x95   :  { %2124 = vtanh.f32 %v523_v3  ;;  %v2105_v56 = vpop.eup %2104  ;;  %v713_v58 = vmul.f32 %v712_v48, %v2734_v55  ;;  %v652_v45 = vadd.f32 %v650_v21, %v640_v39  ;;  %v2787_v61 = vmul.f32 %v2736_v13, %v2692_v34 }
  0x96   :  { %2126 = vrcp.f32 %v596_v42  ;;  %v2107_v26 = vpop.eup %2106  ;;  %v1815_v41 = vmul.f32 -1.442695, %v667_v52  ;;  %v1816_v57 = vmul.f32 -1.442695, %v668_v53  ;;  %v710_v62 = vadd.f32 %v708_v54, %v704_v44 }
  0x97   :  { %2128 = vtanh.f32 %v524_v38  ;;  %v2109_v60 = vpop.eup %2108  ;;  %v714_v63 = vmul.f32 %v712_v48, %v2745_v35  ;;  %v2794_v7 = vmul.f32 %v2741_v43, %v2710_v51  ;;  %v718_v31 = vstv %s2767_s26  ;;  %s2922_s26 = sld [smem:[#allocation5 + $0x186]] }
  0x98   :  { %2130 = vpow2.f32 %v1815_v41  ;;  %v611_v12 = vadd.f32 1.0, %v2109_v60  ;;  %v2800_v34 = vmul.f32 %v2105_v56, %v2748_v50  ;;  %v715_v13 = vadd.f32 %v713_v58, %v709_v47 }
  0x99   :  { %v2111_v0 = vpop.eup %2110  ;;  %2132 = vpow2.f32 %v1816_v57  ;;  %v2805_v6 = vmul.f32 %v2107_v26, %v2752_v19  ;;  %v764_v51 = vstv %s2771_s27  ;;  %v768_v16 = vstv %s2775_s28  ;;  %s2937_s27 = sld [smem:[#allocation5 + $0x187]] }
  0x9a   :  { %2134 = vtanh.f32 %v651_v9  ;;  %v2113_v1 = vpop.eup %2112  ;;  %v716_v10 = vadd.f32 %v714_v63, %v710_v62  ;;  %v719_v14 = vmul.f32 %v718_v31, %v2787_v61  ;;  %v724_v50 = vstv %s2780_s29  ;;  %s2941_s28 = sld [smem:[#allocation5 + $0x202]] }
  0x9b   :  { %2136 = vtanh.f32 %v652_v45  ;;  %v765_v22 = vmul.f32 %v764_v51, %v2670_v4  ;;  %v720_v18 = vmul.f32 %v718_v31, %v2794_v7  ;;  %v769_v19 = vmul.f32 %v768_v16, %v2724_v5  ;;  %s2949_s29 = sld [smem:[#allocation5 + $0x203]] }
  0x9c   :  { %v2115_v43 = vpop.eup %2114  ;;  %2138 = vrcp.f32 %v611_v12  ;;  %v766_v15 = vmul.f32 %v764_v51, %v2705_v46  ;;  %v770_v20 = vmul.f32 %v768_v16, %v2730_v8  ;;  %v774_v21 = vstv %s2783_s30  ;;  %s2970_s30 = sld [smem:[#allocation5 + $0x204]] }
  0x9d   :  { %v2117_v59 = vpop.eup %2116  ;;  %v675_v17 = vadd.f32 1.0, %v2115_v43  ;;  %v771_v24 = vadd.f32 %v769_v19, %v765_v22  ;;  %v775_v25 = vmul.f32 %v774_v21, %v2734_v55  ;;  %v725_v33 = vmul.f32 %v724_v50, %v2800_v34 }
  0x9e   :  { %v2119_v11 = vpop.eup %2118  ;;  %v676_v37 = vadd.f32 1.0, %v2117_v59  ;;  %v780_v2 = vstv %s2790_s5  ;;  %v721_v36 = vadd.f32 %v719_v14, %v715_v13  ;;  %v722_v32 = vadd.f32 %v720_v18, %v716_v10  ;;  %s2976_s5 = sld [smem:[#allocation5 + $0x205]] }
  0x9f   :  { %2140 = vrcp.f32 %v675_v17  ;;  %v612_v27 = vadd.f32 1.0, %v2119_v11  ;;  %v726_v38 = vmul.f32 %v724_v50, %v2805_v6  ;;  %v772_v40 = vadd.f32 %v770_v20, %v766_v15 }
  0xa0   :  { %v2121_v23 = vpop.eup %2120  ;;  %2142 = vrcp.f32 %v676_v37  ;;  %v776_v42 = vmul.f32 %v774_v21, %v2745_v35  ;;  %v781_v52 = vmul.f32 %v780_v2, %v2787_v61  ;;  %v786_v53 = vstv %s2809_s7  ;;  %s2990_s7 = sld [smem:[#allocation5 + $0x282]] }
  0xa1   :  { %v2123_v28 = vpop.eup %2122  ;;  %v603_v30 = vmul.f32 %v2121_v23, %v2777_v49  ;;  %v777_v49 = vadd.f32 %v775_v25, %v771_v24  ;;  %v730_v54 = vstv %s2797_s6  ;;  %v736_v56 = vstv %s2802_s3  ;;  %s2983_s6 = sld [smem:[#allocation5 + $0x280]] }
  0xa2   :  { %v2125_v3 = vpop.eup %2124  ;;  %v742_v9 = vstv %s2813_s8  ;;  %v2846_v41 = vadd.f32 %v725_v33, %v721_v36  ;;  %v2848_v57 = vadd.f32 %v726_v38, %v722_v32  ;;  %v778_v45 = vadd.f32 %v776_v42, %v772_v40  ;;  %s2986_s3 = sld [smem:[#allocation5 + $0x281]] }
  0xa3   :  { %v2127_v39 = vpop.eup %2126  ;;  %2144 = vtanh.f32 %v603_v30  ;;  %v2844_v26 = vmul.f32 %v2125_v3, %v2113_v1  ;;  %v782_v62 = vmul.f32 %v780_v2, %v2794_v7  ;;  %v787_v63 = vmul.f32 %v786_v53, %v2800_v34  ;;  %s2996_s8 = sld [smem:[#allocation5 + $0x206]] }
  0xa4   :  { %v2129_v44 = vpop.eup %2128  ;;  %v604_v48 = vmul.f32 %v2127_v39, %v2111_v0  ;;  %2146 = vrcp.f32 %v612_v27  ;;  %v783_v12 = vadd.f32 %v781_v52, %v777_v49  ;;  %v788_v31 = vmul.f32 %v786_v53, %v2805_v6 }
  0xa5   :  { %v2131_v47 = vpop.eup %2130  ;;  %v2852_v60 = vmul.f32 %v2129_v44, %v2123_v28  ;;  %v826_v13 = vstv %s2823_s10  ;;  %v792_v16 = vstv %s2818_s9  ;;  %v830_v50 = vstv %s2826_s11  ;;  %s2999_s9 = sld [smem:[#allocation5 + $0x283]] }
  0xa6   :  { %v2133_v58 = vpop.eup %2132  ;;  %2148 = vtanh.f32 %v604_v48  ;;  %v691_v51 = vadd.f32 1.0, %v2131_v47  ;;  %v827_v43 = vmul.f32 %v826_v13, %v2670_v4  ;;  %v828_v10 = vmul.f32 %v826_v13, %v2705_v46  ;;  %s3007_s10 = sld [smem:[#allocation5 + $0x284]] }
  0xa7   :  { %v2135_v0 = vpop.eup %2134  ;;  %v692_v14 = vadd.f32 1.0, %v2133_v58  ;;  %v836_v22 = vstv %s2831_s12  ;;  %v842_v59 = vstv %s2834_s13  ;;  %v731_v18 = vmul.f32 %v730_v54, %v2844_v26  ;;  %s3009_s11 = sld [smem:[#allocation5 + $0x207]] }
  0xa8   :  { %v2137_v1 = vpop.eup %2136  ;;  %v831_v19 = vmul.f32 %v830_v50, %v2724_v5  ;;  %v832_v11 = vmul.f32 %v830_v50, %v2730_v8  ;;  %v837_v37 = vmul.f32 %v836_v22, %v2734_v55  ;;  %v732_v15 = vmul.f32 %v730_v54, %v2852_v60  ;;  %s3023_s12 = sld [smem:[#allocation5 + $0x285]] }
  0xa9   :  { %v2139_v17 = vpop.eup %2138  ;;  %v784_v20 = vadd.f32 %v782_v62, %v778_v45  ;;  %v793_v21 = vmul.f32 %v792_v16, %v2844_v26  ;;  %v838_v23 = vmul.f32 %v836_v22, %v2745_v35  ;;  %2150 = vrcp.f32 %v691_v51  ;;  %s3030_s13 = sld [smem:[#allocation5 + $0x286]] }
  0xaa   :  { %v833_v25 = vadd.f32 %v831_v19, %v827_v43  ;;  %v834_v28 = vadd.f32 %v832_v11, %v828_v10  ;;  %v843_v30 = vmul.f32 %v842_v59, %v2787_v61  ;;  %2152 = vrcp.f32 %v692_v14 }
  0xab   :  { %v789_v3 = vadd.f32 %v787_v63, %v783_v12  ;;  %v848_v27 = vstv %s2842_s14  ;;  %v844_v38 = vmul.f32 %v842_v59, %v2794_v7  ;;  %v854_v39 = vstv %s2850_s15  ;;  %s3034_s14 = sld [smem:[#allocation5 + $0x300]] }
  0xac   :  { %v2141_v24 = vpop.eup %2140  ;;  %v839_v32 = vadd.f32 %v837_v37, %v833_v25  ;;  %v840_v42 = vadd.f32 %v838_v23, %v834_v28  ;;  %v888_v44 = vstv %s2856_s16  ;;  %v892_v48 = vstv %s2860_s17  ;;  %s3036_s15 = sld [smem:[#allocation5 + $0x301]] }
  0xad   :  { %v2143_v33 = vpop.eup %2142  ;;  %v683_v2 = vmul.f32 %v2141_v24, %v2135_v0  ;;  %v849_v53 = vmul.f32 %v848_v27, %v2800_v34  ;;  %v889_v54 = vmul.f32 %v888_v44, %v2670_v4  ;;  %v890_v47 = vmul.f32 %v888_v44, %v2705_v46  ;;  %s3043_s16 = sld [smem:[#allocation5 + $0x287]] }
  0xae   :  { %v684_v36 = vmul.f32 %v2143_v33, %v2137_v1  ;;  %v845_v52 = vadd.f32 %v843_v30, %v839_v32  ;;  %v893_v58 = vmul.f32 %v892_v48, %v2724_v5  ;;  %v894_v45 = vmul.f32 %v892_v48, %v2730_v8  ;;  %s3206_s17 = sld [smem:[#allocation7]] }
  0xaf   :  { %2154 = vtanh.f32 %v683_v2  ;;  %v733_v63 = vadd.f32 %v731_v18, %v2846_v41  ;;  %v2904_v0 = vadd.f32 %v732_v15, %v2848_v57  ;;  %v794_v12 = vmul.f32 %v792_v16, %v2852_v60 }
  0xb0   :  { %v2145_v40 = vpop.eup %2144  ;;  %2156 = vtanh.f32 %v684_v36  ;;  %v798_v13 = vstv %s2869_s18  ;;  %v790_v1 = vadd.f32 %v788_v31, %v784_v20  ;;  %v804_v51 = vstv %s2876_s19  ;;  %s3053_s19 = sld [smem:[#allocation5 + $0x302]] }
  0xb1   :  { %v2891_v49 = vmul.f32 %v2145_v40, %v2139_v17  ;;  %v2147_v62 = vpop.eup %2146  ;;  %v846_v43 = vadd.f32 %v844_v38, %v840_v42  ;;  %v850_v10 = vmul.f32 %v848_v27, %v2805_v6  ;;  %v795_v14 = vadd.f32 %v793_v21, %v789_v3  ;;  %s3212_s18 = sld [smem:[#allocation7 + $0x1]] }
  0xb2   :  { %v855_v57 = vmul.f32 %v854_v39, %v2844_v26  ;;  %v895_v50 = vadd.f32 %v893_v58, %v889_v54  ;;  %v896_v22 = vadd.f32 %v894_v45, %v890_v47  ;;  %v851_v31 = vadd.f32 %v849_v53, %v845_v52 }
  0xb3   :  { %v2149_v41 = vpop.eup %2148  ;;  %v737_v16 = vmul.f32 %v736_v56, %v2891_v49  ;;  %v860_v59 = vstv %s2880_s20  ;;  %v898_v17 = vstv %s2883_s21  ;;  %v799_v18 = vmul.f32 %v798_v13, %v2891_v49  ;;  %s3056_s20 = sld [smem:[#allocation5 + $0x303]] }
  0xb4   :  { %v899_v19 = vmul.f32 %v898_v17, %v2734_v55  ;;  %v900_v11 = vmul.f32 %v898_v17, %v2745_v35  ;;  %v904_v37 = vstv %s2887_s22  ;;  %v2928_v15 = vmul.f32 %v2149_v41, %v2147_v62  ;;  %s3066_s21 = sld [smem:[#allocation5 + $0x304]] }
  0xb5   :  { %v852_v20 = vadd.f32 %v850_v10, %v846_v43  ;;  %v856_v21 = vmul.f32 %v854_v39, %v2852_v60  ;;  %v905_v23 = vmul.f32 %v904_v37, %v2787_v61  ;;  %v906_v28 = vmul.f32 %v904_v37, %v2794_v7  ;;  %s3073_s22 = sld [smem:[#allocation5 + $0x305]] }
  0xb6   :  { %v901_v24 = vadd.f32 %v899_v19, %v895_v50  ;;  %v902_v25 = vadd.f32 %v900_v11, %v896_v22  ;;  %v910_v30 = vstv %s2894_s23  ;;  %v2151_v33 = vpop.eup %2150  ;;  %v796_v2 = vadd.f32 %v794_v12, %v790_v1  ;;  %s3076_s23 = sld [smem:[#allocation5 + $0x306]] }
  0xb7   :  { %v857_v3 = vadd.f32 %v855_v57, %v851_v31  ;;  %v861_v27 = vmul.f32 %v860_v59, %v2891_v49  ;;  %v866_v36 = vstv %s2896_s24  ;;  %v2153_v32 = vpop.eup %2152  ;;  %v739_v38 = vadd.f32 %v737_v16, %v733_v63  ;;  %s3081_s24 = sld [smem:[#allocation5 + $0x380]] }
  0xb8   :  { %v801_v39 = vadd.f32 %v799_v18, %v795_v14  ;;  %v907_v40 = vadd.f32 %v905_v23, %v901_v24  ;;  %v911_v42 = vmul.f32 %v910_v30, %v2800_v34  ;;  %v858_v44 = vadd.f32 %v856_v21, %v852_v20 }
  0xb9   :  { %v908_v48 = vadd.f32 %v906_v28, %v902_v25  ;;  %v912_v52 = vmul.f32 %v910_v30, %v2805_v6  ;;  %v916_v53 = vstv %s2908_s25  ;;  %v738_v47 = vmul.f32 %v736_v56, %v2928_v15  ;;  %s3086_s25 = sld [smem:[#allocation5 + $0x381]] }
  0xba   :  { %v800_v58 = vmul.f32 %v798_v13, %v2928_v15  ;;  %v950_v45 = vstv %s2912_s1  ;;  %v954_v62 = vstv %s2915_s2  ;;  %v862_v1 = vmul.f32 %v860_v59, %v2928_v15  ;;  %s3094_s1 = sld [smem:[#allocation5 + $0x382]] }
  0xbb   :  { %v863_v43 = vadd.f32 %v861_v27, %v857_v3  ;;  %v922_v10 = vstv %s2922_s26  ;;  %v913_v14 = vadd.f32 %v911_v42, %v907_v40  ;;  %v917_v56 = vmul.f32 %v916_v53, %v2844_v26  ;;  %s3097_s2 = sld [smem:[#allocation5 + $0x307]] }
  0xbc   :  { %v2155_v54 = vpop.eup %2154  ;;  %v918_v13 = vmul.f32 %v916_v53, %v2852_v60  ;;  %v914_v50 = vadd.f32 %v912_v52, %v908_v48  ;;  %v951_v22 = vmul.f32 %v950_v45, %v2670_v4  ;;  %v955_v16 = vmul.f32 %v954_v62, %v2724_v5  ;;  %s3100_s26 = sld [smem:[#allocation5 + $0x383]] }
  0xbd   :  { %v2157_v63 = vpop.eup %2156  ;;  %v2951_v12 = vmul.f32 %v2155_v54, %v2151_v33  ;;  %v740_v31 = vadd.f32 %v738_v47, %v2904_v0  ;;  %v952_v17 = vmul.f32 %v950_v45, %v2705_v46  ;;  %v956_v18 = vmul.f32 %v954_v62, %v2730_v8 }
  0xbe   :  { %v2955_v41 = vmul.f32 %v2157_v63, %v2153_v32  ;;  %v802_v19 = vadd.f32 %v800_v58, %v796_v2  ;;  %v864_v37 = vadd.f32 %v862_v1, %v858_v44  ;;  %v923_v20 = vmul.f32 %v922_v10, %v2891_v49 }
  0xbf   :  { %v743_v57 = vmul.f32 %v742_v9, %v2951_v12  ;;  %v805_v11 = vmul.f32 %v804_v51, %v2951_v12  ;;  %v919_v0 = vadd.f32 %v917_v56, %v913_v14  ;;  %v924_v21 = vmul.f32 %v922_v10, %v2928_v15 }
  0xc0   :  { %v744_v59 = vmul.f32 %v742_v9, %v2955_v41  ;;  %v806_v9 = vmul.f32 %v804_v51, %v2955_v41  ;;  %v928_v23 = vstv %s2937_s27  ;;  %v867_v25 = vmul.f32 %v866_v36, %v2951_v12  ;;  %s3108_s27 = sld [smem:[#allocation5 + $0x384]] }
  0xc1   :  { %v745_v24 = vadd.f32 %v743_v57, %v739_v38  ;;  %v920_v28 = vadd.f32 %v918_v13, %v914_v50  ;;  %v957_v30 = vadd.f32 %v955_v16, %v951_v22  ;;  %v958_v2 = vadd.f32 %v956_v18, %v952_v17 }
  0xc2   :  { %v746_v33 = vadd.f32 %v744_v59, %v740_v31  ;;  %v960_v3 = vstv %s2941_s28  ;;  %v966_v27 = vstv %s2949_s29  ;;  %v807_v51 = vadd.f32 %v805_v11, %v801_v39  ;;  %s3118_s28 = sld [smem:[#allocation5 + $0x385]] }
  0xc3   :  { %v868_v32 = vmul.f32 %v866_v36, %v2955_v41  ;;  %v961_v40 = vmul.f32 %v960_v3, %v2734_v55  ;;  %v962_v38 = vmul.f32 %v960_v3, %v2745_v35  ;;  %v808_v42 = vadd.f32 %v806_v9, %v802_v19  ;;  %s3122_s29 = sld [smem:[#allocation5 + $0x400]] }
  0xc4   :  { %v925_v44 = vadd.f32 %v923_v20, %v919_v0  ;;  %v929_v48 = vmul.f32 %v928_v23, %v2951_v12  ;;  %2158 = vtanh.f32 %v745_v24  ;;  %v869_v52 = vadd.f32 %v867_v25, %v863_v43 }
  0xc5   :  { %v963_v53 = vadd.f32 %v961_v40, %v957_v30  ;;  %v967_v54 = vmul.f32 %v966_v27, %v2787_v61  ;;  %2160 = vtanh.f32 %v746_v33  ;;  %v964_v36 = vadd.f32 %v962_v38, %v958_v2 }
  0xc6   :  { %v968_v39 = vmul.f32 %v966_v27, %v2794_v7  ;;  %v972_v47 = vstv %s2970_s30  ;;  %2162 = vtanh.f32 %v807_v51  ;;  %v870_v58 = vadd.f32 %v868_v32, %v864_v37  ;;  %s3126_s30 = sld [smem:[#allocation5 + $0x386]] }
  0xc7   :  { %v926_v45 = vadd.f32 %v924_v21, %v920_v28  ;;  %v930_v62 = vmul.f32 %v928_v23, %v2955_v41  ;;  %2164 = vtanh.f32 %v808_v42  ;;  %v931_v63 = vadd.f32 %v929_v48, %v925_v44 }
  0xc8   :  { %v978_v1 = vstv %s2976_s5  ;;  %2166 = vtanh.f32 %v869_v52  ;;  %v969_v43 = vadd.f32 %v967_v54, %v963_v53  ;;  %v973_v10 = vmul.f32 %v972_v47, %v2800_v34  ;;  %s3132_s5 = sld [smem:[#allocation5 + $0x401]] }
  0xc9   :  { %v974_v14 = vmul.f32 %v972_v47, %v2805_v6  ;;  %v970_v56 = vadd.f32 %v968_v39, %v964_v36  ;;  %v1012_v13 = vstv %s2983_s6  ;;  %v1016_v57 = vstv %s2986_s3  ;;  %s3136_s6 = sld [smem:[#allocation5 + $0x402]] }
  0xca   :  { %v1022_v50 = vstv %s2990_s7  ;;  %2168 = vtanh.f32 %v870_v58  ;;  %v932_v22 = vadd.f32 %v930_v62, %v926_v45  ;;  %v1013_v16 = vmul.f32 %v1012_v13, %v2670_v4  ;;  %s3141_s3 = sld [smem:[#allocation5 + $0x403]] }
  0xcb   :  { %v1014_v31 = vmul.f32 %v1012_v13, %v2705_v46  ;;  %v979_v59 = vmul.f32 %v978_v1, %v2844_v26  ;;  %v1017_v17 = vmul.f32 %v1016_v57, %v2724_v5  ;;  %v1018_v18 = vmul.f32 %v1016_v57, %v2730_v8  ;;  %s3144_s7 = sld [smem:[#allocation5 + $0x404]] }
  0xcc   :  { %v1023_v19 = vmul.f32 %v1022_v50, %v2734_v55  ;;  %v975_v11 = vadd.f32 %v973_v10, %v969_v43  ;;  %v980_v37 = vmul.f32 %v978_v1, %v2852_v60  ;;  %v984_v20 = vstv %s2996_s8  ;;  %v3048_v1 = vld [vmem:[%s3647_s0] sm:$0xff]  ;;  %s3147_s8 = sld [smem:[#allocation5 + $0x387]] }
  0xcd   :  { %v1028_v9 = vstv %s2999_s9  ;;  %v976_v0 = vadd.f32 %v974_v14, %v970_v56  ;;  %v1019_v21 = vadd.f32 %v1017_v17, %v1013_v16  ;;  %v1020_v23 = vadd.f32 %v1018_v18, %v1014_v31  ;;  %s3157_s9 = sld [smem:[#allocation5 + $0x405]] }
  0xce   :  { %v1024_v24 = vmul.f32 %v1022_v50, %v2745_v35  ;;  %2170 = vtanh.f32 %v931_v63  ;;  %v1029_v28 = vmul.f32 %v1028_v9, %v2787_v61  ;;  %v981_v30 = vadd.f32 %v979_v59, %v975_v11 }
  0xcf   :  { %2172 = vtanh.f32 %v932_v22  ;;  %v1025_v25 = vadd.f32 %v1023_v19, %v1019_v21  ;;  %v985_v33 = vmul.f32 %v984_v20, %v2891_v49  ;;  %v986_v2 = vmul.f32 %v984_v20, %v2928_v15 }
  0xd0   :  { %v1034_v3 = vstv %s3007_s10  ;;  %v982_v51 = vadd.f32 %v980_v37, %v976_v0  ;;  %v990_v32 = vstv %s3009_s11  ;;  %v1026_v40 = vadd.f32 %v1024_v24, %v1020_v23  ;;  %s3166_s10 = sld [smem:[#allocation5 + $0x406]] }
  0xd1   :  { %v2159_v27 = vpop.eup %2158  ;;  %v1030_v38 = vmul.f32 %v1028_v9, %v2794_v7  ;;  %v1031_v48 = vadd.f32 %v1029_v28, %v1025_v25  ;;  %v1035_v52 = vmul.f32 %v1034_v3, %v2800_v34  ;;  %v987_v54 = vadd.f32 %v985_v33, %v981_v30  ;;  %s3171_s11 = sld [smem:[#allocation5 + $0x480]] }
  0xd2   :  { %v2161_v42 = vpop.eup %2160  ;;  %v991_v36 = vmul.f32 %v990_v32, %v2951_v12  ;;  %v1040_v39 = vstv %s3023_s12  ;;  %v988_v58 = vadd.f32 %v986_v2, %v982_v51  ;;  %v992_v45 = vmul.f32 %v990_v32, %v2955_v41  ;;  %s3175_s12 = sld [smem:[#allocation5 + $0x481]] }
  0xd3   :  { %v2163_v44 = vpop.eup %2162  ;;  %v1032_v62 = vadd.f32 %v1030_v38, %v1026_v40  ;;  %v1036_v63 = vmul.f32 %v1034_v3, %v2805_v6  ;;  %v749_v43 = vmul.f32 %v3048_v1, %v2159_v27  ;;  %v750_v10 = vmul.f32 %v2762_v29, %v2161_v42 }
  0xd4   :  { %v2165_v53 = vpop.eup %2164  ;;  %v1037_v56 = vadd.f32 %v1035_v52, %v1031_v48  ;;  %v1041_v13 = vmul.f32 %v1040_v39, %v2844_v26  ;;  %v993_v57 = vadd.f32 %v991_v36, %v987_v54  ;;  %v1046_v50 = vstv %s3030_s13  ;;  %s3183_s13 = sld [smem:[#allocation5 + $0x482]] }
  0xd5   :  { %v2167_v47 = vpop.eup %2166  ;;  %v811_v22 = vmul.f32 %v3048_v1, %v2163_v44  ;;  %v994_v16 = vadd.f32 %v992_v45, %v988_v58  ;;  %v1038_v31 = vadd.f32 %v1036_v63, %v1032_v62  ;;  %v1042_v59 = vmul.f32 %v1040_v39, %v2852_v60 }
  0xd6   :  { %v751_v17 = vadd.f32 %v750_v10, %v749_v43  ;;  %v812_v18 = vmul.f32 %v2762_v29, %v2165_v53  ;;  %v1074_v19 = vstv %s3034_s14  ;;  %v1078_v11 = vstv %s3036_s15  ;;  %s3190_s14 = sld [smem:[#allocation5 + $0x483]] }
  0xd7   :  { %v2169_v14 = vpop.eup %2168  ;;  %v873_v20 = vmul.f32 %v3048_v1, %v2167_v47  ;;  %v1043_v0 = vadd.f32 %v1041_v13, %v1037_v56  ;;  %v1047_v21 = vmul.f32 %v1046_v50, %v2891_v49  ;;  %v1075_v24 = vmul.f32 %v1074_v19, %v2670_v4  ;;  %s3193_s15 = sld [smem:[#allocation5 + $0x407]] }
  0xd8   :  { %v874_v9 = vmul.f32 %v2762_v29, %v2169_v14  ;;  %v1076_v25 = vmul.f32 %v1074_v19, %v2705_v46  ;;  %v1079_v28 = vmul.f32 %v1078_v11, %v2724_v5  ;;  %2174 = vtanh.f32 %v993_v57 }
  0xd9   :  { %v1044_v30 = vadd.f32 %v1042_v59, %v1038_v31  ;;  %v1048_v33 = vmul.f32 %v1046_v50, %v2928_v15  ;;  %v1052_v2 = vstv %s3043_s16  ;;  %v752_v3 = vrot.slane %v751_v17, 4  ;;  %s3204_s16 = sld [smem:[#allocation5 + $0x484]] }
  0xda   :  { %2176 = vtanh.f32 %v994_v16  ;;  %v1080_v27 = vmul.f32 %v1078_v11, %v2730_v8  ;;  %v813_v51 = vadd.f32 %v812_v18, %v811_v22  ;;  %v875_v32 = vadd.f32 %v874_v9, %v873_v20 }
  0xdb   :  { %v2171_v37 = vpop.eup %2170  ;;  %v1049_v40 = vadd.f32 %v1047_v21, %v1043_v0  ;;  %v1081_v38 = vadd.f32 %v1079_v28, %v1075_v24  ;;  %v1053_v42 = vmul.f32 %v1052_v2, %v2951_v12  ;;  %v1084_v48 = vstv %s3053_s19  ;;  %s3220_s19 = sld [smem:[#allocation5 + $0x485]] }
  0xdc   :  { %v2173_v23 = vpop.eup %2172  ;;  %v1082_v44 = vadd.f32 %v1080_v27, %v1076_v25  ;;  %v1090_v52 = vstv %s3056_s20  ;;  %v935_v53 = vmul.f32 %v3048_v1, %v2171_v37  ;;  %v1050_v36 = vadd.f32 %v1048_v33, %v1044_v30  ;;  %s3224_s20 = sld [smem:[#allocation5 + $0x486]] }
  0xdd   :  { %v936_v54 = vmul.f32 %v2762_v29, %v2173_v23  ;;  %v1085_v39 = vmul.f32 %v1084_v48, %v2734_v55  ;;  %v1054_v47 = vmul.f32 %v1052_v2, %v2955_v41  ;;  %v1086_v58 = vmul.f32 %v1084_v48, %v2745_v35 }
  0xde   :  { %v1091_v45 = vmul.f32 %v1090_v52, %v2787_v61  ;;  %v1092_v62 = vmul.f32 %v1090_v52, %v2794_v7  ;;  %v753_v63 = vadd.f32 %v752_v3, %v751_v17  ;;  %v814_v43 = vrot.slane %v813_v51, 4 }
  0xdf   :  { %v1087_v10 = vadd.f32 %v1085_v39, %v1081_v38  ;;  %v1096_v14 = vstv %s3066_s21  ;;  %v876_v56 = vrot.slane %v875_v32, 4  ;;  %v1055_v13 = vadd.f32 %v1053_v42, %v1049_v40  ;;  %s3228_s21 = sld [smem:[#allocation5 + $0x487]] }
  0xe0   :  { %v1088_v57 = vadd.f32 %v1086_v58, %v1082_v44  ;;  %v1097_v50 = vmul.f32 %v1096_v14, %v2800_v34  ;;  %v937_v22 = vadd.f32 %v936_v54, %v935_v53  ;;  %v1102_v31 = vstv %s3073_s22  ;;  %s3233_s22 = sld [smem:[#allocation5 + $0x500]] }
  0xe1   :  { %v1093_v16 = vadd.f32 %v1091_v45, %v1087_v10  ;;  %v1056_v59 = vadd.f32 %v1054_v47, %v1050_v36  ;;  %v1098_v18 = vmul.f32 %v1096_v14, %v2805_v6  ;;  %v754_v19 = vrot.slane %v753_v63, 2 }
  0xe2   :  { %v1094_v17 = vadd.f32 %v1092_v62, %v1088_v57  ;;  %v815_v11 = vadd.f32 %v814_v43, %v813_v51  ;;  %v877_v37 = vadd.f32 %v876_v56, %v875_v32  ;;  %2178 = vtanh.f32 %v1055_v13 }
  0xe3   :  { %v1099_v20 = vadd.f32 %v1097_v50, %v1093_v16  ;;  %v1103_v9 = vmul.f32 %v1102_v31, %v2844_v26  ;;  %v938_v0 = vrot.slane %v937_v22, 4  ;;  %v1108_v21 = vstv %s3076_s23  ;;  %s3236_s23 = sld [smem:[#allocation5 + $0x501]] }
  0xe4   :  { %v1136_v23 = vstv %s3081_s24  ;;  %v1140_v24 = vstv %s3086_s25  ;;  %2180 = vtanh.f32 %v1056_v59  ;;  %v1100_v28 = vadd.f32 %v1098_v18, %v1094_v17  ;;  %s3440_s24 = sld [smem:[#allocation5 + $0x682]] }
  0xe5   :  { %v2175_v25 = vpop.eup %2174  ;;  %v1104_v30 = vmul.f32 %v1102_v31, %v2852_v60  ;;  %v1137_v33 = vmul.f32 %v1136_v23, %v2670_v4  ;;  %v1138_v3 = vmul.f32 %v1136_v23, %v2705_v46  ;;  %v1141_v27 = vmul.f32 %v1140_v24, %v2724_v5  ;;  %s3451_s25 = sld [smem:[#allocation5 + $0x683]] }
  0xe6   :  { %v1142_v51 = vmul.f32 %v1140_v24, %v2730_v8  ;;  %v755_v32 = vadd.f32 %v754_v19, %v753_v63  ;;  %v1105_v40 = vadd.f32 %v1103_v9, %v1099_v20  ;;  %v1109_v38 = vmul.f32 %v1108_v21, %v2891_v49 }
  0xe7   :  { %v2177_v2 = vpop.eup %2176  ;;  %v1146_v42 = vstv %s3094_s1  ;;  %v816_v44 = vrot.slane %v815_v11, 2  ;;  %v878_v48 = vrot.slane %v877_v37, 2  ;;  %v1114_v52 = vstv %s3097_s2  ;;  %s3248_s1 = sld [smem:[#allocation5 + $0x502]] }
  0xe8   :  { %v1143_v53 = vadd.f32 %v1141_v27, %v1137_v33  ;;  %v939_v54 = vadd.f32 %v938_v0, %v937_v22  ;;  %v1106_v36 = vadd.f32 %v1104_v30, %v1100_v28  ;;  %v1110_v39 = vmul.f32 %v1108_v21, %v2928_v15  ;;  %s3257_s2 = sld [smem:[#allocation5 + $0x503]] }
  0xe9   :  { %v1147_v47 = vmul.f32 %v1146_v42, %v2734_v55  ;;  %v1144_v58 = vadd.f32 %v1142_v51, %v1138_v3  ;;  %v1148_v45 = vmul.f32 %v1146_v42, %v2745_v35  ;;  %v1152_v62 = vstv %s3100_s26  ;;  %s3271_s26 = sld [smem:[#allocation5 + $0x504]] }
  0xea   :  { %v1111_v63 = vadd.f32 %v1109_v38, %v1105_v40  ;;  %v1115_v43 = vmul.f32 %v1114_v52, %v2951_v12  ;;  %v1153_v14 = vmul.f32 %v1152_v62, %v2787_v61  ;;  %v756_v56 = vrot.slane %v755_v32, 1 }
  0xeb   :  { %v1149_v10 = vadd.f32 %v1147_v47, %v1143_v53  ;;  %v3128_v13 = vadd.f32 %v816_v44, %v815_v11  ;;  %v3130_v57 = vadd.f32 %v878_v48, %v877_v37  ;;  %v940_v50 = vrot.slane %v939_v54, 2 }
  0xec   :  { %v1112_v22 = vadd.f32 %v1110_v39, %v1106_v36  ;;  %v1116_v16 = vmul.f32 %v1114_v52, %v2955_v41  ;;  %v1158_v31 = vstv %s3108_s27  ;;  %v997_v59 = vmul.f32 %v3048_v1, %v2175_v25  ;;  %s3273_s27 = sld [smem:[#allocation7 + $0x2]] }
  0xed   :  { %v998_v17 = vmul.f32 %v2762_v29, %v2177_v2  ;;  %v1150_v18 = vadd.f32 %v1148_v45, %v1144_v58  ;;  %v1154_v19 = vmul.f32 %v1152_v62, %v2794_v7  ;;  %v1117_v11 = vadd.f32 %v1115_v43, %v1111_v63 }
  0xee   :  { %v1155_v37 = vadd.f32 %v1153_v14, %v1149_v10  ;;  %v1159_v20 = vmul.f32 %v1158_v31, %v2800_v34  ;;  %v757_v0 = vadd.f32 %v756_v56, %v755_v32  ;;  %v818_v21 = vrot.slane %v3128_v13, 1 }
  0xef   :  { %v2179_v9 = vpop.eup %2178  ;;  %v880_v23 = vrot.slane %v3130_v57, 1  ;;  %v3150_v24 = vadd.f32 %v940_v50, %v939_v54  ;;  %v1118_v25 = vadd.f32 %v1116_v16, %v1112_v22  ;;  %v1164_v28 = vstv %s3118_s28  ;;  %s3282_s28 = sld [smem:[#allocation5 + $0x505]] }
  0xf0   :  { %v999_v33 = vadd.f32 %v998_v17, %v997_v59  ;;  %v1156_v2 = vadd.f32 %v1154_v19, %v1150_v18  ;;  %v1160_v3 = vmul.f32 %v1158_v31, %v2805_v6  ;;  %v1198_v27 = vstv %s3122_s29  ;;  %s3284_s29 = sld [smem:[#allocation7 + $0x3]] }
  0xf1   :  { %v2181_v30 = vpop.eup %2180  ;;  %v1059_v51 = vmul.f32 %v3048_v1, %v2179_v9  ;;  %2182 = vtanh.f32 %v1117_v11  ;;  %v1161_v32 = vadd.f32 %v1159_v20, %v1155_v37  ;;  %v1170_v40 = vstv %s3126_s30  ;;  %s3292_s30 = sld [smem:[#allocation5 + $0x506]] }
  0xf2   :  { %v1165_v38 = vmul.f32 %v1164_v28, %v2844_v26  ;;  %v1199_v42 = vmul.f32 %v1198_v27, %v2670_v4  ;;  %v1200_v44 = vmul.f32 %v1198_v27, %v2705_v46  ;;  %v1202_v48 = vstv %s3132_s5  ;;  %s3296_s5 = sld [smem:[#allocation5 + $0x507]] }
  0xf3   :  { %v1060_v52 = vmul.f32 %v2762_v29, %v2181_v30  ;;  %2184 = vtanh.f32 %v1118_v25  ;;  %v1203_v53 = vmul.f32 %v1202_v48, %v2724_v5  ;;  %v1204_v54 = vmul.f32 %v1202_v48, %v2730_v8 }
  0xf4   :  { %v1162_v36 = vadd.f32 %v1160_v3, %v1156_v2  ;;  %v1166_v39 = vmul.f32 %v1164_v28, %v2852_v60  ;;  %v1208_v47 = vstv %s3136_s6  ;;  %v1214_v58 = vstv %s3141_s3  ;;  %s3300_s6 = sld [smem:[#allocation5 + $0x580]] }
  0xf5   :  { %v1171_v45 = vmul.f32 %v1170_v40, %v2891_v49  ;;  %v1205_v62 = vadd.f32 %v1203_v53, %v1199_v42  ;;  %v1206_v63 = vadd.f32 %v1204_v54, %v1200_v44  ;;  %v1220_v29 = vstv %s3144_s7  ;;  %s3304_s3 = sld [smem:[#allocation5 + $0x581]] }
  0xf6   :  { %v1167_v43 = vadd.f32 %v1165_v38, %v1161_v32  ;;  %v1176_v10 = vstv %s3147_s8  ;;  %v1209_v14 = vmul.f32 %v1208_v47, %v2734_v55  ;;  %v1210_v56 = vmul.f32 %v1208_v47, %v2745_v35  ;;  %s3311_s7 = sld [smem:[#allocation5 + $0x582]] }
  0xf7   :  { %v1000_v50 = vrot.slane %v999_v33, 4  ;;  %v1172_v22 = vmul.f32 %v1170_v40, %v2928_v15  ;;  %v1215_v16 = vmul.f32 %v1214_v58, %v2787_v61  ;;  %v1216_v31 = vmul.f32 %v1214_v58, %v2794_v7  ;;  %s3315_s8 = sld [smem:[#allocation5 + $0x583]] }
  0xf8   :  { %v1168_v59 = vadd.f32 %v1166_v39, %v1162_v36  ;;  %v1211_v17 = vadd.f32 %v1209_v14, %v1205_v62  ;;  %v1212_v18 = vadd.f32 %v1210_v56, %v1206_v63  ;;  %v1221_v19 = vmul.f32 %v1220_v29, %v2800_v34 }
  0xf9   :  { %2186 = vtanh.f32 %v757_v0  ;;  %v3186_v11 = vadd.f32 %v1060_v52, %v1059_v51  ;;  %v1177_v37 = vmul.f32 %v1176_v10, %v2951_v12  ;;  %v1226_v20 = vstv %s3157_s9  ;;  %s3333_s9 = sld [smem:[#allocation5 + $0x584]] }
  0xfa   :  { %v1173_v9 = vadd.f32 %v1171_v45, %v1167_v43  ;;  %v1217_v25 = vadd.f32 %v1215_v16, %v1211_v17  ;;  %v1218_v28 = vadd.f32 %v1216_v31, %v1212_v18  ;;  %v1222_v30 = vmul.f32 %v1220_v29, %v2805_v6 }
  0xfb   :  { %v819_v2 = vadd.f32 %v818_v21, %v3128_v13  ;;  %v3197_v0 = vadd.f32 %v880_v23, %v3130_v57  ;;  %v942_v3 = vrot.slane %v3150_v24, 1  ;;  %v3200_v27 = vadd.f32 %v1000_v50, %v999_v33 }
  0xfc   :  { %v1174_v51 = vadd.f32 %v1172_v22, %v1168_v59  ;;  %v1178_v32 = vmul.f32 %v1176_v10, %v2955_v41  ;;  %v1223_v40 = vadd.f32 %v1221_v19, %v1217_v25  ;;  %v1227_v38 = vmul.f32 %v1226_v20, %v2844_v26  ;;  %v3242_v19 = vld [vmem:[%s3647_s0 + $0x8] sm:$0xff] }
  0xfd   :  { %v1062_v13 = vrot.slane %v3186_v11, 4  ;;  %v1232_v21 = vstv %s3166_s10  ;;  %v1260_v57 = vstv %s3171_s11  ;;  %v1264_v23 = vstv %s3175_s12  ;;  %s3344_s10 = sld [smem:[#allocation7 + $0x4]] }
  0xfe   :  { %v2183_v42 = vpop.eup %2182  ;;  %v1179_v33 = vadd.f32 %v1177_v37, %v1173_v9  ;;  %v1224_v44 = vadd.f32 %v1222_v30, %v1218_v28  ;;  %v1228_v48 = vmul.f32 %v1226_v20, %v2852_v60  ;;  %v1261_v52 = vmul.f32 %v1260_v57, %v2670_v4  ;;  %s3352_s11 = sld [smem:[#allocation5 + $0x585]] }
  0xff   :  { %v1262_v53 = vmul.f32 %v1260_v57, %v2705_v46  ;;  %v1265_v54 = vmul.f32 %v1264_v23, %v2724_v5  ;;  %v1266_v36 = vmul.f32 %v1264_v23, %v2730_v8  ;;  %v1270_v39 = vstv %s3183_s13  ;;  %s3357_s12 = sld [smem:[#allocation5 + $0x600]] }
 0x100   :  { %v2185_v47 = vpop.eup %2184  ;;  %v1180_v58 = vadd.f32 %v1178_v32, %v1174_v51  ;;  %v1229_v45 = vadd.f32 %v1227_v38, %v1223_v40  ;;  %v1233_v62 = vmul.f32 %v1232_v21, %v2891_v49  ;;  %v1271_v63 = vmul.f32 %v1270_v39, %v2734_v55  ;;  %s3363_s13 = sld [smem:[#allocation5 + $0x586]] }
 0x101   :  { %v1267_v29 = vadd.f32 %v1265_v54, %v1261_v52  ;;  %v1268_v43 = vadd.f32 %v1266_v36, %v1262_v53  ;;  %v1272_v10 = vmul.f32 %v1270_v39, %v2745_v35  ;;  %v1276_v14 = vstv %s3190_s14  ;;  %s3370_s14 = sld [smem:[#allocation5 + $0x601]] }
 0x102   :  { %v1230_v56 = vadd.f32 %v1228_v48, %v1224_v44  ;;  %v1234_v50 = vmul.f32 %v1232_v21, %v2928_v15  ;;  %v1238_v22 = vstv %s3193_s15  ;;  %v1277_v16 = vmul.f32 %v1276_v14, %v2787_v61  ;;  %s3374_s15 = sld [smem:[#allocation5 + $0x602]] }
 0x103   :  { %2188 = vtanh.f32 %v1179_v33  ;;  %v1273_v31 = vadd.f32 %v1271_v63, %v1267_v29  ;;  %v1274_v59 = vadd.f32 %v1272_v10, %v1268_v43  ;;  %v1278_v17 = vmul.f32 %v1276_v14, %v2794_v7 }
 0x104   :  { %v1121_v18 = vmul.f32 %v3048_v1, %v2183_v42  ;;  %v1122_v37 = vmul.f32 %v3242_v19, %v2185_v47  ;;  %2190 = vtanh.f32 %v1180_v58  ;;  %v1282_v20 = vstv %s3204_s16  ;;  %s3379_s16 = sld [smem:[#allocation5 + $0x603]] }
 0x105   :  { %v1235_v9 = vadd.f32 %v1233_v62, %v1229_v45  ;;  %v1239_v25 = vmul.f32 %v1238_v22, %v2951_v12  ;;  %v1240_v28 = vmul.f32 %v1238_v22, %v2955_v41  ;;  %v1279_v30 = vadd.f32 %v1277_v16, %v1273_v31 }
 0x106   :  { %v3250_v51 = vpop.eup %2186  ;;  %v1236_v32 = vadd.f32 %v1234_v50, %v1230_v56  ;;  %v1280_v40 = vadd.f32 %v1278_v17, %v1274_v59  ;;  %v1283_v38 = vmul.f32 %v1282_v20, %v2800_v34  ;;  %v1284_v21 = vmul.f32 %v1282_v20, %v2805_v6 }
 0x107   :  { %v760_v57 = vstv %s3206_s17  ;;  %2192 = vtanh.f32 %v819_v2  ;;  %v822_v23 = vstv %s3212_s18  ;;  %v1288_v42 = vstv %s3220_s19  ;;  %s3384_s17 = sld [smem:[#allocation5 + $0x587]] }
 0x108   :  { %2194 = vtanh.f32 %v3197_v0  ;;  %v1285_v33 = vadd.f32 %v1283_v38, %v1279_v30  ;;  %v1289_v44 = vmul.f32 %v1288_v42, %v2844_v26  ;;  %v1294_v48 = vstv %s3224_s20  ;;  %s3390_s18 = sld [smem:[#allocation5 + $0x604]] }
 0x109   :  { %v3265_v52 = vadd.f32 %v942_v3, %v3150_v24  ;;  %v1002_v2 = vrot.slane %v3200_v27, 2  ;;  %v3269_v53 = vadd.f32 %v1062_v13, %v3186_v11  ;;  %v1241_v54 = vadd.f32 %v1239_v25, %v1235_v9  ;;  %s3407_s19 = sld [smem:[#allocation5 + $0x605]] }
 0x10a   :  { %v3275_v0 = vadd.f32 %v1122_v37, %v1121_v18  ;;  %v1242_v36 = vadd.f32 %v1240_v28, %v1236_v32  ;;  %v1286_v39 = vadd.f32 %v1284_v21, %v1280_v40  ;;  %v1290_v47 = vmul.f32 %v1288_v42, %v2852_v60  ;;  %s3413_s20 = sld [smem:[#allocation5 + $0x606]] }
 0x10b   :  { %v1295_v24 = vmul.f32 %v1294_v48, %v2891_v49  ;;  %v1300_v3 = vstv %s3228_s21  ;;  %v1322_v58 = vstv %s3233_s22  ;;  %v1326_v45 = vstv %s3236_s23  ;;  %s3422_s21 = sld [smem:[#allocation5 + $0x607]] }
 0x10c   :  { %v1291_v11 = vadd.f32 %v1289_v44, %v1285_v33  ;;  %v1323_v13 = vmul.f32 %v1322_v58, %v2670_v4  ;;  %v1324_v62 = vmul.f32 %v1322_v58, %v2705_v46  ;;  %v1327_v63 = vmul.f32 %v1326_v45, %v2724_v5  ;;  %s3428_s22 = sld [smem:[#allocation5 + $0x680]] }
 0x10d   :  { %2196 = vtanh.f32 %v1241_v54  ;;  %v1296_v29 = vmul.f32 %v1294_v48, %v2928_v15  ;;  %v1328_v43 = vmul.f32 %v1326_v45, %v2730_v8  ;;  %v1332_v10 = vstv %s3248_s1  ;;  %s3434_s23 = sld [smem:[#allocation5 + $0x681]] }
 0x10e   :  { %v1292_v14 = vadd.f32 %v1290_v47, %v1286_v39  ;;  %v1329_v56 = vadd.f32 %v1327_v63, %v1323_v13  ;;  %v1333_v50 = vmul.f32 %v1332_v10, %v2734_v55  ;;  %v1334_v22 = vmul.f32 %v1332_v10, %v2745_v35  ;;  %s3454_s1 = sld [smem:[#allocation5 + $0x684]] }
 0x10f   :  { %2198 = vtanh.f32 %v1242_v36  ;;  %v1301_v16 = vmul.f32 %v1300_v3, %v2951_v12  ;;  %v1330_v31 = vadd.f32 %v1328_v43, %v1324_v62  ;;  %v1338_v59 = vstv %s3257_s2  ;;  %s3465_s2 = sld [smem:[#allocation5 + $0x685]] }
 0x110   :  { %v2189_v17 = vpop.eup %2188  ;;  %v1297_v18 = vadd.f32 %v1295_v24, %v1291_v11  ;;  %v1335_v37 = vadd.f32 %v1333_v50, %v1329_v56  ;;  %v1339_v20 = vmul.f32 %v1338_v59, %v2787_v61  ;;  %v1340_v9 = vmul.f32 %v1338_v59, %v2794_v7 }
 0x111   :  { %v2191_v25 = vpop.eup %2190  ;;  %v3307_v28 = vadd.f32 %v1002_v2, %v3200_v27  ;;  %v1064_v30 = vrot.slane %v3269_v53, 2  ;;  %v1336_v32 = vadd.f32 %v1334_v22, %v1330_v31  ;;  %v1344_v40 = vstv %s3271_s26  ;;  %s3470_s26 = sld [smem:[#allocation5 + $0x686]] }
 0x112   :  { %v1298_v38 = vadd.f32 %v1296_v29, %v1292_v14  ;;  %v1302_v21 = vmul.f32 %v1300_v3, %v2955_v41  ;;  %v1341_v42 = vadd.f32 %v1339_v20, %v1335_v37  ;;  %v1345_v33 = vmul.f32 %v1344_v40, %v2800_v34 }
 0x113   :  { %v1124_v27 = vrot.slane %v3275_v0, 4  ;;  %v1342_v44 = vadd.f32 %v1340_v9, %v1336_v32  ;;  %v1346_v48 = vmul.f32 %v1344_v40, %v2805_v6  ;;  %v1350_v2 = vstv %s3282_s28  ;;  %s3484_s28 = sld [smem:[#allocation5 + $0x700]] }
 0x114   :  { %v2193_v54 = vpop.eup %2192  ;;  %v884_v36 = vstv %s3273_s27  ;;  %v1183_v39 = vmul.f32 %v3048_v1, %v2189_v17  ;;  %v1184_v47 = vmul.f32 %v3242_v19, %v2191_v25  ;;  %v1303_v24 = vadd.f32 %v1301_v16, %v1297_v18  ;;  %s3481_s27 = sld [smem:[#allocation5 + $0x687]] }
 0x115   :  { %v3323_v3 = vpop.eup %2194  ;;  %v946_v58 = vstv %s3284_s29  ;;  %v1347_v45 = vadd.f32 %v1345_v33, %v1341_v42  ;;  %v1351_v11 = vmul.f32 %v1350_v2, %v2844_v26  ;;  %v1356_v13 = vstv %s3292_s30  ;;  %s3489_s30 = sld [smem:[#allocation5 + $0x701]] }
 0x116   :  { %v761_v62 = vmul.f32 %v3250_v51, %v760_v57  ;;  %2200 = vtanh.f32 %v3265_v52  ;;  %v1004_v63 = vrot.slane %v3307_v28, 1  ;;  %v1304_v29 = vadd.f32 %v1302_v21, %v1298_v38  ;;  %s3630_s29 = sld [smem:[#allocation7 + $0x7]] }
 0x117   :  { %v3336_v43 = vadd.f32 %v1064_v30, %v3269_v53  ;;  %v3339_v10 = vadd.f32 %v1124_v27, %v3275_v0  ;;  %v1348_v14 = vadd.f32 %v1346_v48, %v1342_v44  ;;  %v1352_v56 = vmul.f32 %v1350_v2, %v2852_v60 }
 0x118   :  { %v1185_v51 = vadd.f32 %v1184_v47, %v1183_v39  ;;  %2202 = vtanh.f32 %v1303_v24  ;;  %v1357_v57 = vmul.f32 %v1356_v13, %v2891_v49  ;;  %v1384_v52 = vstv %s3300_s6  ;;  %s3506_s6 = sld [smem:[#allocation5 + $0x703]] }
 0x119   :  { %v1353_v50 = vadd.f32 %v1351_v11, %v1347_v45  ;;  %v1362_v22 = vstv %s3296_s5  ;;  %v1385_v53 = vmul.f32 %v1384_v52, %v2670_v4  ;;  %v1386_v16 = vmul.f32 %v1384_v52, %v2705_v46  ;;  %s3497_s5 = sld [smem:[#allocation5 + $0x702]] }
 0x11a   :  { %v2197_v31 = vpop.eup %2196  ;;  %2204 = vtanh.f32 %v1304_v29  ;;  %v1388_v0 = vstv %s3304_s3  ;;  %v1394_v59 = vstv %s3311_s7  ;;  %v1400_v17 = vstv %s3315_s8  ;;  %s3518_s8 = sld [smem:[#allocation5 + $0x704]] }
 0x11b   :  { %v1354_v18 = vadd.f32 %v1352_v56, %v1348_v14  ;;  %v1358_v37 = vmul.f32 %v1356_v13, %v2928_v15  ;;  %v1389_v20 = vmul.f32 %v1388_v0, %v2724_v5  ;;  %v1390_v9 = vmul.f32 %v1388_v0, %v2730_v8 }
 0x11c   :  { %v2199_v25 = vpop.eup %2198  ;;  %v1186_v30 = vrot.slane %v1185_v51, 4  ;;  %v1363_v32 = vmul.f32 %v1362_v22, %v2951_v12  ;;  %v1395_v40 = vmul.f32 %v1394_v59, %v2734_v55  ;;  %v1396_v38 = vmul.f32 %v1394_v59, %v2745_v35 }
 0x11d   :  { %v1359_v21 = vadd.f32 %v1357_v57, %v1353_v50  ;;  %v1391_v42 = vadd.f32 %v1389_v20, %v1385_v53  ;;  %v1392_v33 = vadd.f32 %v1390_v9, %v1386_v16  ;;  %v1401_v27 = vmul.f32 %v1400_v17, %v2787_v61 }
 0x11e   :  { %v823_v44 = vmul.f32 %v2193_v54, %v822_v23  ;;  %v1005_v48 = vadd.f32 %v1004_v63, %v3307_v28  ;;  %v1245_v2 = vmul.f32 %v3048_v1, %v2197_v31  ;;  %v1406_v39 = vstv %s3333_s9  ;;  %s3531_s9 = sld [smem:[#allocation5 + $0x706]] }
 0x11f   :  { %v1246_v47 = vmul.f32 %v3242_v19, %v2199_v25  ;;  %v1360_v24 = vadd.f32 %v1358_v37, %v1354_v18  ;;  %v1364_v45 = vmul.f32 %v1362_v22, %v2955_v41  ;;  %v1397_v11 = vadd.f32 %v1395_v40, %v1391_v42 }
 0x120   :  { %v1066_v13 = vrot.slane %v3336_v43, 1  ;;  %v1126_v23 = vrot.slane %v3339_v10, 2  ;;  %v1398_v28 = vadd.f32 %v1396_v38, %v1392_v33  ;;  %v1402_v54 = vmul.f32 %v1400_v17, %v2794_v7 }
 0x121   :  { %v3381_v63 = vadd.f32 %v1186_v30, %v1185_v51  ;;  %v1365_v29 = vadd.f32 %v1363_v32, %v1359_v21  ;;  %v1403_v14 = vadd.f32 %v1401_v27, %v1397_v11  ;;  %v1407_v56 = vmul.f32 %v1406_v39, %v2800_v34 }
 0x122   :  { %v3386_v57 = vadd.f32 %v823_v44, %v761_v62  ;;  %2206 = vtanh.f32 %v1005_v48  ;;  %v1008_v52 = vstv %s3344_s10  ;;  %v1412_v50 = vstv %s3352_s11  ;;  %s3535_s11 = sld [smem:[#allocation5 + $0x707]] }
 0x123   :  { %v3392_v22 = vpop.eup %2200  ;;  %v885_v51 = vmul.f32 %v3323_v3, %v884_v36  ;;  %v3397_v53 = vadd.f32 %v1246_v47, %v1245_v2  ;;  %v1366_v16 = vadd.f32 %v1364_v45, %v1360_v24  ;;  %v1446_v31 = vstv %s3357_s12  ;;  %s3541_s12 = sld [smem:[#allocation5 + $0x780]] }
 0x124   :  { %v1067_v0 = vadd.f32 %v1066_v13, %v3336_v43  ;;  %v3402_v62 = vadd.f32 %v1126_v23, %v3339_v10  ;;  %v1404_v59 = vadd.f32 %v1402_v54, %v1398_v28  ;;  %v1408_v17 = vmul.f32 %v1406_v39, %v2805_v6  ;;  %s3638_s10 = sld [smem:[#allocation7 + $0x8]] }
 0x125   :  { %v2203_v18 = vpop.eup %2202  ;;  %v1188_v37 = vrot.slane %v3381_v63, 2  ;;  %2208 = vtanh.f32 %v1365_v29  ;;  %v1409_v20 = vadd.f32 %v1407_v56, %v1403_v14  ;;  %v1413_v36 = vmul.f32 %v1412_v50, %v2844_v26 }
 0x126   :  { %v1418_v3 = vstv %s3363_s13  ;;  %v1447_v43 = vmul.f32 %v1446_v31, %v2670_v4  ;;  %v1448_v10 = vmul.f32 %v1446_v31, %v2705_v46  ;;  %v1450_v9 = vstv %s3370_s14  ;;  %s3545_s13 = sld [smem:[#allocation5 + $0x781]] }
 0x127   :  { %v2205_v25 = vpop.eup %2204  ;;  %v1248_v30 = vrot.slane %v3397_v53, 4  ;;  %2210 = vtanh.f32 %v1366_v16  ;;  %v1451_v32 = vmul.f32 %v1450_v9, %v2724_v5  ;;  %v1452_v40 = vmul.f32 %v1450_v9, %v2730_v8  ;;  %s3547_s14 = sld [smem:[#allocation5 + $0x782]] }
 0x128   :  { %v1410_v38 = vadd.f32 %v1408_v17, %v1404_v59  ;;  %v1414_v21 = vmul.f32 %v1412_v50, %v2852_v60  ;;  %v1456_v42 = vstv %s3374_s15  ;;  %v1462_v33 = vstv %s3379_s16  ;;  %s3552_s15 = sld [smem:[#allocation5 + $0x783]] }
 0x129   :  { %v1415_v27 = vadd.f32 %v1413_v36, %v1409_v20  ;;  %v1419_v44 = vmul.f32 %v1418_v3, %v2891_v49  ;;  %v1453_v48 = vadd.f32 %v1451_v32, %v1447_v43  ;;  %v1454_v2 = vadd.f32 %v1452_v40, %v1448_v10  ;;  %s3573_s16 = sld [smem:[#allocation5 + $0x784]] }
 0x12a   :  { %v1424_v39 = vstv %s3384_s17  ;;  %v1457_v47 = vmul.f32 %v1456_v42, %v2734_v55  ;;  %v1458_v24 = vmul.f32 %v1456_v42, %v2745_v35  ;;  %v1468_v45 = vstv %s3390_s18  ;;  %s3576_s17 = sld [smem:[#allocation5 + $0x785]] }
 0x12b   :  { %v1307_v11 = vmul.f32 %v3048_v1, %v2203_v18  ;;  %v1308_v13 = vmul.f32 %v3242_v19, %v2205_v25  ;;  %v1420_v23 = vmul.f32 %v1418_v3, %v2928_v15  ;;  %v1463_v28 = vmul.f32 %v1462_v33, %v2787_v61  ;;  %s3582_s18 = sld [smem:[#allocation5 + $0x786]] }
 0x12c   :  { %v1416_v54 = vadd.f32 %v1414_v21, %v1410_v38  ;;  %v1459_v29 = vadd.f32 %v1457_v47, %v1453_v48  ;;  %v1460_v14 = vadd.f32 %v1458_v24, %v1454_v2  ;;  %v1464_v56 = vmul.f32 %v1462_v33, %v2794_v7 }
 0x12d   :  { %v1421_v50 = vadd.f32 %v1419_v44, %v1415_v27  ;;  %v1425_v16 = vmul.f32 %v1424_v39, %v2951_v12  ;;  %v1469_v1 = vmul.f32 %v1468_v45, %v2800_v34  ;;  %v1470_v31 = vmul.f32 %v1468_v45, %v2805_v6 }
 0x12e   :  { %v1465_v59 = vadd.f32 %v1463_v28, %v1459_v29  ;;  %v1466_v17 = vadd.f32 %v1464_v56, %v1460_v14  ;;  %v1474_v18 = vstv %s3407_s19  ;;  %v1480_v20 = vstv %s3413_s20  ;;  %s3595_s19 = sld [smem:[#allocation5 + $0x787]] }
 0x12f   :  { %v3444_v36 = vpop.eup %2206  ;;  %v3447_v3 = vadd.f32 %v885_v51, %v3386_v57  ;;  %2212 = vtanh.f32 %v1067_v0  ;;  %v1475_v43 = vmul.f32 %v1474_v18, %v2844_v26  ;;  %v1476_v10 = vmul.f32 %v1474_v18, %v2852_v60  ;;  %s3610_s20 = sld [smem:[#allocation7 + $0x5]] }
 0x130   :  { %v1422_v9 = vadd.f32 %v1420_v23, %v1416_v54  ;;  %v1426_v25 = vmul.f32 %v1424_v39, %v2955_v41  ;;  %v1471_v32 = vadd.f32 %v1469_v1, %v1465_v59  ;;  %v1472_v40 = vadd.f32 %v1470_v31, %v1466_v17 }
 0x131   :  { %v1128_v38 = vrot.slane %v3402_v62, 1  ;;  %v3458_v57 = vadd.f32 %v1188_v37, %v3381_v63  ;;  %v1481_v51 = vmul.f32 %v1480_v20, %v2891_v49  ;;  %v1486_v0 = vstv %s3422_s21  ;;  %s3615_s21 = sld [smem:[#allocation7 + $0x6]] }
 0x132   :  { %v2209_v21 = vpop.eup %2208  ;;  %v3463_v42 = vadd.f32 %v1248_v30, %v3397_v53  ;;  %v1309_v33 = vadd.f32 %v1308_v13, %v1307_v11  ;;  %v1427_v27 = vadd.f32 %v1425_v16, %v1421_v50  ;;  %v1477_v44 = vadd.f32 %v1475_v43, %v1471_v32 }
 0x133   :  { %v1478_v48 = vadd.f32 %v1476_v10, %v1472_v40  ;;  %v1482_v2 = vmul.f32 %v1480_v20, %v2928_v15  ;;  %v1508_v39 = vstv %s3428_s22  ;;  %v1512_v47 = vstv %s3434_s23  ;;  %s1904_s22 = sld [smem:[#allocation7 + $0x9]] }
 0x134   :  { %v2211_v63 = vpop.eup %2210  ;;  %v1428_v37 = vadd.f32 %v1426_v25, %v1422_v9  ;;  %v1487_v24 = vmul.f32 %v1486_v0, %v2951_v12  ;;  %v1509_v53 = vmul.f32 %v1508_v39, %v2670_v4  ;;  %v1510_v30 = vmul.f32 %v1508_v39, %v2705_v46  ;;  %v3511_v39 = vld [vmem:[%s3647_s0] sm:$0xff]  ;;  %s3521_s0 = sld [smem:[#allocation5 + $0x705]] }
 0x135   :  { %v1483_v45 = vadd.f32 %v1481_v51, %v1477_v44  ;;  %v1513_v11 = vmul.f32 %v1512_v47, %v2724_v5  ;;  %v1514_v13 = vmul.f32 %v1512_v47, %v2730_v8  ;;  %v1518_v23 = vstv %s3440_s24  ;;  %s1913_s23 = sld [smem:[#allocation7 + $0xa]] }
 0x136   :  { %2214 = vtanh.f32 %v1427_v27  ;;  %v1488_v28 = vmul.f32 %v1486_v0, %v2955_v41  ;;  %v1519_v54 = vmul.f32 %v1518_v23, %v2734_v55  ;;  %v1520_v29 = vmul.f32 %v1518_v23, %v2745_v35  ;;  %s1922_s24 = sld [smem:[#allocation7 + $0xb]] }
 0x137   :  { %v1484_v14 = vadd.f32 %v1482_v2, %v1478_v48  ;;  %v1515_v56 = vadd.f32 %v1513_v11, %v1509_v53  ;;  %v1516_v50 = vadd.f32 %v1514_v13, %v1510_v30  ;;  %v1524_v16 = vstv %s3451_s25  ;;  %s1931_s25 = sld [smem:[#allocation7 + $0xc]] }
 0x138   :  { %2216 = vtanh.f32 %v1428_v37  ;;  %v1525_v1 = vmul.f32 %v1524_v16, %v2787_v61  ;;  %v1526_v31 = vmul.f32 %v1524_v16, %v2794_v7  ;;  %v1530_v59 = vstv %s3454_s1  ;;  %s1940_s1 = sld [smem:[#allocation7 + $0xd]] }
 0x139   :  { %v3492_v17 = vadd.f32 %v1128_v38, %v3402_v62  ;;  %v1190_v18 = vrot.slane %v3458_v57, 1  ;;  %v1489_v20 = vadd.f32 %v1487_v24, %v1483_v45  ;;  %v1521_v43 = vadd.f32 %v1519_v54, %v1515_v56 }
 0x13a   :  { %v1310_v10 = vrot.slane %v1309_v33, 4  ;;  %v1522_v9 = vadd.f32 %v1520_v29, %v1516_v50  ;;  %v1531_v25 = vmul.f32 %v1530_v59, %v2800_v34  ;;  %v1532_v32 = vmul.f32 %v1530_v59, %v2805_v6 }
 0x13b   :  { %v1490_v40 = vadd.f32 %v1488_v28, %v1484_v14  ;;  %v1527_v51 = vadd.f32 %v1525_v1, %v1521_v43  ;;  %v1536_v0 = vstv %s3465_s2  ;;  %v1542_v27 = vstv %s3470_s26  ;;  %s1949_s2 = sld [smem:[#allocation7 + $0xe]] }
 0x13c   :  { %v3501_v44 = vpop.eup %2212  ;;  %v1250_v62 = vrot.slane %v3463_v42, 2  ;;  %v1528_v38 = vadd.f32 %v1526_v31, %v1522_v9  ;;  %v1537_v48 = vmul.f32 %v1536_v0, %v2844_v26  ;;  %v1538_v2 = vmul.f32 %v1536_v0, %v2852_v60  ;;  %s1958_s26 = sld [smem:[#allocation7 + $0xf]] }
 0x13d   :  { %v1369_v47 = vmul.f32 %v3511_v39, %v2209_v21  ;;  %2218 = vtanh.f32 %v1489_v20  ;;  %v1533_v37 = vadd.f32 %v1531_v25, %v1527_v51  ;;  %v1543_v24 = vmul.f32 %v1542_v27, %v2891_v49 }
 0x13e   :  { %v1370_v53 = vmul.f32 %v3242_v19, %v2211_v63  ;;  %v1534_v30 = vadd.f32 %v1532_v32, %v1528_v38  ;;  %v1544_v45 = vmul.f32 %v1542_v27, %v2928_v15  ;;  %v1548_v11 = vstv %s3481_s27  ;;  %s1959_s27 = sld [smem:[#allocation7 + $0x10]] }
 0x13f   :  { %v1311_v13 = vadd.f32 %v1310_v10, %v1309_v33  ;;  %2220 = vtanh.f32 %v1490_v40  ;;  %v1539_v23 = vadd.f32 %v1537_v48, %v1533_v37  ;;  %v1549_v21 = vmul.f32 %v1548_v11, %v2951_v12 }
 0x140   :  { %v1540_v28 = vadd.f32 %v1538_v2, %v1534_v30  ;;  %v1550_v54 = vmul.f32 %v1548_v11, %v2955_v41  ;;  %v1570_v29 = vstv %s3484_s28  ;;  %v1574_v14 = vstv %s3489_s30  ;;  %s2327_s28 = smov [#allocation8]  }
 0x141   :  { %v1545_v63 = vadd.f32 %v1543_v24, %v1539_v23  ;;  %v1571_v56 = vmul.f32 %v1570_v29, %v2670_v4  ;;  %v1572_v50 = vmul.f32 %v1570_v29, %v2705_v46  ;;  %v1575_v33 = vmul.f32 %v1574_v14, %v2724_v5  ;;  %s1704_s30 = sshll.u32 %s2327_s28, 4  ;;  %s1705_s30 = int_to_ptr.vmem [resolvable:$true] %s1704_s30 }
 0x142   :  { %v1371_v16 = vadd.f32 %v1370_v53, %v1369_v47  ;;  %v1546_v1 = vadd.f32 %v1544_v45, %v1540_v28  ;;  %v1576_v31 = vmul.f32 %v1574_v14, %v2730_v8  ;;  %v1580_v59 = vstv %s3497_s5  ;;  %s2296_s5 = scalar_lea.vmem %s1705_s30, 16  ;;  %p2301_p2 = scmp.lt.s32.totalorder %s1705_s30, %s1705_s30 }
 0x143   :  { %v2215_v20 = vpop.eup %2214  ;;  %v1551_v43 = vadd.f32 %v1549_v21, %v1545_v63  ;;  %v1577_v10 = vadd.f32 %v1575_v33, %v1571_v56  ;;  %v1581_v9 = vmul.f32 %v1580_v59, %v2734_v55  ;;  %v1582_v25 = vmul.f32 %v1580_v59, %v2745_v35  ;;  %p2297_p1 = scmp.ne.s32.totalorder %s1705_s30, %s2296_s5 }
 0x144   :  { %v3538_v32 = vadd.f32 %v1250_v62, %v3463_v42  ;;  %v1552_v40 = vadd.f32 %v1550_v54, %v1546_v1  ;;  %v1578_v51 = vadd.f32 %v1576_v31, %v1572_v50  ;;  %v1586_v0 = vstv %s3506_s6  ;;  %s2300_s6 = scalar_lea.vmem %s1705_s30, 32 }
 0x145   :  { %v2217_v27 = vpop.eup %2216  ;;  %2222 = vtanh.f32 %v1551_v43  ;;  %v1583_v38 = vadd.f32 %v1581_v9, %v1577_v10  ;;  %v1587_v48 = vmul.f32 %v1586_v0, %v2787_v61  ;;  %v1588_v2 = vmul.f32 %v1586_v0, %v2794_v7  ;;  %p2302_p3 = scmp.lt.s32.totalorder %s2300_s6, %s2296_s5 }
 0x146   :  { %v1312_v47 = vrot.slane %v1311_v13, 2  ;;  %v1372_v37 = vrot.slane %v1371_v16, 4  ;;  %2224 = vtanh.f32 %v1552_v40  ;;  %v1584_v42 = vadd.f32 %v1582_v25, %v1578_v51 }
 0x147   :  { %v1431_v62 = vmul.f32 %v3511_v39, %v2215_v20  ;;  %v1589_v24 = vadd.f32 %v1587_v48, %v1583_v38  ;;  %v1592_v53 = vstv %s3518_s8  ;;  %v1598_v30 = vstv %s3521_s0  ;;  %p2303_p4 = por %p2302_p3, %p2301_p2 }
 0x148   :  { %v1432_v45 = vmul.f32 %v3242_v19, %v2217_v27  ;;  %v1590_v11 = vadd.f32 %v1588_v2, %v1584_v42  ;;  %v1593_v23 = vmul.f32 %v1592_v53, %v2800_v34  ;;  %v1594_v21 = vmul.f32 %v1592_v53, %v2805_v6 }
 0x149   :  { %2226 = vtanh.f32 %v3492_v17  ;;  %v3561_v28 = vadd.f32 %v1190_v18, %v3458_v57  ;;  %v1599_v54 = vmul.f32 %v1598_v30, %v2844_v26  ;;  %v1600_v29 = vmul.f32 %v1598_v30, %v2852_v60  ;;  %p2304_p5 = pnand %p2303_p4, %p2297_p1 }
 0x14a   :  { %v2219_v14 = vpop.eup %2218  ;;  %v1252_v63 = vrot.slane %v3538_v32, 1  ;;  %v1595_v56 = vadd.f32 %v1593_v23, %v1589_v24  ;;  %v1596_v50 = vadd.f32 %v1594_v21, %v1590_v11  ;;  %v1604_v33 = vstv %s3531_s9 }
 0x14b   :  { %v3567_v1 = vadd.f32 %v1312_v47, %v1311_v13  ;;  %v3569_v17 = vadd.f32 %v1372_v37, %v1371_v16  ;;  %v1605_v31 = vmul.f32 %v1604_v33, %v2891_v49  ;;  %v1606_v57 = vmul.f32 %v1604_v33, %v2928_v15 }
 0x14c   :  { %v2221_v18 = vpop.eup %2220  ;;  %v1433_v59 = vadd.f32 %v1432_v45, %v1431_v62  ;;  %v1601_v20 = vadd.f32 %v1599_v54, %v1595_v56  ;;  %v1602_v43 = vadd.f32 %v1600_v29, %v1596_v50  ;;  %v1610_v10 = vstv %s3535_s11 }
 0x14d   :  { %v1493_v13 = vmul.f32 %v3511_v39, %v2219_v14  ;;  %v1611_v16 = vmul.f32 %v1610_v10, %v2951_v12  ;;  %v1612_v9 = vmul.f32 %v1610_v10, %v2955_v41  ;;  %v1632_v25 = vstv %s3541_s12 }
 0x14e   :  { %v1607_v40 = vadd.f32 %v1605_v31, %v1601_v20  ;;  %v1608_v51 = vadd.f32 %v1606_v57, %v1602_v43  ;;  %v1633_v0 = vmul.f32 %v1632_v25, %v2670_v4  ;;  %v1634_v27 = vmul.f32 %v1632_v25, %v2705_v46 }
 0x14f   :  { %v1494_v38 = vmul.f32 %v3242_v19, %v2221_v18  ;;  %v1636_v48 = vstv %s3545_s13  ;;  %v1642_v2 = vstv %s3547_s14  ;;  %v1648_v47 = vstv %s3552_s15 }
 0x150   :  { %v1613_v37 = vadd.f32 %v1611_v16, %v1607_v40  ;;  %v1614_v42 = vadd.f32 %v1612_v9, %v1608_v51  ;;  %v1637_v62 = vmul.f32 %v1636_v48, %v2724_v5  ;;  %v1638_v24 = vmul.f32 %v1636_v48, %v2730_v8 }
 0x151   :  { %v1434_v53 = vrot.slane %v1433_v59, 4  ;;  %v1643_v30 = vmul.f32 %v1642_v2, %v2734_v55  ;;  %v1644_v45 = vmul.f32 %v1642_v2, %v2745_v35  ;;  %v1649_v4 = vmul.f32 %v1648_v47, %v2787_v61 }
 0x152   :  { %v2223_v46 = vpop.eup %2222  ;;  %2228 = vtanh.f32 %v1613_v37  ;;  %v1639_v11 = vadd.f32 %v1637_v62, %v1633_v0  ;;  %v1640_v23 = vadd.f32 %v1638_v24, %v1634_v27  ;;  %v1650_v5 = vmul.f32 %v1648_v47, %v2794_v7 }
 0x153   :  { %v2225_v21 = vpop.eup %2224  ;;  %v1495_v54 = vadd.f32 %v1494_v38, %v1493_v13  ;;  %v1555_v8 = vmul.f32 %v3511_v39, %v2223_v46  ;;  %2230 = vtanh.f32 %v1614_v42  ;;  %v1654_v55 = vstv %s3573_s16 }
 0x154   :  { %v1556_v35 = vmul.f32 %v3242_v19, %v2225_v21  ;;  %v1645_v61 = vadd.f32 %v1643_v30, %v1639_v11  ;;  %v1646_v29 = vadd.f32 %v1644_v45, %v1640_v23  ;;  %v1655_v14 = vmul.f32 %v1654_v55, %v2800_v34 }
 0x155   :  { %v1374_v56 = vrot.slane %v3569_v17, 2  ;;  %v1656_v50 = vmul.f32 %v1654_v55, %v2805_v6  ;;  %v1660_v33 = vstv %s3576_s17  ;;  %v1666_v31 = vstv %s3582_s18 }
 0x156   :  { %v2227_v7 = vpop.eup %2226  ;;  %v1435_v57 = vadd.f32 %v1434_v53, %v1433_v59  ;;  %v1651_v18 = vadd.f32 %v1649_v4, %v1645_v61  ;;  %v1652_v20 = vadd.f32 %v1650_v5, %v1646_v29  ;;  %v1661_v43 = vmul.f32 %v1660_v33, %v2844_v26 }
 0x157   :  { %v947_v10 = vmul.f32 %v3392_v22, %v946_v58  ;;  %v1496_v13 = vrot.slane %v1495_v54, 4  ;;  %v1557_v34 = vadd.f32 %v1556_v35, %v1555_v8  ;;  %v1662_v16 = vmul.f32 %v1660_v33, %v2852_v60 }
 0x158   :  { %v1657_v9 = vadd.f32 %v1655_v14, %v1651_v18  ;;  %v1658_v6 = vadd.f32 %v1656_v50, %v1652_v20  ;;  %v1667_v25 = vmul.f32 %v1666_v31, %v2891_v49  ;;  %v1668_v59 = vmul.f32 %v1666_v31, %v2928_v15 }
 0x159   :  { %2232 = vtanh.f32 %v3561_v28  ;;  %v1253_v26 = vadd.f32 %v1252_v63, %v3538_v32  ;;  %v1314_v58 = vrot.slane %v3567_v1, 1  ;;  %v1672_v22 = vstv %s3595_s19 }
 0x15a   :  { %v1375_v60 = vadd.f32 %v1374_v56, %v3569_v17  ;;  %v1436_v40 = vrot.slane %v1435_v57, 2  ;;  %v1663_v51 = vadd.f32 %v1661_v43, %v1657_v9  ;;  %v1664_v0 = vadd.f32 %v1662_v16, %v1658_v6 }
 0x15b   :  { %v1497_v49 = vadd.f32 %v1496_v13, %v1495_v54  ;;  %v1558_v15 = vrot.slane %v1557_v34, 4  ;;  %v1673_v27 = vmul.f32 %v1672_v22, %v2951_v12  ;;  %v1674_v38 = vmul.f32 %v1672_v22, %v2955_v41 }
 0x15c   :  { %v1669_v28 = vadd.f32 %v1667_v25, %v1663_v51  ;;  %v1670_v48 = vadd.f32 %v1668_v59, %v1664_v0  ;;  %v948_v2 = vadd.f32 %v947_v10, %v3447_v3  ;;  %v1009_v32 = vmul.f32 %v3444_v36, %v1008_v52 }
 0x15d   :  { %2234 = vtanh.f32 %v1253_v26  ;;  %v1315_v63 = vadd.f32 %v1314_v58, %v3567_v1  ;;  %v1376_v17 = vrot.slane %v1375_v60, 1  ;;  %v1070_v12 = vstv %s3610_s20 }
 0x15e   :  { %v1675_v47 = vadd.f32 %v1673_v27, %v1669_v28  ;;  %v1676_v37 = vadd.f32 %v1674_v38, %v1670_v48  ;;  %v1437_v62 = vadd.f32 %v1436_v40, %v1435_v57  ;;  %v1498_v41 = vrot.slane %v1497_v49, 2 }
 0x15f   :  { %v2229_v42 = vpop.eup %2228  ;;  %v1559_v24 = vadd.f32 %v1558_v15, %v1557_v34  ;;  %v1132_v30 = vstv %s3615_s21  ;;  %v1010_v36 = vadd.f32 %v1009_v32, %v948_v2  ;;  %v1071_v1 = vmul.f32 %v3501_v44, %v1070_v12 }
 0x160   :  { %v2231_v53 = vpop.eup %2230  ;;  %v1617_v3 = vmul.f32 %v3511_v39, %v2229_v42  ;;  %2236 = vtanh.f32 %v1675_v47  ;;  %v1377_v45 = vadd.f32 %v1376_v17, %v1375_v60  ;;  %v1438_v4 = vrot.slane %v1437_v62, 1 }
 0x161   :  { %v1618_v52 = vmul.f32 %v3242_v19, %v2231_v53  ;;  %2238 = vtanh.f32 %v1676_v37  ;;  %v1499_v46 = vadd.f32 %v1498_v41, %v1497_v49  ;;  %v1560_v11 = vrot.slane %v1559_v24, 2 }
 0x162   :  { %2240 = vtanh.f32 %v1315_v63  ;;  %v1072_v54 = vadd.f32 %v1071_v1, %v1010_v36  ;;  %v1133_v8 = vmul.f32 %v2227_v7, %v1132_v30  ;;  %v1194_v55 = vstv %s3630_s29 }
 0x163   :  { %v1619_v23 = vadd.f32 %v1618_v52, %v1617_v3  ;;  %2242 = vtanh.f32 %v1377_v45  ;;  %v1439_v35 = vadd.f32 %v1438_v4, %v1437_v62  ;;  %v1500_v61 = vrot.slane %v1499_v46, 1 }
 0x164   :  { %v1561_v29 = vadd.f32 %v1560_v11, %v1559_v24  ;;  %v1134_v50 = vadd.f32 %v1133_v8, %v1072_v54  ;;  %v1256_v31 = vstv %s3638_s10  ;;  %v1318_v59 = vstv %s1904_s22 }
 0x165   :  { %v1620_v5 = vrot.slane %v1619_v23, 4  ;;  %2244 = vtanh.f32 %v1439_v35  ;;  %v1501_v57 = vadd.f32 %v1500_v61, %v1499_v46  ;;  %v1380_v0 = vstv %s1913_s23 }
 0x166   :  { %v2233_v21 = vpop.eup %2232  ;;  %v1562_v18 = vrot.slane %v1561_v29, 1  ;;  %v1442_v28 = vstv %s1922_s24  ;;  %v1504_v17 = vstv %s1931_s25  ;;  %v1566_v62 = vstv %s1940_s1 }
 0x167   :  { %v1621_v14 = vadd.f32 %v1620_v5, %v1619_v23  ;;  %v1195_v33 = vmul.f32 %v2233_v21, %v1194_v55  ;;  %2246 = vtanh.f32 %v1501_v57  ;;  %v1628_v3 = vstv %s1949_s2 }
 0x168   :  { %v1563_v9 = vadd.f32 %v1562_v18, %v1561_v29  ;;  %v1690_v36 = vstv %s1958_s26  ;;  %v1694_v46 = vstv %s1959_s27 }
 0x169   :  { %v1622_v44 = vrot.slane %v1621_v14, 2  ;;  %v1196_v7 = vadd.f32 %v1195_v33, %v1134_v50 }
 0x16a   :  { %v2235_v56 = vpop.eup %2234  ;;  %2248 = vtanh.f32 %v1563_v9 }
 0x16b   :  { %v1623_v20 = vadd.f32 %v1622_v44, %v1621_v14  ;;  %v1257_v13 = vmul.f32 %v2235_v56, %v1256_v31 }
 0x16d   :  { %v2237_v43 = vpop.eup %2236  ;;  %v1624_v6 = vrot.slane %v1623_v20, 1  ;;  %v1258_v58 = vadd.f32 %v1257_v13, %v1196_v7 }
 0x16e   :  { %v2239_v10 = vpop.eup %2238  ;;  %v1679_v34 = vmul.f32 %v3511_v39, %v2237_v43 }
 0x16f   :  { %v2241_v16 = vpop.eup %2240  ;;  %v1680_v25 = vmul.f32 %v3242_v19, %v2239_v10  ;;  %v1625_v40 = vadd.f32 %v1624_v6, %v1623_v20 }
 0x170   :  { %v2243_v22 = vpop.eup %2242  ;;  %v1319_v60 = vmul.f32 %v2241_v16, %v1318_v59 }
 0x171   :  { %v1681_v26 = vadd.f32 %v1680_v25, %v1679_v34  ;;  %v1381_v39 = vmul.f32 %v2243_v22, %v1380_v0  ;;  %2250 = vtanh.f32 %v1625_v40 }
 0x172   :  { %v1320_v15 = vadd.f32 %v1319_v60, %v1258_v58  ;;  %v2245_v38 = vpop.eup %2244 }
 0x173   :  { %v1682_v51 = vrot.slane %v1681_v26, 4  ;;  %v1443_v2 = vmul.f32 %v2245_v38, %v1442_v28 }
 0x174   :  { %v1382_v48 = vadd.f32 %v1381_v39, %v1320_v15  ;;  %v2247_v63 = vpop.eup %2246 }
 0x175   :  { %v1683_v49 = vadd.f32 %v1682_v51, %v1681_v26  ;;  %v1505_v42 = vmul.f32 %v2247_v63, %v1504_v17 }
 0x176   :  { %v1444_v37 = vadd.f32 %v1443_v2, %v1382_v48 }
 0x177   :  { %v1684_v27 = vrot.slane %v1683_v49, 2  ;;  %v2249_v12 = vpop.eup %2248 }
 0x178   :  { %v1506_v41 = vadd.f32 %v1505_v42, %v1444_v37  ;;  %v1567_v24 = vmul.f32 %v2249_v12, %v1566_v62 }
 0x179   :  { %v1685_v19 = vadd.f32 %v1684_v27, %v1683_v49 }
 0x17a   :  { %v1568_v30 = vadd.f32 %v1567_v24, %v1506_v41 }
 0x17b   :  { %v1686_v32 = vrot.slane %v1685_v19, 1 }
 0x17d   :  { %v1687_v47 = vadd.f32 %v1686_v32, %v1685_v19 }
 0x17e   :  { %v2251_v53 = vpop.eup %2250 }
 0x17f   :  { %2252 = vtanh.f32 %v1687_v47  ;;  %v1629_v52 = vmul.f32 %v2251_v53, %v1628_v3 }
 0x181   :  { %v1630_v1 = vadd.f32 %v1629_v52, %v1568_v30 }
 0x18c   :  { %v2253_v45 = vpop.eup %2252 }
 0x18d   :  { %v1691_v4 = vmul.f32 %v2253_v45, %v1690_v36 }
 0x18f   :  { %v1692_v11 = vadd.f32 %v1691_v4, %v1630_v1 }
 0x191   :  { %v1695_v23 = vadd.f32 %v1694_v46, %v1692_v11 }
 0x193   :  { %2254 = vtanh.f32 %v1695_v23 }
 0x1a0   :  { %v2255_v5 = vpop.eup %2254 }
 0x1a1   :  { %1697 = vst [vmem:[#allocation8] sm:$0x1] %v2255_v5 }
 0x1a2   :  { %2307 = shalt.err (!%p2304_p5)
}
 0x1a3   :  { %1707 = dma.vmem_to_hbm [thread:$0]  %s1705_s30, 16, %s3651_s4, [#allocation3]  }
 0x1a4   :  { %2320 = dma.done.wait [#allocation3], 16  }
 0x1a5   :  { %2321 = vsyncadd [#allocation3], 4294967280 }
 0x1a6   :  { %1711 = vsyncpa [#allocation3], 1 }
 0x1a7   :  { %1712 = vsyncpa [#allocation4], 1 }
 0x1a8   :  { %1713 = vsyncpa [#allocation6], 1 }

</bundles_post_ra>
